<compile_context>
chip_gen: v6e
topology: v6e:2x2x1
jax: 0.10.0
libtpu: 0.0.40
codegen_flags: <defaults>
</compile_context>

<pallas_src>
import jax
import jax.numpy as jnp
from jax.experimental import pallas as pl
from jax.experimental.pallas import tpu as pltpu


NEG_SLOPE = 0.1


def _leaky(v):
    return jnp.where(v > 0, v, NEG_SLOPE * v)


# ------------------------------- Pallas kernel --------------------------------

def msrg_kernel(xs_ref, wdn_ref, bdn_ref, w1_ref, b1_ref, w2_ref, b2_ref,
                wdt_ref, bd_ref, wu_ref, bu_ref, wl_ref, bl_ref, wup_ref, bup_ref,
                o_ref):
    """Full MultyScaleResidualGroup forward for one batch element (grid axis = batch).

    xs_ref/o_ref: (1, Hs, Ws, 4C) space-to-depth NHWC view, channel q = (2r+s)*C + c
    holds x[2i+r, 2j+s, c].  Trailing dim 4C = 128 -> lane-dense I/O.
    """
    _, Hs, Ws, C4 = xs_ref.shape
    C = C4 // 4
    HW = Hs * Ws
    n_blocks = w1_ref.shape[0]
    bf16 = jnp.bfloat16

    def mm(lhs, rhs):                       # bf16 operands, f32 accumulation on the MXU
        return jnp.dot(lhs, rhs, preferred_element_type=jnp.float32)

    def patches3x3(t_f32):
        """(HW, C) f32 activation -> (HW, 9C) bf16 im2col patches (zero 'same' halo)."""
        tb = t_f32.astype(bf16).reshape(Hs, Ws, C)
        zr = jnp.zeros((1, Ws, C), bf16)
        zc = jnp.zeros((Hs + 2, 1, C), bf16)
        tp = jnp.concatenate([zr, tb, zr], axis=0)
        tp = jnp.concatenate([zc, tp, zc], axis=1)                # (Hs+2, Ws+2, C)
        return jnp.concatenate(
            [tp[kh:kh + Hs, kw:kw + Ws, :].reshape(HW, C)
             for kh in range(3) for kw in range(3)], axis=-1)     # (HW, 9C)

    def conv3x3(t_f32, w, b):
        return mm(patches3x3(t_f32), w) + b                       # (HW, Cout) f32

    xs = xs_ref[0]                                                # (Hs, Ws, 4C) f32
    xb = xs.astype(bf16)

    # ---------------- down: Conv3x3 stride-2 pad-1 + LeakyReLU ----------------
    # On the s2d view this is a 2x2 conv over 4C channels: ONE K = 16C matmul.
    zr = jnp.zeros((1, Ws, C4), bf16)
    zc = jnp.zeros((Hs, 1, C4), bf16)
    x_m0 = jnp.concatenate([zr, xb[:-1]], axis=0)                 # row offset -1
    x_0m = jnp.concatenate([zc, xb[:, :-1]], axis=1)              # col offset -1
    x_mm = jnp.concatenate([zc, x_m0[:, :-1]], axis=1)            # row & col offset -1
    lhs = jnp.concatenate([x_mm.reshape(HW, C4), x_m0.reshape(HW, C4),
                           x_0m.reshape(HW, C4), xb.reshape(HW, C4)], axis=-1)
    t = _leaky(mm(lhs, wdn_ref[...]) + bdn_ref[...])              # (HW, C) f32

    # ---------------- body: n_resblocks RCABs (fori_loop, streamed weights) ----
    def rcab(blk, t):
        a1 = jnp.maximum(conv3x3(t, w1_ref[blk], b1_ref[blk]), 0.0)
        a2 = conv3x3(a1, w2_ref[blk], b2_ref[blk])
        # CALayer on the VPU/XLU: GAP -> 1x1 -> ReLU -> 1x1 -> sigmoid -> channel scale
        z = jnp.mean(a2, axis=0, keepdims=True)                               # (1, C)
        d = jnp.maximum(jnp.sum(z * wdt_ref[blk], axis=1, keepdims=True)
                        + bd_ref[blk], 0.0)                                   # (mid, 1)
        y = jax.nn.sigmoid(jnp.sum(d * wu_ref[blk], axis=0, keepdims=True)
                           + bu_ref[blk])                                     # (1, C)
        return a2 * y + t                                                     # RCAB residual

    t = jax.lax.fori_loop(0, n_blocks, rcab, t)
    t = conv3x3(t, wl_ref[...], bl_ref[...])                      # trailing body conv

    # ------ up: ConvTranspose4x4 stride-2 pad-1 + LeakyReLU + outer residual ------
    # All 4 sub-pixel parities come out of ONE matmul with N = 4C = 128 (lane-dense).
    u = mm(patches3x3(t), wup_ref[...]) + bup_ref[...]            # (HW, 4C) f32
    out = _leaky(u) + xs.reshape(HW, C4)
    o_ref[0] = out.reshape(Hs, Ws, C4)


# --------------------------------- Wrapper ------------------------------------

@jax.jit
def msrg_forward(x_nchw, wdn, bdn, w1s, b1s, w2s, b2s, wdts, bds, wus, bus,
                 wl, bl, wup, bup):
    """x_nchw: (B, C, H, W) float32 with even H, W.  Returns (B, C, H, W) float32."""
    B, C, H, W = x_nchw.shape
    Hs, Ws = H // 2, W // 2
    C4 = 4 * C

    # NCHW -> space-to-depth NHWC (channel q = (2r+s)*C + c); trailing dim 4C = 128.
    # TODO(synk): fuse these layout transposes into neighbouring model ops in a full net.
    xs = jnp.transpose(x_nchw.reshape(B, C, Hs, 2, Ws, 2), (0, 2, 4, 3, 5, 1))
    xs = xs.reshape(B, Hs, Ws, C4).astype(jnp.float32)

    weights = (wdn, bdn, w1s, b1s, w2s, b2s, wdts, bds, wus, bus, wl, bl, wup, bup)

    out = pl.pallas_call(
        msrg_kernel,
        out_shape=jax.ShapeDtypeStruct((B, Hs, Ws, C4), jnp.float32),
        grid=(B,),
        in_specs=[pl.BlockSpec((1, Hs, Ws, C4), lambda b: (b, 0, 0, 0))]
                 + [pl.BlockSpec(w.shape, lambda b, n=w.ndim: (0,) * n) for w in weights],
        out_specs=pl.BlockSpec((1, Hs, Ws, C4), lambda b: (b, 0, 0, 0)),
        input_output_aliases={0: 0},          # output reuses xs's HBM buffer
        compiler_params=pltpu.CompilerParams(
            dimension_semantics=("parallel",),
            # blocks (2 x 32 KiB x 2 buf) + bf16 weights (~250 KiB x 2 buf) << 32 MiB
            vmem_limit_bytes=32 * 1024 * 1024),
    )(xs, *weights)

    # depth-to-space back to NCHW
    out = jnp.transpose(out.reshape(B, Hs, Ws, 2, 2, C), (0, 5, 1, 3, 2, 4))
    return out.reshape(B, C, H, W)


# --------------------------- Weight layout packing -----------------------------

def _pack_conv3x3(w_pt):
    """PyTorch Conv2d weight (Cout, Cin, 3, 3) -> bf16 im2col RHS (9*Cin, Cout)."""
    cout, cin = w_pt.shape[:2]
    return jnp.transpose(w_pt, (2, 3, 1, 0)).reshape(9 * cin, cout).astype(jnp.bfloat16)


# (s2d row/col offset, parity) -> 3x3 kernel tap index for the stride-2 conv.
_KH_DOWN = {(-1, 1): 0, (0, 0): 1, (0, 1): 2}


def _pack_down(w_pt):
    """Conv2d(C,C,3,s=2,p=1) weight (Cout, Cin, 3, 3) -> bf16 RHS (16*Cin, Cout).

    Row order: taps (off_r, off_c) in [(-1,-1),(-1,0),(0,-1),(0,0)]; within a tap the
    channel order is the s2d order (2r+s)*Cin + cin.  Unused (offset, parity) pairs
    are zero blocks."""
    cout, cin = w_pt.shape[:2]
    zero = jnp.zeros((cin, cout), jnp.float32)
    rows = []
    for off_r in (-1, 0):
        for off_c in (-1, 0):
            for r in (0, 1):
                for s in (0, 1):
                    kh = _KH_DOWN.get((off_r, r))
                    kw = _KH_DOWN.get((off_c, s))
                    rows.append(zero if kh is None or kw is None
                                else w_pt[:, :, kh, kw].T)
    return jnp.concatenate(rows, axis=0).astype(jnp.bfloat16)


# (output parity, input offset) -> 4x4 kernel tap index for ConvTranspose2d(4, s=2, p=1).
_KH_UP = {(0, -1): 3, (0, 0): 1, (1, 0): 2, (1, 1): 0}


def _pack_up(w_pt):
    """ConvTranspose2d weight (Cin, Cout, 4, 4) -> bf16 combined RHS (9*Cin, 4*Cout).

    Rows follow the 3x3 im2col tap order (oh-major, ow-minor, cin within); columns are
    the s2d output channel order (2r+s)*Cout + cout.  Unused taps are zero blocks."""
    cin, cout = w_pt.shape[:2]
    zero = jnp.zeros((cin, cout), jnp.float32)
    cols = []
    for r in (0, 1):
        for s in (0, 1):
            rows = []
            for oh in (-1, 0, 1):
                for ow in (-1, 0, 1):
                    kh = _KH_UP.get((r, oh))
                    kw = _KH_UP.get((s, ow))
                    rows.append(zero if kh is None or kw is None
                                else w_pt[:, :, kh, kw])
            cols.append(jnp.concatenate(rows, axis=0))
    return jnp.concatenate(cols, axis=1).astype(jnp.bfloat16)


# ----------------------------- Pure-JAX reference ------------------------------

def msrg_reference(x_nchw, rp):
    hi = jax.lax.Precision.HIGHEST
    x = jnp.transpose(x_nchw, (0, 2, 3, 1))

    def conv(v, w_hwio, b, stride=1):
        return jax.lax.conv_general_dilated(
            v, w_hwio, (stride, stride), [(1, 1), (1, 1)],
            dimension_numbers=('NHWC', 'HWIO', 'NHWC'), precision=hi) + b

    lrelu = lambda v: jnp.where(v > 0, v, NEG_SLOPE * v)

    t = lrelu(conv(x, rp['wdown'], rp['bdown'], stride=2))
    for blk in range(len(rp['w1'])):
        a1 = jax.nn.relu(conv(t, rp['w1'][blk], rp['b1'][blk]))
        a2 = conv(a1, rp['w2'][blk], rp['b2'][blk])
        y = jnp.mean(a2, axis=(1, 2), keepdims=True)
        y = jax.nn.relu(jnp.einsum('bijc,cm->bijm', y, rp['wd'][blk], precision=hi)
                        + rp['bd'][blk])
        y = jax.nn.sigmoid(jnp.einsum('bijm,mc->bijc', y, rp['wu'][blk], precision=hi)
                           + rp['bu'][blk])
        t = a2 * y + t
    t = conv(t, rp['wlast'], rp['blast'])
    u = jax.lax.conv_general_dilated(
        t, rp['wup_flip'], (1, 1), [(2, 2), (2, 2)], lhs_dilation=(2, 2),
        dimension_numbers=('NHWC', 'HWIO', 'NHWC'), precision=hi) + rp['bup']
    out = lrelu(u) + x
    return jnp.transpose(out, (0, 3, 1, 2))


# ------------------------------------ main -------------------------------------

if __name__ == "__main__":
    B, C, H, W = 2, 32, 16, 16          # n_feat=32, even spatial dims for the stride-2 path
    reduction, n_resblocks = 4, 2
    mid = C // reduction

    key = jax.random.PRNGKey(0)
    keys = iter(jax.random.split(key, 40))
    rnd = lambda shape, scale: jax.random.normal(next(keys), shape, jnp.float32) * scale

    x = rnd((B, C, H, W), 0.5)

    # Parameters generated in native PyTorch layouts.
    wdown_pt, bdown = rnd((C, C, 3, 3), 0.05), rnd((C,), 0.05)          # Conv2d(3, s=2, p=1)
    w1_pt = [rnd((C, C, 3, 3), 0.05) for _ in range(n_resblocks)]
    b1 = [rnd((C,), 0.05) for _ in range(n_resblocks)]
    w2_pt = [rnd((C, C, 3, 3), 0.05) for _ in range(n_resblocks)]
    b2 = [rnd((C,), 0.05) for _ in range(n_resblocks)]
    wd_pt = [rnd((mid, C, 1, 1), 0.1) for _ in range(n_resblocks)]      # CA 1x1 down
    bd = [rnd((mid,), 0.1) for _ in range(n_resblocks)]
    wu_pt = [rnd((C, mid, 1, 1), 0.1) for _ in range(n_resblocks)]      # CA 1x1 up
    bu = [rnd((C,), 0.1) for _ in range(n_resblocks)]
    wlast_pt, blast = rnd((C, C, 3, 3), 0.05), rnd((C,), 0.05)          # trailing body conv
    wup_pt, bup = rnd((C, C, 4, 4), 0.05), rnd((C,), 0.05)              # ConvTranspose2d(4,2,1)

    # ---- kernel-layout parameters (matmul weights pre-cast to bf16) ----
    out = msrg_forward(
        x,
        _pack_down(wdown_pt), bdown.reshape(1, C),
        jnp.stack([_pack_conv3x3(w) for w in w1_pt]),
        jnp.stack([b.reshape(1, C) for b in b1]),
        jnp.stack([_pack_conv3x3(w) for w in w2_pt]),
        jnp.stack([b.reshape(1, C) for b in b2]),
        jnp.stack([w[:, :, 0, 0] for w in wd_pt]),          # (mid, C)  CA down, VPU form
        jnp.stack([b.reshape(mid, 1) for b in bd]),
        jnp.stack([w[:, :, 0, 0].T for w in wu_pt]),        # (mid, C)  CA up, VPU form
        jnp.stack([b.reshape(1, C) for b in bu]),
        _pack_conv3x3(wlast_pt), blast.reshape(1, C),
        _pack_up(wup_pt), jnp.tile(bup, (4,)).reshape(1, 4 * C),
    )
    out = jax.block_until_ready(out)

    # ---- reference-layout parameters (HWIO) ----
    hwio = lambda w: jnp.transpose(w, (2, 3, 1, 0))
    rp = dict(
        wdown=hwio(wdown_pt), bdown=bdown,
        w1=[hwio(w) for w in w1_pt], b1=b1,
        w2=[hwio(w) for w in w2_pt], b2=b2,
        wd=[w[:, :, 0, 0].T for w in wd_pt], bd=bd,
        wu=[w[:, :, 0, 0].T for w in wu_pt], bu=bu,
        wlast=hwio(wlast_pt), blast=blast,
        wup_flip=jnp.transpose(wup_pt[:, :, ::-1, ::-1], (2, 3, 0, 1)), bup=bup,
    )
    ref = msrg_reference(x, rp)

    assert out.shape == (B, C, H, W) and out.dtype == jnp.float32
    err = jnp.max(jnp.abs(out - ref))
    # bf16 MXU operands vs an f32 HIGHEST reference -> slightly relaxed tolerance.
    assert jnp.allclose(out, ref, rtol=2e-2, atol=2e-2), f"max abs diff {err}"

    print("KERNEL_OK")
</pallas_src>

<mosaic_0001>
module attributes {stable_mosaic.version = 11 : i64} {
  func.func @msrg_kernel(%arg0: i32, %arg1: memref<1x8x8x128xf32, #tpu.memory_space<vmem>>, %arg2: memref<512x32xbf16, #tpu.memory_space<vmem>>, %arg3: memref<1x32xf32, #tpu.memory_space<vmem>>, %arg4: memref<2x288x32xbf16, #tpu.memory_space<vmem>>, %arg5: memref<2x1x32xf32, #tpu.memory_space<vmem>>, %arg6: memref<2x288x32xbf16, #tpu.memory_space<vmem>>, %arg7: memref<2x1x32xf32, #tpu.memory_space<vmem>>, %arg8: memref<2x8x32xf32, #tpu.memory_space<vmem>>, %arg9: memref<2x8x1xf32, #tpu.memory_space<vmem>>, %arg10: memref<2x8x32xf32, #tpu.memory_space<vmem>>, %arg11: memref<2x1x32xf32, #tpu.memory_space<vmem>>, %arg12: memref<288x32xbf16, #tpu.memory_space<vmem>>, %arg13: memref<1x32xf32, #tpu.memory_space<vmem>>, %arg14: memref<288x128xbf16, #tpu.memory_space<vmem>>, %arg15: memref<1x128xf32, #tpu.memory_space<vmem>>, %arg16: memref<1x8x8x128xf32, #tpu.memory_space<vmem>>) attributes {dimension_semantics = [#tpu.dimension_semantics<parallel>], iteration_bounds = array<i64: 2>, scalar_prefetch = 0 : i64, scratch_operands = 0 : i64, tpu.core_type = #tpu.core_type<tc>, window_params = [{transform_indices = @transform_0, window_bounds = array<i64: 1, 8, 8, 128>}, {pipeline_mode = #tpu.pipeline_mode<synchronous>, transform_indices = @transform_1, window_bounds = array<i64: 512, 32>}, {pipeline_mode = #tpu.pipeline_mode<synchronous>, transform_indices = @transform_2, window_bounds = array<i64: 1, 32>}, {pipeline_mode = #tpu.pipeline_mode<synchronous>, transform_indices = @transform_3, window_bounds = array<i64: 2, 288, 32>}, {pipeline_mode = #tpu.pipeline_mode<synchronous>, transform_indices = @transform_4, window_bounds = array<i64: 2, 1, 32>}, {pipeline_mode = #tpu.pipeline_mode<synchronous>, transform_indices = @transform_5, window_bounds = array<i64: 2, 288, 32>}, {pipeline_mode = #tpu.pipeline_mode<synchronous>, transform_indices = @transform_6, window_bounds = array<i64: 2, 1, 32>}, {pipeline_mode = #tpu.pipeline_mode<synchronous>, transform_indices = @transform_7, window_bounds = array<i64: 2, 8, 32>}, {pipeline_mode = #tpu.pipeline_mode<synchronous>, transform_indices = @transform_8, window_bounds = array<i64: 2, 8, 1>}, {pipeline_mode = #tpu.pipeline_mode<synchronous>, transform_indices = @transform_9, window_bounds = array<i64: 2, 8, 32>}, {pipeline_mode = #tpu.pipeline_mode<synchronous>, transform_indices = @transform_10, window_bounds = array<i64: 2, 1, 32>}, {pipeline_mode = #tpu.pipeline_mode<synchronous>, transform_indices = @transform_11, window_bounds = array<i64: 288, 32>}, {pipeline_mode = #tpu.pipeline_mode<synchronous>, transform_indices = @transform_12, window_bounds = array<i64: 1, 32>}, {pipeline_mode = #tpu.pipeline_mode<synchronous>, transform_indices = @transform_13, window_bounds = array<i64: 288, 128>}, {pipeline_mode = #tpu.pipeline_mode<synchronous>, transform_indices = @transform_14, window_bounds = array<i64: 1, 128>}, {transform_indices = @transform_15, window_bounds = array<i64: 1, 8, 8, 128>}]} {
    %c0 = arith.constant 0 : index
    %c0_0 = arith.constant 0 : index
    %c0_1 = arith.constant 0 : index
    %c0_2 = arith.constant 0 : index
    %0 = vector.load %arg1[%c0, %c0_0, %c0_1, %c0_2] : memref<1x8x8x128xf32, #tpu.memory_space<vmem>>, vector<1x8x8x128xf32>
    %1 = vector.shape_cast %0 : vector<1x8x8x128xf32> to vector<8x8x128xf32>
    %2 = arith.truncf %1 : vector<8x8x128xf32> to vector<8x8x128xbf16>
    %cst = arith.constant 0.000000e+00 : bf16
    %3 = vector.broadcast %cst : bf16 to vector<1x8x128xbf16>
    %cst_3 = arith.constant 0.000000e+00 : bf16
    %4 = vector.broadcast %cst_3 : bf16 to vector<8x1x128xbf16>
    %5 = vector.extract_strided_slice %2 {offsets = [0, 0, 0], sizes = [7, 8, 128], strides = [1, 1, 1]} : vector<8x8x128xbf16> to vector<7x8x128xbf16>
    %6 = tpu.concatenate %3, %5 in 0 : vector<1x8x128xbf16>, vector<7x8x128xbf16> -> vector<8x8x128xbf16>
    %7 = vector.extract_strided_slice %2 {offsets = [0, 0, 0], sizes = [8, 7, 128], strides = [1, 1, 1]} : vector<8x8x128xbf16> to vector<8x7x128xbf16>
    %8 = tpu.concatenate %4, %7 in 1 : vector<8x1x128xbf16>, vector<8x7x128xbf16> -> vector<8x8x128xbf16>
    %9 = vector.extract_strided_slice %6 {offsets = [0, 0, 0], sizes = [8, 7, 128], strides = [1, 1, 1]} : vector<8x8x128xbf16> to vector<8x7x128xbf16>
    %10 = tpu.concatenate %4, %9 in 1 : vector<8x1x128xbf16>, vector<8x7x128xbf16> -> vector<8x8x128xbf16>
    %11 = vector.shape_cast %10 : vector<8x8x128xbf16> to vector<64x128xbf16>
    %12 = vector.shape_cast %6 : vector<8x8x128xbf16> to vector<64x128xbf16>
    %13 = vector.shape_cast %8 : vector<8x8x128xbf16> to vector<64x128xbf16>
    %14 = vector.shape_cast %2 : vector<8x8x128xbf16> to vector<64x128xbf16>
    %15 = tpu.concatenate %11, %12, %13, %14 in 1 : vector<64x128xbf16>, vector<64x128xbf16>, vector<64x128xbf16>, vector<64x128xbf16> -> vector<64x512xbf16>
    %c0_4 = arith.constant 0 : index
    %c0_5 = arith.constant 0 : index
    %16 = vector.load %arg2[%c0_4, %c0_5] : memref<512x32xbf16, #tpu.memory_space<vmem>>, vector<512x32xbf16>
    %cst_6 = arith.constant dense<0.000000e+00> : vector<64x32xf32>
    %17 = tpu.matmul %15, %16, %cst_6 {dimension_numbers = #tpu.dot_dimension_numbers<[1], [0], [0], [1], [0, 0, 1, 1], [], []>} : vector<64x512xbf16>, vector<512x32xbf16>, vector<64x32xf32> -> vector<64x32xf32>
    %c0_7 = arith.constant 0 : index
    %c0_8 = arith.constant 0 : index
    %18 = vector.load %arg3[%c0_7, %c0_8] : memref<1x32xf32, #tpu.memory_space<vmem>>, vector<1x32xf32>
    %19 = vector.broadcast %18 : vector<1x32xf32> to vector<64x32xf32>
    %20 = arith.addf %17, %19 : vector<64x32xf32>
    %cst_9 = arith.constant 0.000000e+00 : f32
    %21 = vector.broadcast %cst_9 : f32 to vector<64x32xf32>
    %22 = arith.cmpf ogt, %20, %21 : vector<64x32xf32>
    %cst_10 = arith.constant 1.000000e-01 : f32
    %23 = vector.broadcast %cst_10 : f32 to vector<64x32xf32>
    %24 = arith.mulf %23, %20 : vector<64x32xf32>
    %25 = arith.select %22, %20, %24 : vector<64x32xi1>, vector<64x32xf32>
    %c0_i32 = arith.constant 0 : i32
    %c2_i32 = arith.constant 2 : i32
    %26 = arith.addi %c0_i32, %c2_i32 : i32
    %c1_i32 = arith.constant 1 : i32
    %27 = scf.for %arg17 = %c0_i32 to %26 step %c1_i32 iter_args(%arg18 = %25) -> (vector<64x32xf32>)  : i32 {
      %99 = arith.index_cast %arg17 : i32 to index
      %c0_32 = arith.constant 0 : index
      %c0_33 = arith.constant 0 : index
      %100 = vector.load %arg4[%99, %c0_32, %c0_33] : memref<2x288x32xbf16, #tpu.memory_space<vmem>>, vector<1x288x32xbf16>
      %101 = vector.shape_cast %100 : vector<1x288x32xbf16> to vector<288x32xbf16>
      %102 = arith.index_cast %arg17 : i32 to index
      %c0_34 = arith.constant 0 : index
      %c0_35 = arith.constant 0 : index
      %103 = vector.load %arg5[%102, %c0_34, %c0_35] : memref<2x1x32xf32, #tpu.memory_space<vmem>>, vector<1x1x32xf32>
      %104 = vector.shape_cast %103 : vector<1x1x32xf32> to vector<1x32xf32>
      %105 = arith.truncf %arg18 : vector<64x32xf32> to vector<64x32xbf16>
      %106 = vector.shape_cast %105 : vector<64x32xbf16> to vector<8x8x32xbf16>
      %cst_36 = arith.constant 0.000000e+00 : bf16
      %107 = vector.broadcast %cst_36 : bf16 to vector<1x8x32xbf16>
      %cst_37 = arith.constant 0.000000e+00 : bf16
      %108 = vector.broadcast %cst_37 : bf16 to vector<10x1x32xbf16>
      %109 = tpu.concatenate %107, %106, %107 in 0 : vector<1x8x32xbf16>, vector<8x8x32xbf16>, vector<1x8x32xbf16> -> vector<10x8x32xbf16>
      %110 = tpu.concatenate %108, %109, %108 in 1 : vector<10x1x32xbf16>, vector<10x8x32xbf16>, vector<10x1x32xbf16> -> vector<10x10x32xbf16>
      %111 = vector.extract_strided_slice %110 {offsets = [0, 0, 0], sizes = [8, 8, 32], strides = [1, 1, 1]} : vector<10x10x32xbf16> to vector<8x8x32xbf16>
      %112 = vector.shape_cast %111 : vector<8x8x32xbf16> to vector<64x32xbf16>
      %113 = vector.extract_strided_slice %110 {offsets = [0, 1, 0], sizes = [8, 8, 32], strides = [1, 1, 1]} : vector<10x10x32xbf16> to vector<8x8x32xbf16>
      %114 = vector.shape_cast %113 : vector<8x8x32xbf16> to vector<64x32xbf16>
      %115 = vector.extract_strided_slice %110 {offsets = [0, 2, 0], sizes = [8, 8, 32], strides = [1, 1, 1]} : vector<10x10x32xbf16> to vector<8x8x32xbf16>
      %116 = vector.shape_cast %115 : vector<8x8x32xbf16> to vector<64x32xbf16>
      %117 = vector.extract_strided_slice %110 {offsets = [1, 0, 0], sizes = [8, 8, 32], strides = [1, 1, 1]} : vector<10x10x32xbf16> to vector<8x8x32xbf16>
      %118 = vector.shape_cast %117 : vector<8x8x32xbf16> to vector<64x32xbf16>
      %119 = vector.extract_strided_slice %110 {offsets = [1, 1, 0], sizes = [8, 8, 32], strides = [1, 1, 1]} : vector<10x10x32xbf16> to vector<8x8x32xbf16>
      %120 = vector.shape_cast %119 : vector<8x8x32xbf16> to vector<64x32xbf16>
      %121 = vector.extract_strided_slice %110 {offsets = [1, 2, 0], sizes = [8, 8, 32], strides = [1, 1, 1]} : vector<10x10x32xbf16> to vector<8x8x32xbf16>
      %122 = vector.shape_cast %121 : vector<8x8x32xbf16> to vector<64x32xbf16>
      %123 = vector.extract_strided_slice %110 {offsets = [2, 0, 0], sizes = [8, 8, 32], strides = [1, 1, 1]} : vector<10x10x32xbf16> to vector<8x8x32xbf16>
      %124 = vector.shape_cast %123 : vector<8x8x32xbf16> to vector<64x32xbf16>
      %125 = vector.extract_strided_slice %110 {offsets = [2, 1, 0], sizes = [8, 8, 32], strides = [1, 1, 1]} : vector<10x10x32xbf16> to vector<8x8x32xbf16>
      %126 = vector.shape_cast %125 : vector<8x8x32xbf16> to vector<64x32xbf16>
      %127 = vector.extract_strided_slice %110 {offsets = [2, 2, 0], sizes = [8, 8, 32], strides = [1, 1, 1]} : vector<10x10x32xbf16> to vector<8x8x32xbf16>
      %128 = vector.shape_cast %127 : vector<8x8x32xbf16> to vector<64x32xbf16>
      %129 = tpu.concatenate %112, %114, %116, %118, %120, %122, %124, %126, %128 in 1 : vector<64x32xbf16>, vector<64x32xbf16>, vector<64x32xbf16>, vector<64x32xbf16>, vector<64x32xbf16>, vector<64x32xbf16>, vector<64x32xbf16>, vector<64x32xbf16>, vector<64x32xbf16> -> vector<64x288xbf16>
      %cst_38 = arith.constant dense<0.000000e+00> : vector<64x32xf32>
      %130 = tpu.matmul %129, %101, %cst_38 {dimension_numbers = #tpu.dot_dimension_numbers<[1], [0], [0], [1], [0, 0, 1, 1], [], []>} : vector<64x288xbf16>, vector<288x32xbf16>, vector<64x32xf32> -> vector<64x32xf32>
      %131 = vector.broadcast %104 : vector<1x32xf32> to vector<64x32xf32>
      %132 = arith.addf %130, %131 : vector<64x32xf32>
      %cst_39 = arith.constant 0.000000e+00 : f32
      %133 = vector.broadcast %cst_39 : f32 to vector<64x32xf32>
      %134 = arith.maximumf %132, %133 : vector<64x32xf32>
      %135 = arith.index_cast %arg17 : i32 to index
      %c0_40 = arith.constant 0 : index
      %c0_41 = arith.constant 0 : index
      %136 = vector.load %arg6[%135, %c0_40, %c0_41] : memref<2x288x32xbf16, #tpu.memory_space<vmem>>, vector<1x288x32xbf16>
      %137 = vector.shape_cast %136 : vector<1x288x32xbf16> to vector<288x32xbf16>
      %138 = arith.index_cast %arg17 : i32 to index
      %c0_42 = arith.constant 0 : index
      %c0_43 = arith.constant 0 : index
      %139 = vector.load %arg7[%138, %c0_42, %c0_43] : memref<2x1x32xf32, #tpu.memory_space<vmem>>, vector<1x1x32xf32>
      %140 = vector.shape_cast %139 : vector<1x1x32xf32> to vector<1x32xf32>
      %141 = arith.truncf %134 : vector<64x32xf32> to vector<64x32xbf16>
      %142 = vector.shape_cast %141 : vector<64x32xbf16> to vector<8x8x32xbf16>
      %cst_44 = arith.constant 0.000000e+00 : bf16
      %143 = vector.broadcast %cst_44 : bf16 to vector<1x8x32xbf16>
      %cst_45 = arith.constant 0.000000e+00 : bf16
      %144 = vector.broadcast %cst_45 : bf16 to vector<10x1x32xbf16>
      %145 = tpu.concatenate %143, %142, %143 in 0 : vector<1x8x32xbf16>, vector<8x8x32xbf16>, vector<1x8x32xbf16> -> vector<10x8x32xbf16>
      %146 = tpu.concatenate %144, %145, %144 in 1 : vector<10x1x32xbf16>, vector<10x8x32xbf16>, vector<10x1x32xbf16> -> vector<10x10x32xbf16>
      %147 = vector.extract_strided_slice %146 {offsets = [0, 0, 0], sizes = [8, 8, 32], strides = [1, 1, 1]} : vector<10x10x32xbf16> to vector<8x8x32xbf16>
      %148 = vector.shape_cast %147 : vector<8x8x32xbf16> to vector<64x32xbf16>
      %149 = vector.extract_strided_slice %146 {offsets = [0, 1, 0], sizes = [8, 8, 32], strides = [1, 1, 1]} : vector<10x10x32xbf16> to vector<8x8x32xbf16>
      %150 = vector.shape_cast %149 : vector<8x8x32xbf16> to vector<64x32xbf16>
      %151 = vector.extract_strided_slice %146 {offsets = [0, 2, 0], sizes = [8, 8, 32], strides = [1, 1, 1]} : vector<10x10x32xbf16> to vector<8x8x32xbf16>
      %152 = vector.shape_cast %151 : vector<8x8x32xbf16> to vector<64x32xbf16>
      %153 = vector.extract_strided_slice %146 {offsets = [1, 0, 0], sizes = [8, 8, 32], strides = [1, 1, 1]} : vector<10x10x32xbf16> to vector<8x8x32xbf16>
      %154 = vector.shape_cast %153 : vector<8x8x32xbf16> to vector<64x32xbf16>
      %155 = vector.extract_strided_slice %146 {offsets = [1, 1, 0], sizes = [8, 8, 32], strides = [1, 1, 1]} : vector<10x10x32xbf16> to vector<8x8x32xbf16>
      %156 = vector.shape_cast %155 : vector<8x8x32xbf16> to vector<64x32xbf16>
      %157 = vector.extract_strided_slice %146 {offsets = [1, 2, 0], sizes = [8, 8, 32], strides = [1, 1, 1]} : vector<10x10x32xbf16> to vector<8x8x32xbf16>
      %158 = vector.shape_cast %157 : vector<8x8x32xbf16> to vector<64x32xbf16>
      %159 = vector.extract_strided_slice %146 {offsets = [2, 0, 0], sizes = [8, 8, 32], strides = [1, 1, 1]} : vector<10x10x32xbf16> to vector<8x8x32xbf16>
      %160 = vector.shape_cast %159 : vector<8x8x32xbf16> to vector<64x32xbf16>
      %161 = vector.extract_strided_slice %146 {offsets = [2, 1, 0], sizes = [8, 8, 32], strides = [1, 1, 1]} : vector<10x10x32xbf16> to vector<8x8x32xbf16>
      %162 = vector.shape_cast %161 : vector<8x8x32xbf16> to vector<64x32xbf16>
      %163 = vector.extract_strided_slice %146 {offsets = [2, 2, 0], sizes = [8, 8, 32], strides = [1, 1, 1]} : vector<10x10x32xbf16> to vector<8x8x32xbf16>
      %164 = vector.shape_cast %163 : vector<8x8x32xbf16> to vector<64x32xbf16>
      %165 = tpu.concatenate %148, %150, %152, %154, %156, %158, %160, %162, %164 in 1 : vector<64x32xbf16>, vector<64x32xbf16>, vector<64x32xbf16>, vector<64x32xbf16>, vector<64x32xbf16>, vector<64x32xbf16>, vector<64x32xbf16>, vector<64x32xbf16>, vector<64x32xbf16> -> vector<64x288xbf16>
      %cst_46 = arith.constant dense<0.000000e+00> : vector<64x32xf32>
      %166 = tpu.matmul %165, %137, %cst_46 {dimension_numbers = #tpu.dot_dimension_numbers<[1], [0], [0], [1], [0, 0, 1, 1], [], []>} : vector<64x288xbf16>, vector<288x32xbf16>, vector<64x32xf32> -> vector<64x32xf32>
      %167 = vector.broadcast %140 : vector<1x32xf32> to vector<64x32xf32>
      %168 = arith.addf %166, %167 : vector<64x32xf32>
      %cst_47 = arith.constant dense<0.000000e+00> : vector<32xf32>
      %169 = vector.multi_reduction <add>, %168, %cst_47 [0] : vector<64x32xf32> to vector<32xf32>
      %170 = vector.shape_cast %169 : vector<32xf32> to vector<1x32xf32>
      %cst_48 = arith.constant 6.400000e+01 : f32
      %171 = vector.broadcast %cst_48 : f32 to vector<1x32xf32>
      %172 = arith.divf %170, %171 : vector<1x32xf32>
      %173 = arith.index_cast %arg17 : i32 to index
      %c0_49 = arith.constant 0 : index
      %c0_50 = arith.constant 0 : index
      %174 = vector.load %arg8[%173, %c0_49, %c0_50] : memref<2x8x32xf32, #tpu.memory_space<vmem>>, vector<1x8x32xf32>
      %175 = vector.shape_cast %174 : vector<1x8x32xf32> to vector<8x32xf32>
      %176 = vector.broadcast %172 : vector<1x32xf32> to vector<8x32xf32>
      %177 = arith.mulf %176, %175 : vector<8x32xf32>
      %cst_51 = arith.constant dense<0.000000e+00> : vector<8xf32>
      %178 = vector.multi_reduction <add>, %177, %cst_51 [1] : vector<8x32xf32> to vector<8xf32>
      %179 = vector.shape_cast %178 : vector<8xf32> to vector<8x1xf32>
      %180 = arith.index_cast %arg17 : i32 to index
      %c0_52 = arith.constant 0 : index
      %c0_53 = arith.constant 0 : index
      %181 = vector.load %arg9[%180, %c0_52, %c0_53] : memref<2x8x1xf32, #tpu.memory_space<vmem>>, vector<1x8x1xf32>
      %182 = vector.shape_cast %181 : vector<1x8x1xf32> to vector<8x1xf32>
      %183 = arith.addf %179, %182 : vector<8x1xf32>
      %cst_54 = arith.constant 0.000000e+00 : f32
      %184 = vector.broadcast %cst_54 : f32 to vector<8x1xf32>
      %185 = arith.maximumf %183, %184 : vector<8x1xf32>
      %186 = arith.index_cast %arg17 : i32 to index
      %c0_55 = arith.constant 0 : index
      %c0_56 = arith.constant 0 : index
      %187 = vector.load %arg10[%186, %c0_55, %c0_56] : memref<2x8x32xf32, #tpu.memory_space<vmem>>, vector<1x8x32xf32>
      %188 = vector.shape_cast %187 : vector<1x8x32xf32> to vector<8x32xf32>
      %189 = vector.broadcast %185 : vector<8x1xf32> to vector<8x32xf32>
      %190 = arith.mulf %189, %188 : vector<8x32xf32>
      %cst_57 = arith.constant dense<0.000000e+00> : vector<32xf32>
      %191 = vector.multi_reduction <add>, %190, %cst_57 [0] : vector<8x32xf32> to vector<32xf32>
      %192 = vector.shape_cast %191 : vector<32xf32> to vector<1x32xf32>
      %193 = arith.index_cast %arg17 : i32 to index
      %c0_58 = arith.constant 0 : index
      %c0_59 = arith.constant 0 : index
      %194 = vector.load %arg11[%193, %c0_58, %c0_59] : memref<2x1x32xf32, #tpu.memory_space<vmem>>, vector<1x1x32xf32>
      %195 = vector.shape_cast %194 : vector<1x1x32xf32> to vector<1x32xf32>
      %196 = arith.addf %192, %195 : vector<1x32xf32>
      %197 = arith.negf %196 : vector<1x32xf32>
      %198 = math.exp %197 : vector<1x32xf32>
      %cst_60 = arith.constant 1.000000e+00 : f32
      %199 = vector.broadcast %cst_60 : f32 to vector<1x32xf32>
      %200 = arith.addf %199, %198 : vector<1x32xf32>
      %201 = arith.divf %199, %200 : vector<1x32xf32>
      %202 = vector.broadcast %201 : vector<1x32xf32> to vector<64x32xf32>
      %203 = arith.mulf %168, %202 : vector<64x32xf32>
      %204 = arith.addf %203, %arg18 : vector<64x32xf32>
      scf.yield %204 : vector<64x32xf32>
    }
    %c2_i32_11 = arith.constant 2 : i32
    %c0_12 = arith.constant 0 : index
    %c0_13 = arith.constant 0 : index
    %28 = vector.load %arg12[%c0_12, %c0_13] : memref<288x32xbf16, #tpu.memory_space<vmem>>, vector<288x32xbf16>
    %c0_14 = arith.constant 0 : index
    %c0_15 = arith.constant 0 : index
    %29 = vector.load %arg13[%c0_14, %c0_15] : memref<1x32xf32, #tpu.memory_space<vmem>>, vector<1x32xf32>
    %30 = arith.truncf %27 : vector<64x32xf32> to vector<64x32xbf16>
    %31 = vector.shape_cast %30 : vector<64x32xbf16> to vector<8x8x32xbf16>
    %cst_16 = arith.constant 0.000000e+00 : bf16
    %32 = vector.broadcast %cst_16 : bf16 to vector<1x8x32xbf16>
    %cst_17 = arith.constant 0.000000e+00 : bf16
    %33 = vector.broadcast %cst_17 : bf16 to vector<10x1x32xbf16>
    %34 = tpu.concatenate %32, %31, %32 in 0 : vector<1x8x32xbf16>, vector<8x8x32xbf16>, vector<1x8x32xbf16> -> vector<10x8x32xbf16>
    %35 = tpu.concatenate %33, %34, %33 in 1 : vector<10x1x32xbf16>, vector<10x8x32xbf16>, vector<10x1x32xbf16> -> vector<10x10x32xbf16>
    %36 = vector.extract_strided_slice %35 {offsets = [0, 0, 0], sizes = [8, 8, 32], strides = [1, 1, 1]} : vector<10x10x32xbf16> to vector<8x8x32xbf16>
    %37 = vector.shape_cast %36 : vector<8x8x32xbf16> to vector<64x32xbf16>
    %38 = vector.extract_strided_slice %35 {offsets = [0, 1, 0], sizes = [8, 8, 32], strides = [1, 1, 1]} : vector<10x10x32xbf16> to vector<8x8x32xbf16>
    %39 = vector.shape_cast %38 : vector<8x8x32xbf16> to vector<64x32xbf16>
    %40 = vector.extract_strided_slice %35 {offsets = [0, 2, 0], sizes = [8, 8, 32], strides = [1, 1, 1]} : vector<10x10x32xbf16> to vector<8x8x32xbf16>
    %41 = vector.shape_cast %40 : vector<8x8x32xbf16> to vector<64x32xbf16>
    %42 = vector.extract_strided_slice %35 {offsets = [1, 0, 0], sizes = [8, 8, 32], strides = [1, 1, 1]} : vector<10x10x32xbf16> to vector<8x8x32xbf16>
    %43 = vector.shape_cast %42 : vector<8x8x32xbf16> to vector<64x32xbf16>
    %44 = vector.extract_strided_slice %35 {offsets = [1, 1, 0], sizes = [8, 8, 32], strides = [1, 1, 1]} : vector<10x10x32xbf16> to vector<8x8x32xbf16>
    %45 = vector.shape_cast %44 : vector<8x8x32xbf16> to vector<64x32xbf16>
    %46 = vector.extract_strided_slice %35 {offsets = [1, 2, 0], sizes = [8, 8, 32], strides = [1, 1, 1]} : vector<10x10x32xbf16> to vector<8x8x32xbf16>
    %47 = vector.shape_cast %46 : vector<8x8x32xbf16> to vector<64x32xbf16>
    %48 = vector.extract_strided_slice %35 {offsets = [2, 0, 0], sizes = [8, 8, 32], strides = [1, 1, 1]} : vector<10x10x32xbf16> to vector<8x8x32xbf16>
    %49 = vector.shape_cast %48 : vector<8x8x32xbf16> to vector<64x32xbf16>
    %50 = vector.extract_strided_slice %35 {offsets = [2, 1, 0], sizes = [8, 8, 32], strides = [1, 1, 1]} : vector<10x10x32xbf16> to vector<8x8x32xbf16>
    %51 = vector.shape_cast %50 : vector<8x8x32xbf16> to vector<64x32xbf16>
    %52 = vector.extract_strided_slice %35 {offsets = [2, 2, 0], sizes = [8, 8, 32], strides = [1, 1, 1]} : vector<10x10x32xbf16> to vector<8x8x32xbf16>
    %53 = vector.shape_cast %52 : vector<8x8x32xbf16> to vector<64x32xbf16>
    %54 = tpu.concatenate %37, %39, %41, %43, %45, %47, %49, %51, %53 in 1 : vector<64x32xbf16>, vector<64x32xbf16>, vector<64x32xbf16>, vector<64x32xbf16>, vector<64x32xbf16>, vector<64x32xbf16>, vector<64x32xbf16>, vector<64x32xbf16>, vector<64x32xbf16> -> vector<64x288xbf16>
    %cst_18 = arith.constant dense<0.000000e+00> : vector<64x32xf32>
    %55 = tpu.matmul %54, %28, %cst_18 {dimension_numbers = #tpu.dot_dimension_numbers<[1], [0], [0], [1], [0, 0, 1, 1], [], []>} : vector<64x288xbf16>, vector<288x32xbf16>, vector<64x32xf32> -> vector<64x32xf32>
    %56 = vector.broadcast %29 : vector<1x32xf32> to vector<64x32xf32>
    %57 = arith.addf %55, %56 : vector<64x32xf32>
    %58 = arith.truncf %57 : vector<64x32xf32> to vector<64x32xbf16>
    %59 = vector.shape_cast %58 : vector<64x32xbf16> to vector<8x8x32xbf16>
    %cst_19 = arith.constant 0.000000e+00 : bf16
    %60 = vector.broadcast %cst_19 : bf16 to vector<1x8x32xbf16>
    %cst_20 = arith.constant 0.000000e+00 : bf16
    %61 = vector.broadcast %cst_20 : bf16 to vector<10x1x32xbf16>
    %62 = tpu.concatenate %60, %59, %60 in 0 : vector<1x8x32xbf16>, vector<8x8x32xbf16>, vector<1x8x32xbf16> -> vector<10x8x32xbf16>
    %63 = tpu.concatenate %61, %62, %61 in 1 : vector<10x1x32xbf16>, vector<10x8x32xbf16>, vector<10x1x32xbf16> -> vector<10x10x32xbf16>
    %64 = vector.extract_strided_slice %63 {offsets = [0, 0, 0], sizes = [8, 8, 32], strides = [1, 1, 1]} : vector<10x10x32xbf16> to vector<8x8x32xbf16>
    %65 = vector.shape_cast %64 : vector<8x8x32xbf16> to vector<64x32xbf16>
    %66 = vector.extract_strided_slice %63 {offsets = [0, 1, 0], sizes = [8, 8, 32], strides = [1, 1, 1]} : vector<10x10x32xbf16> to vector<8x8x32xbf16>
    %67 = vector.shape_cast %66 : vector<8x8x32xbf16> to vector<64x32xbf16>
    %68 = vector.extract_strided_slice %63 {offsets = [0, 2, 0], sizes = [8, 8, 32], strides = [1, 1, 1]} : vector<10x10x32xbf16> to vector<8x8x32xbf16>
    %69 = vector.shape_cast %68 : vector<8x8x32xbf16> to vector<64x32xbf16>
    %70 = vector.extract_strided_slice %63 {offsets = [1, 0, 0], sizes = [8, 8, 32], strides = [1, 1, 1]} : vector<10x10x32xbf16> to vector<8x8x32xbf16>
    %71 = vector.shape_cast %70 : vector<8x8x32xbf16> to vector<64x32xbf16>
    %72 = vector.extract_strided_slice %63 {offsets = [1, 1, 0], sizes = [8, 8, 32], strides = [1, 1, 1]} : vector<10x10x32xbf16> to vector<8x8x32xbf16>
    %73 = vector.shape_cast %72 : vector<8x8x32xbf16> to vector<64x32xbf16>
    %74 = vector.extract_strided_slice %63 {offsets = [1, 2, 0], sizes = [8, 8, 32], strides = [1, 1, 1]} : vector<10x10x32xbf16> to vector<8x8x32xbf16>
    %75 = vector.shape_cast %74 : vector<8x8x32xbf16> to vector<64x32xbf16>
    %76 = vector.extract_strided_slice %63 {offsets = [2, 0, 0], sizes = [8, 8, 32], strides = [1, 1, 1]} : vector<10x10x32xbf16> to vector<8x8x32xbf16>
    %77 = vector.shape_cast %76 : vector<8x8x32xbf16> to vector<64x32xbf16>
    %78 = vector.extract_strided_slice %63 {offsets = [2, 1, 0], sizes = [8, 8, 32], strides = [1, 1, 1]} : vector<10x10x32xbf16> to vector<8x8x32xbf16>
    %79 = vector.shape_cast %78 : vector<8x8x32xbf16> to vector<64x32xbf16>
    %80 = vector.extract_strided_slice %63 {offsets = [2, 2, 0], sizes = [8, 8, 32], strides = [1, 1, 1]} : vector<10x10x32xbf16> to vector<8x8x32xbf16>
    %81 = vector.shape_cast %80 : vector<8x8x32xbf16> to vector<64x32xbf16>
    %82 = tpu.concatenate %65, %67, %69, %71, %73, %75, %77, %79, %81 in 1 : vector<64x32xbf16>, vector<64x32xbf16>, vector<64x32xbf16>, vector<64x32xbf16>, vector<64x32xbf16>, vector<64x32xbf16>, vector<64x32xbf16>, vector<64x32xbf16>, vector<64x32xbf16> -> vector<64x288xbf16>
    %c0_21 = arith.constant 0 : index
    %c0_22 = arith.constant 0 : index
    %83 = vector.load %arg14[%c0_21, %c0_22] : memref<288x128xbf16, #tpu.memory_space<vmem>>, vector<288x128xbf16>
    %cst_23 = arith.constant dense<0.000000e+00> : vector<64x128xf32>
    %84 = tpu.matmul %82, %83, %cst_23 {dimension_numbers = #tpu.dot_dimension_numbers<[1], [0], [0], [1], [0, 0, 1, 1], [], []>} : vector<64x288xbf16>, vector<288x128xbf16>, vector<64x128xf32> -> vector<64x128xf32>
    %c0_24 = arith.constant 0 : index
    %c0_25 = arith.constant 0 : index
    %85 = vector.load %arg15[%c0_24, %c0_25] : memref<1x128xf32, #tpu.memory_space<vmem>>, vector<1x128xf32>
    %86 = vector.broadcast %85 : vector<1x128xf32> to vector<64x128xf32>
    %87 = arith.addf %84, %86 : vector<64x128xf32>
    %cst_26 = arith.constant 0.000000e+00 : f32
    %88 = vector.broadcast %cst_26 : f32 to vector<64x128xf32>
    %89 = arith.cmpf ogt, %87, %88 : vector<64x128xf32>
    %cst_27 = arith.constant 1.000000e-01 : f32
    %90 = vector.broadcast %cst_27 : f32 to vector<64x128xf32>
    %91 = arith.mulf %90, %87 : vector<64x128xf32>
    %92 = arith.select %89, %87, %91 : vector<64x128xi1>, vector<64x128xf32>
    %93 = vector.shape_cast %1 : vector<8x8x128xf32> to vector<64x128xf32>
    %94 = arith.addf %92, %93 : vector<64x128xf32>
    %95 = vector.shape_cast %94 : vector<64x128xf32> to vector<8x8x128xf32>
    %c0_28 = arith.constant 0 : index
    %c0_29 = arith.constant 0 : index
    %c0_30 = arith.constant 0 : index
    %c0_31 = arith.constant 0 : index
    %96 = vector.load %arg16[%c0_28, %c0_29, %c0_30, %c0_31] : memref<1x8x8x128xf32, #tpu.memory_space<vmem>>, vector<1x8x8x128xf32>
    %97 = vector.shape_cast %96 : vector<1x8x8x128xf32> to vector<8x8x128xf32>
    %98 = vector.shape_cast %95 : vector<8x8x128xf32> to vector<1x8x8x128xf32>
    tpu.vector_store %arg16[%c0_28, %c0_29, %c0_30, %c0_31], %98 {strides = array<i32>} : memref<1x8x8x128xf32, #tpu.memory_space<vmem>>, vector<1x8x8x128xf32>,
    return
  }
  func.func @transform_0(%arg0: i32) -> (i32, i32, i32, i32) {
    %c0_i32 = arith.constant 0 : i32
    %c0_i32_0 = arith.constant 0 : i32
    %c0_i32_1 = arith.constant 0 : i32
    %c0_i32_2 = arith.constant 0 : i32
    return %arg0, %c0_i32, %c0_i32_0, %c0_i32_1 : i32, i32, i32, i32
  }
  func.func @transform_1(%arg0: i32) -> (i32, i32) {
    %c0_i32 = arith.constant 0 : i32
    %c0_i32_0 = arith.constant 0 : i32
    %c0_i32_1 = arith.constant 0 : i32
    return %c0_i32, %c0_i32_0 : i32, i32
  }
  func.func @transform_2(%arg0: i32) -> (i32, i32) {
    %c0_i32 = arith.constant 0 : i32
    %c0_i32_0 = arith.constant 0 : i32
    %c0_i32_1 = arith.constant 0 : i32
    return %c0_i32, %c0_i32_0 : i32, i32
  }
  func.func @transform_3(%arg0: i32) -> (i32, i32, i32) {
    %c0_i32 = arith.constant 0 : i32
    %c0_i32_0 = arith.constant 0 : i32
    %c0_i32_1 = arith.constant 0 : i32
    %c0_i32_2 = arith.constant 0 : i32
    return %c0_i32, %c0_i32_0, %c0_i32_1 : i32, i32, i32
  }
  func.func @transform_4(%arg0: i32) -> (i32, i32, i32) {
    %c0_i32 = arith.constant 0 : i32
    %c0_i32_0 = arith.constant 0 : i32
    %c0_i32_1 = arith.constant 0 : i32
    %c0_i32_2 = arith.constant 0 : i32
    return %c0_i32, %c0_i32_0, %c0_i32_1 : i32, i32, i32
  }
  func.func @transform_5(%arg0: i32) -> (i32, i32, i32) {
    %c0_i32 = arith.constant 0 : i32
    %c0_i32_0 = arith.constant 0 : i32
    %c0_i32_1 = arith.constant 0 : i32
    %c0_i32_2 = arith.constant 0 : i32
    return %c0_i32, %c0_i32_0, %c0_i32_1 : i32, i32, i32
  }
  func.func @transform_6(%arg0: i32) -> (i32, i32, i32) {
    %c0_i32 = arith.constant 0 : i32
    %c0_i32_0 = arith.constant 0 : i32
    %c0_i32_1 = arith.constant 0 : i32
    %c0_i32_2 = arith.constant 0 : i32
    return %c0_i32, %c0_i32_0, %c0_i32_1 : i32, i32, i32
  }
  func.func @transform_7(%arg0: i32) -> (i32, i32, i32) {
    %c0_i32 = arith.constant 0 : i32
    %c0_i32_0 = arith.constant 0 : i32
    %c0_i32_1 = arith.constant 0 : i32
    %c0_i32_2 = arith.constant 0 : i32
    return %c0_i32, %c0_i32_0, %c0_i32_1 : i32, i32, i32
  }
  func.func @transform_8(%arg0: i32) -> (i32, i32, i32) {
    %c0_i32 = arith.constant 0 : i32
    %c0_i32_0 = arith.constant 0 : i32
    %c0_i32_1 = arith.constant 0 : i32
    %c0_i32_2 = arith.constant 0 : i32
    return %c0_i32, %c0_i32_0, %c0_i32_1 : i32, i32, i32
  }
  func.func @transform_9(%arg0: i32) -> (i32, i32, i32) {
    %c0_i32 = arith.constant 0 : i32
    %c0_i32_0 = arith.constant 0 : i32
    %c0_i32_1 = arith.constant 0 : i32
    %c0_i32_2 = arith.constant 0 : i32
    return %c0_i32, %c0_i32_0, %c0_i32_1 : i32, i32, i32
  }
  func.func @transform_10(%arg0: i32) -> (i32, i32, i32) {
    %c0_i32 = arith.constant 0 : i32
    %c0_i32_0 = arith.constant 0 : i32
    %c0_i32_1 = arith.constant 0 : i32
    %c0_i32_2 = arith.constant 0 : i32
    return %c0_i32, %c0_i32_0, %c0_i32_1 : i32, i32, i32
  }
  func.func @transform_11(%arg0: i32) -> (i32, i32) {
    %c0_i32 = arith.constant 0 : i32
    %c0_i32_0 = arith.constant 0 : i32
    %c0_i32_1 = arith.constant 0 : i32
    return %c0_i32, %c0_i32_0 : i32, i32
  }
  func.func @transform_12(%arg0: i32) -> (i32, i32) {
    %c0_i32 = arith.constant 0 : i32
    %c0_i32_0 = arith.constant 0 : i32
    %c0_i32_1 = arith.constant 0 : i32
    return %c0_i32, %c0_i32_0 : i32, i32
  }
  func.func @transform_13(%arg0: i32) -> (i32, i32) {
    %c0_i32 = arith.constant 0 : i32
    %c0_i32_0 = arith.constant 0 : i32
    %c0_i32_1 = arith.constant 0 : i32
    return %c0_i32, %c0_i32_0 : i32, i32
  }
  func.func @transform_14(%arg0: i32) -> (i32, i32) {
    %c0_i32 = arith.constant 0 : i32
    %c0_i32_0 = arith.constant 0 : i32
    %c0_i32_1 = arith.constant 0 : i32
    return %c0_i32, %c0_i32_0 : i32, i32
  }
  func.func @transform_15(%arg0: i32) -> (i32, i32, i32, i32) {
    %c0_i32 = arith.constant 0 : i32
    %c0_i32_0 = arith.constant 0 : i32
    %c0_i32_1 = arith.constant 0 : i32
    %c0_i32_2 = arith.constant 0 : i32
    return %arg0, %c0_i32, %c0_i32_0, %c0_i32_1 : i32, i32, i32, i32
  }
}

</mosaic_0001>

<bundles_post_ra>
// kernel: msrg_forward.1
= control target key start
LH: loop header
LB: loop body
LE: loop exit
PB: predicated region body
PF: predicated region fallthrough
CT: control target
= control target key end

     0   :  { %s5464_s18 = smov 0   ;;  %s7084_s0 = inlined_call_operand.vmem [shape: f32[2,8,8,128], index: 0, kind: input, shape index: {}, may-alias: {0,15}]   ;;  %s7085_s1 = inlined_call_operand.vmem [shape: bf16[512,32], index: 1, kind: input, shape index: {}]   ;;  %s7086_s2 = inlined_call_operand.vmem [shape: f32[1,32], index: 2, kind: input, shape index: {}]   ;;  %s7087_s3 = inlined_call_operand.vmem [shape: bf16[2,288,32], index: 3, kind: input, shape index: {}]   ;;  %s7088_s4 = inlined_call_operand.vmem [shape: f32[2,1,32], index: 4, kind: input, shape index: {}]   ;;  %s7089_s5 = inlined_call_operand.vmem [shape: bf16[2,288,32], index: 5, kind: input, shape index: {}]   ;;  %s7090_s6 = inlined_call_operand.vmem [shape: f32[2,1,32], index: 6, kind: input, shape index: {}]   ;;  %s7091_s7 = inlined_call_operand.vmem [shape: f32[2,8,32], index: 7, kind: input, shape index: {}]   ;;  %s7092_s8 = inlined_call_operand.vmem [shape: f32[2,8,1], index: 8, kind: input, shape index: {}]   ;;  %s7093_s9 = inlined_call_operand.vmem [shape: f32[2,8,32], index: 9, kind: input, shape index: {}]   ;;  %s7094_s10 = inlined_call_operand.vmem [shape: f32[2,1,32], index: 10, kind: input, shape index: {}]   ;;  %s7095_s11 = inlined_call_operand.vmem [shape: bf16[288,32], index: 11, kind: input, shape index: {}]   ;;  %s7096_s12 = inlined_call_operand.vmem [shape: f32[1,32], index: 12, kind: input, shape index: {}]   ;;  %s7097_s13 = inlined_call_operand.vmem [shape: bf16[288,128], index: 13, kind: input, shape index: {}]   ;;  %s7098_s14 = inlined_call_operand.vmem [shape: f32[1,128], index: 14, kind: input, shape index: {}]   ;;  %s7099_s15 = inlined_call_operand.vmem [shape: f32[2,8,8,128], index: 15, kind: output, shape index: {}, may-alias: {0,15}]  }
   0x1 LB: > { %s4345_s19 = sadd.s32 4294967295, %s5338_s18   ;;  %p4349_p0 = scmp.ge.s32.totalorder %s5338_s18, 1  ;;  %s5338_s18 = sphi %s5464_s18, %s25_s18  }
   0x2   : > { %p437_p1 = scmp.lt.s32.totalorder %s5338_s18, 3 }
   0x4   : > { %p438_p2 = pnand %p4349_p0, %p437_p1 }
   0x6   : > { %441 = sbr.rel (%p438_p2) target bundleno = 2129 (0x851), region = 80 }
   0xb   : > { %v5186_v0 = vld [vmem:[%s7085_s1 + $0x78] sm:$0xff]   ;;  %p485_p3 = scmp.lt.s32.totalorder %s4345_s19, 1  ;;  %v5190_v4 = vld [vmem:[%s7085_s1 + $0x70] sm:$0xff]   ;;  %v5194_v8 = vld [vmem:[%s7085_s1 + $0x68] sm:$0xff]   ;;  %vm576_vm0 = vcmask 1040384   ;;  %v5376_v40 = vmov 0  }
   0xc   : > { %v5187_v1 = vld [vmem:[%s7085_s1 + $0xf8] sm:$0xff]   ;;  %4786 = vmatprep.subr.bf16.mxu0 %v5186_v0  ;;  %v5191_v5 = vld [vmem:[%s7085_s1 + $0xf0] sm:$0xff]   ;;  %v5195_v9 = vld [vmem:[%s7085_s1 + $0xe8] sm:$0xff]   ;;  %vm577_vm1 = vsmask.f32 256  ;;  %v590_v41 = vrot.slane %v5376_v40, 7 }
   0xd   : > { %v5188_v2 = vld [vmem:[%s7085_s1 + $0x38] sm:$0xff]   ;;  %s7123_s19 = smov (!%p485_p3, %s4345_s19), 1  ;;  %4826 = vmatprep.subr.bf16.mxu1 %v5187_v1  ;;  %v5192_v6 = vld [vmem:[%s7085_s1 + $0x30] sm:$0xff]   ;;  %v5196_v10 = vld [vmem:[%s7085_s1 + $0x28] sm:$0xff]   ;;  %s5698_s23 = smov 0  }
   0xe   : > { %v5189_v3 = vld [vmem:[%s7085_s1 + $0xb8] sm:$0xff]   ;;  %4787 = vmatpush3.bf16.msra.mxu0 %v5188_v2  ;;  %s4743_s30 = sshll.u32 %s7123_s19, 6  ;;  %v5193_v7 = vld [vmem:[%s7085_s1 + $0xb0] sm:$0xff]   ;;  %v5197_v11 = vld [vmem:[%s7085_s1 + $0xa8] sm:$0xff]  }
   0xf   : > { %4827 = vmatpush3.bf16.msra.mxu1 %v5189_v3  ;;  %s5498_s22 = scalar_lea.vmem %s7099_s15, %s4743_s30  ;;  %4788 = vmatprep.subr.bf16.mxu0 %v5190_v4  ;;  %v5198_v12 = vld [vmem:[%s7085_s1 + $0x60] sm:$0xff]   ;;  %v5202_v16 = vld [vmem:[%s7085_s1 + $0x58] sm:$0xff]   ;;  %v5206_v20 = vld [vmem:[%s7085_s1 + $0x50] sm:$0xff]   ;;  %s5577_s29 = scalar_lea.vmem %s7084_s0, %s4743_s30 }
  0x10   : > { %4828 = vmatprep.subr.bf16.mxu1 %v5191_v5  ;;  %v5199_v13 = vld [vmem:[%s7085_s1 + $0xe0] sm:$0xff]   ;;  %v5203_v17 = vld [vmem:[%s7085_s1 + $0xd8] sm:$0xff]   ;;  %v5207_v21 = vld [vmem:[%s7085_s1 + $0xd0] sm:$0xff]  }
  0x11   : > { %v5200_v14 = vld [vmem:[%s7085_s1 + $0x20] sm:$0xff]   ;;  %v5204_v18 = vld [vmem:[%s7085_s1 + $0x18] sm:$0xff]   ;;  %v5208_v22 = vld [vmem:[%s7085_s1 + $0x10] sm:$0xff]  }
  0x12   : > { %4789 = vmatpush3.bf16.msra.mxu0 %v5192_v6  ;;  %v5201_v15 = vld [vmem:[%s7085_s1 + $0xa0] sm:$0xff]   ;;  %v5205_v19 = vld [vmem:[%s7085_s1 + $0x98] sm:$0xff]   ;;  %v5209_v23 = vld [vmem:[%s7085_s1 + $0x90] sm:$0xff]  }
  0x13   : > { %4829 = vmatpush3.bf16.msra.mxu1 %v5193_v7  ;;  %4790 = vmatprep.subr.bf16.mxu0 %v5194_v8  ;;  %v5210_v24 = vld [vmem:[%s7085_s1 + $0x48] sm:$0xff]   ;;  %v5214_v28 = vld [vmem:[%s7085_s1 + $0x40] sm:$0xff]   ;;  %v5592_v34 = vld [vmem:[%s5577_s29 + $0x10] sm:$0xff] }
  0x14   : > { %4830 = vmatprep.subr.bf16.mxu1 %v5195_v9  ;;  %v5211_v25 = vld [vmem:[%s7085_s1 + $0xc8] sm:$0xff]   ;;  %v5215_v29 = vld [vmem:[%s7085_s1 + $0xc0] sm:$0xff]   ;;  %v506_v38 = vpack.c.bf16 %v5592_v34, %v5592_v34  ;;  %v5603_v39 = vld [vmem:[%s5577_s29 + $0x18] sm:$0xff] }
  0x15   : > { %v5212_v26 = vld [vmem:[%s7085_s1 + $0x8] sm:$0xff]   ;;  %v5216_v30 = vld [vmem:[%s7085_s1] sm:$0xff]   ;;  %v507_v42 = vpack.c.bf16 %v5603_v39, %v5603_v39  ;;  %vm5615_vm2 = vmand %vm576_vm0, %vm577_vm1  ;;  %v4749_v1 = vpack.c.bf16 %v5603_v39, %v5592_v34 }
  0x16   : > { %4791 = vmatpush3.bf16.msra.mxu0 %v5196_v10  ;;  %v5213_v27 = vld [vmem:[%s7085_s1 + $0x88] sm:$0xff]   ;;  %v5217_v31 = vld [vmem:[%s7085_s1 + $0x80] sm:$0xff]   ;;  %v527_v51 = vshrl.u32 %v506_v38, 16  ;;  %v530_v52 = vshll.u32 %v506_v38, 16  ;;  %v5625_v61 = vsel %vm5615_vm2, 0, %v590_v41  ;;  %v5637_v10 = vld [vmem:[%s5577_s29 + $0x30] sm:$0xff] }
  0x17   : > { %4831 = vmatpush3.bf16.msra.mxu1 %v5197_v11  ;;  %4792 = vmatprep.subr.bf16.mxu0 %v5198_v12  ;;  %v5586_v32 = vld [vmem:[%s5577_s29] sm:$0xff]  ;;  %v5589_v33 = vld [vmem:[%s5577_s29 + $0x8] sm:$0xff]  ;;  %v534_v53 = vshrl.u32 %v507_v42, 16  ;;  %v537_v56 = vshll.u32 %v507_v42, 16  ;;  %7104 = vst [vmem:[#allocation2_spill] sm:$0xff] %v5625_v61  ;;  %v5640_v11 = vld [vmem:[%s5577_s29 + $0x38] sm:$0xff] }
  0x18   : > { %4832 = vmatprep.subr.bf16.mxu1 %v5199_v13  ;;  %v504_v35 = vpack.c.bf16 %v5586_v32, %v5586_v32  ;;  %v505_v36 = vpack.c.bf16 %v5589_v33, %v5589_v33  ;;  %v4748_v37 = vpack.c.bf16 %v5589_v33, %v5586_v32  ;;  %v5608_v43 = vld [vmem:[%s5577_s29 + $0x20] sm:$0xff]  ;;  %v5611_v48 = vld [vmem:[%s5577_s29 + $0x28] sm:$0xff]  ;;  %v529_v58 = vrot.slane %v527_v51, 7  ;;  %7105 = vst [vmem:[#allocation3_spill] sm:$0xff] %v5640_v11 }
  0x19   : > { %v508_v57 = vpack.c.bf16 %v5608_v43, %v5608_v43  ;;  %v536_v59 = vrot.slane %v534_v53, 7  ;;  %v509_v60 = vpack.c.bf16 %v5611_v48, %v5611_v48  ;;  %v4745_v0 = vpack.c.bf16 %v5592_v34, %v5589_v33  ;;  %v5669_v53 = vld [vmem:[%s7086_s2] ss:$0 sm:$0xff] }
  0x1a   : > { %4793 = vmatpush3.bf16.msra.mxu0 %v5200_v14  ;;  %v513_v44 = vshrl.u32 %v504_v35, 16  ;;  %v4358_v45 = vcombine.low %v5376_v40, %v504_v35  ;;  %v520_v46 = vshrl.u32 %v505_v36, 16  ;;  %v523_v47 = vshll.u32 %v505_v36, 16  ;;  %1024 = vmatprep.mubr.bf16.mxu1 %v4748_v37 }
  0x1b   : > { %4833 = vmatpush3.bf16.msra.mxu1 %v5201_v15  ;;  %4794 = vmatprep.subr.bf16.mxu0 %v5202_v16  ;;  %v516_v50 = vshll.u32 %v504_v35, 16  ;;  %v532_v2 = vor.u32 %v530_v52, %v529_v58  ;;  %v541_v3 = vshrl.u32 %v508_v57, 16  ;;  %v539_v6 = vor.u32 %v537_v56, %v536_v59 }
  0x1c   : > { %4834 = vmatprep.subr.bf16.mxu1 %v5203_v17  ;;  %959 = vmatprep.mubr.bf16.mxu0 %v4358_v45  ;;  %v522_v54 = vrot.slane %v520_v46, 7  ;;  %v515_v55 = vrot.slane %v513_v44, 7  ;;  %v548_v7 = vshrl.u32 %v509_v60, 16  ;;  %v544_v14 = vshll.u32 %v508_v57, 16 }
  0x1d   : > { %v581_v12 = vsel %vm5615_vm2, 0, %v532_v2  ;;  %v543_v13 = vrot.slane %v541_v3, 7  ;;  %v551_v15 = vshll.u32 %v509_v60, 16  ;;  %v582_v16 = vsel %vm5615_vm2, 0, %v539_v6 }
  0x1e   : > { %4795 = vmatpush3.bf16.msra.mxu0 %v5204_v18  ;;  %v518_v62 = vor.u32 %v516_v50, %v515_v55  ;;  %v525_v63 = vor.u32 %v523_v47, %v522_v54  ;;  %v550_v17 = vrot.slane %v548_v7, 7  ;;  %v510_v18 = vpack.c.bf16 %v5637_v10, %v5637_v10 }
  0x1f   : > { %4835 = vmatpush3.bf16.msra.mxu1 %v5205_v19  ;;  %4796 = vmatprep.subr.bf16.mxu0 %v5206_v20  ;;  %v511_v19 = vpack.c.bf16 %v5640_v11, %v5640_v11  ;;  %v4747_v40 = vpack.c.bf16 %v5637_v10, %v5611_v48  ;;  %v4751_v41 = vpack.c.bf16 %v5640_v11, %v5637_v10 }
  0x20   : > { %4836 = vmatprep.subr.bf16.mxu1 %v5207_v21  ;;  %v579_v4 = vsel %vm5615_vm2, 0, %v518_v62  ;;  %v580_v5 = vsel %vm5615_vm2, 0, %v525_v63  ;;  %v4363_v21 = vcombine.low %v581_v12, %v582_v16  ;;  %v558_v36 = vshll.u32 %v510_v18, 16 }
  0x21   : > { %v4354_v8 = vcombine.low %v5625_v61, %v579_v4  ;;  %v4362_v9 = vcombine.low %v579_v4, %v580_v5  ;;  %v4355_v20 = vcombine.low %v580_v5, %v581_v12 }
  0x22   : > { %4797 = vmatpush3.bf16.msra.mxu0 %v5208_v22  ;;  %v4746_v22 = vpack.c.bf16 %v5608_v43, %v5603_v39 }
  0x23   : > { %4837 = vmatpush3.bf16.msra.mxu1 %v5209_v23  ;;  %4798 = vmatprep.subr.bf16.mxu0 %v5210_v24  ;;  %v546_v23 = vor.u32 %v544_v14, %v543_v13  ;;  %v4750_v24 = vpack.c.bf16 %v5611_v48, %v5608_v43 }
  0x24   : > { %4838 = vmatprep.subr.bf16.mxu1 %v5211_v25  ;;  %v553_v25 = vor.u32 %v551_v15, %v550_v17 }
  0x26   : > { %4799 = vmatpush3.bf16.msra.mxu0 %v5212_v26  ;;  %v562_v26 = vshrl.u32 %v511_v19, 16 }
  0x27   : > { %4839 = vmatpush3.bf16.msra.mxu1 %v5213_v27  ;;  %4800 = vmatprep.subr.bf16.mxu0 %v5214_v28  ;;  %v555_v27 = vshrl.u32 %v510_v18, 16  ;;  %v583_v28 = vsel %vm5615_vm2, 0, %v546_v23 }
  0x28   : > { %4840 = vmatprep.subr.bf16.mxu1 %v5215_v29  ;;  %v565_v29 = vshll.u32 %v511_v19, 16  ;;  %v4356_v37 = vcombine.low %v582_v16, %v583_v28 }
  0x29   : > { %v557_v35 = vrot.slane %v555_v27, 7 }
  0x2a   : > { %4801 = vmatpush3.bf16.msra.mxu0 %v5216_v30  ;;  %v584_v30 = vsel %vm5615_vm2, 0, %v553_v25 }
  0x2b   : > { %4841 = vmatpush3.bf16.msra.mxu1 %v5217_v31  ;;  %v564_v31 = vrot.slane %v562_v26, 7  ;;  %v4364_v38 = vcombine.low %v583_v28, %v584_v30  ;;  %v560_v42 = vor.u32 %v558_v36, %v557_v35 }
  0x2d   : > { %960 = vmatmul.mubr.bf16.vlgmr.msra.gmra.mxu0 %v4354_v8  ;;  %v567_v44 = vor.u32 %v565_v29, %v564_v31  ;;  %v585_v45 = vsel %vm5615_vm2, 0, %v560_v42 }
  0x2e   : > { %1025 = vmatmul.mubr.bf16.vlgmr.msra.gmra.mxu1 %v4362_v9  ;;  %967 = vmatprep.mubr.bf16.mxu0 %v4745_v0  ;;  %v4357_v47 = vcombine.low %v584_v30, %v585_v45 }
  0x2f   : > { %1032 = vmatprep.mubr.bf16.mxu1 %v4749_v1  ;;  %v586_v46 = vsel %vm5615_vm2, 0, %v567_v44 }
  0x30   : > { %v4365_v50 = vcombine.low %v585_v45, %v586_v46 }
  0x35   : > { %968 = vmatmul.mubr.bf16.gmra.mxu0 %v4355_v20 }
  0x36   : > { %1033 = vmatmul.mubr.bf16.gmra.mxu1 %v4363_v21  ;;  %975 = vmatprep.mubr.bf16.mxu0 %v4746_v22 }
  0x37   : > { %1040 = vmatprep.mubr.bf16.mxu1 %v4750_v24 }
  0x3d   : > { %976 = vmatmul.mubr.bf16.gmra.mxu0 %v4356_v37 }
  0x3e   : > { %1041 = vmatmul.mubr.bf16.gmra.mxu1 %v4364_v38  ;;  %983 = vmatprep.mubr.bf16.mxu0 %v4747_v40 }
  0x3f   : > { %1048 = vmatprep.mubr.bf16.mxu1 %v4751_v41 }
  0x45   : > { %984 = vmatmul.mubr.bf16.gmra.mxu0 %v4357_v47 }
  0x46   : > { %1049 = vmatmul.mubr.bf16.gmra.mxu1 %v4365_v50 }
  0xed   : > { %v4802_v51 = vpop.f32.mrf.mxu0 }
  0xee   : > { %v4842_v52 = vpop.f32.mrf.mxu1 }
  0xef   : > { %v4803_v54 = vpop.f32.mrf.mxu0 }
  0xf0   : > { %v4843_v55 = vpop.f32.mrf.mxu1  ;;  %v4804_v56 = vadd.f32 %v4803_v54, %v4802_v51 }
  0xf1   : > { %v4805_v57 = vpop.f32.mrf.mxu0  ;;  %v4844_v60 = vadd.f32 %v4843_v55, %v4842_v52 }
  0xf2   : > { %v4845_v58 = vpop.f32.mrf.mxu1  ;;  %v962_v59 = vadd.f32 %v4804_v56, %v5669_v53 }
  0xf3   : > { %v4806_v62 = vpop.f32.mrf.mxu0 }
  0xf4   : > { %v4846_v63 = vpop.f32.mrf.mxu1  ;;  %v1027_v0 = vadd.f32 %v4844_v60, %v962_v59  ;;  %v4807_v1 = vadd.f32 %v4806_v62, %v4805_v57 }
  0xf5   : > { %v4808_v2 = vpop.f32.mrf.mxu0  ;;  %v4847_v6 = vadd.f32 %v4846_v63, %v4845_v58 }
  0xf6   : > { %v4848_v3 = vpop.f32.mrf.mxu1  ;;  %vm1057_vm3 = vcmp.gt.f32.partialorder %v1027_v0, 0.0  ;;  %v1065_v4 = vmul.f32 0.1, %v1027_v0  ;;  %v965_v5 = vadd.f32 %v4807_v1, %v5669_v53 }
  0xf7   : > { %v4809_v7 = vpop.f32.mrf.mxu0 }
  0xf8   : > { %v4849_v8 = vpop.f32.mrf.mxu1  ;;  %v5673_v9 = vsel %vm1057_vm3, %v1027_v0, %v1065_v4   ;;  %v1030_v12 = vadd.f32 %v4847_v6, %v965_v5  ;;  %v4810_v13 = vadd.f32 %v4809_v7, %v4808_v2 }
  0xf9   : > { %v4811_v14 = vpop.f32.mrf.mxu0  ;;  %v4850_v18 = vadd.f32 %v4849_v8, %v4848_v3 }
  0xfa   : > { %v4851_v15 = vpop.f32.mrf.mxu1  ;;  %vm1058_vm4 = vcmp.gt.f32.partialorder %v1030_v12, 0.0  ;;  %v1066_v16 = vmul.f32 0.1, %v1030_v12  ;;  %v970_v17 = vadd.f32 %v4810_v13, %v5669_v53 }
  0xfb   : > { %v4812_v19 = vpop.f32.mrf.mxu0 }
  0xfc   : > { %v4852_v20 = vpop.f32.mrf.mxu1  ;;  %v1074_v21 = vsel %vm1058_vm4, %v1030_v12, %v1066_v16   ;;  %v1035_v22 = vadd.f32 %v4850_v18, %v970_v17  ;;  %v4813_v23 = vadd.f32 %v4812_v19, %v4811_v14 }
  0xfd   : > { %v4814_v24 = vpop.f32.mrf.mxu0  ;;  %v4853_v28 = vadd.f32 %v4852_v20, %v4851_v15 }
  0xfe   : > { %v4854_v25 = vpop.f32.mrf.mxu1  ;;  %vm1059_vm5 = vcmp.gt.f32.partialorder %v1035_v22, 0.0  ;;  %v1067_v26 = vmul.f32 0.1, %v1035_v22  ;;  %v973_v27 = vadd.f32 %v4813_v23, %v5669_v53 }
  0xff   : > { %v4815_v29 = vpop.f32.mrf.mxu0 }
 0x100   : > { %v4855_v30 = vpop.f32.mrf.mxu1  ;;  %v1075_v31 = vsel %vm1059_vm5, %v1035_v22, %v1067_v26   ;;  %v1038_v35 = vadd.f32 %v4853_v28, %v973_v27  ;;  %v4816_v36 = vadd.f32 %v4815_v29, %v4814_v24 }
 0x101   : > { %v4817_v37 = vpop.f32.mrf.mxu0  ;;  %v4856_v42 = vadd.f32 %v4855_v30, %v4854_v25 }
 0x102   : > { %v4857_v38 = vpop.f32.mrf.mxu1  ;;  %vm1060_vm6 = vcmp.gt.f32.partialorder %v1038_v35, 0.0  ;;  %v1068_v40 = vmul.f32 0.1, %v1038_v35  ;;  %v978_v41 = vadd.f32 %v4816_v36, %v5669_v53 }
 0x103   : > { %v4818_v44 = vpop.f32.mrf.mxu0 }
 0x104   : > { %v4858_v45 = vpop.f32.mrf.mxu1  ;;  %v1076_v46 = vsel %vm1060_vm6, %v1038_v35, %v1068_v40   ;;  %v1043_v47 = vadd.f32 %v4856_v42, %v978_v41  ;;  %v4819_v50 = vadd.f32 %v4818_v44, %v4817_v37 }
 0x105   : > { %v4820_v51 = vpop.f32.mrf.mxu0  ;;  %v4859_v56 = vadd.f32 %v4858_v45, %v4857_v38 }
 0x106   : > { %v4860_v52 = vpop.f32.mrf.mxu1  ;;  %vm1061_vm7 = vcmp.gt.f32.partialorder %v1043_v47, 0.0  ;;  %v1069_v54 = vmul.f32 0.1, %v1043_v47  ;;  %v981_v55 = vadd.f32 %v4819_v50, %v5669_v53 }
 0x107   : > { %v4821_v57 = vpop.f32.mrf.mxu0 }
 0x108   : > { %v4861_v58 = vpop.f32.mrf.mxu1  ;;  %v1077_v59 = vsel %vm1061_vm7, %v1043_v47, %v1069_v54   ;;  %v1046_v60 = vadd.f32 %v4859_v56, %v981_v55  ;;  %v4822_v62 = vadd.f32 %v4821_v57, %v4820_v51 }
 0x109   : > { %v4823_v63 = vpop.f32.mrf.mxu0  ;;  %v4862_v3 = vadd.f32 %v4861_v58, %v4860_v52 }
 0x10a   : > { %v4863_v0 = vpop.f32.mrf.mxu1  ;;  %vm1062_vm8 = vcmp.gt.f32.partialorder %v1046_v60, 0.0  ;;  %v1070_v1 = vmul.f32 0.1, %v1046_v60  ;;  %v986_v2 = vadd.f32 %v4822_v62, %v5669_v53 }
 0x10b   : > { %v4824_v4 = vpop.f32.mrf.mxu0 }
 0x10c   : > { %v4864_v5 = vpop.f32.mrf.mxu1  ;;  %v1078_v6 = vsel %vm1062_vm8, %v1046_v60, %v1070_v1   ;;  %v1051_v7 = vadd.f32 %v4862_v3, %v986_v2  ;;  %v4825_v8 = vadd.f32 %v4824_v4, %v4823_v63 }
 0x10d   : > { %v4865_v14 = vadd.f32 %v4864_v5, %v4863_v0 }
 0x10e   : > { %vm1063_vm9 = vcmp.gt.f32.partialorder %v1051_v7, 0.0  ;;  %v1071_v12 = vmul.f32 0.1, %v1051_v7  ;;  %v989_v13 = vadd.f32 %v4825_v8, %v5669_v53 }
 0x110   : > { %v1079_v15 = vsel %vm1063_vm9, %v1051_v7, %v1071_v12   ;;  %v1054_v16 = vadd.f32 %v4865_v14, %v989_v13 }
 0x112   : > { %vm1064_vm10 = vcmp.gt.f32.partialorder %v1054_v16, 0.0  ;;  %v1072_v17 = vmul.f32 0.1, %v1054_v16 }
 0x114   : > { %v1080_v18 = vsel %vm1064_vm10, %v1054_v16, %v1072_v17  }
 0x115 LB: >> { %vm1232_vm11 = vcmask 1044480   ;;  %vm1233_vm12 = vsmask.f32 4352  ;;  %v4754_v53 = vpack.c.bf16 %v5366_v21, %v5366_v21  ;;  %v4755_v19 = vpack.c.bf16 %v5362_v31, %v5362_v31  ;;  %s4752_s24 = smul.u32 144, %s5374_s23  ;;  %v7108_v61 = vld [vmem:[#allocation2_spill] sm:$0xff]  ;;  %s5377_s28 = smov 64   ;;  %s5374_s23 = sphi %s5698_s23, %s1086_s23   ;;  %v5370_v9 = vphi %v5673_v9, %v7120_v9   ;;  %v5366_v21 = vphi %v1074_v21, %v7119_v21   ;;  %v5362_v31 = vphi %v1075_v31, %v7118_v31   ;;  %v5358_v46 = vphi %v1076_v46, %v7117_v46   ;;  %v5354_v59 = vphi %v1077_v59, %v7116_v59   ;;  %v5350_v6 = vphi %v1078_v6, %v7115_v6   ;;  %v5346_v15 = vphi %v1079_v15, %v7114_v15   ;;  %v5342_v18 = vphi %v1080_v18, %v7113_v18  }
 0x116   : >> { %v4756_v20 = vpack.c.bf16 %v5358_v46, %v5358_v46  ;;  %v4757_v22 = vpack.c.bf16 %v5354_v59, %v5354_v59  ;;  %vm1399_vm13 = vcmask 1042432   ;;  %vm5745_vm14 = vmand %vm1232_vm11, %vm1233_vm12  ;;  %vm1400_vm15 = vcmask 1046532   ;;  %s5378_s29 = smov 96   ;;  %s5379_s16 = smov 32  }
 0x117   : >> { %v1168_v23 = vshrl.u32 %v4754_v53, 16  ;;  %v1171_v24 = vshll.u32 %v4754_v53, 16  ;;  %v1175_v25 = vshrl.u32 %v4755_v19, 16  ;;  %v1178_v26 = vshll.u32 %v4755_v19, 16  ;;  %s5741_s27 = scalar_lea.vmem %s7087_s3, %s4752_s24  ;;  %vm5808_vm0 = vmor %vm1399_vm13, %vm1400_vm15  ;;  %s6073_s21 = scalar_lea.vmem %s7089_s5, %s4752_s24 }
 0x118   : >> { %v1182_v27 = vshrl.u32 %v4756_v20, 16  ;;  %v1185_v28 = vshll.u32 %v4756_v20, 16  ;;  %v1189_v29 = vshrl.u32 %v4757_v22, 16  ;;  %v1192_v30 = vshll.u32 %v4757_v22, 16  ;;  %v5220_v38 = vld [vmem:[%s5741_s27 + $0x78] sm:$0xff]   ;;  %v5222_v58 = vld [vmem:[%s5741_s27 + $0x70] sm:$0xff]   ;;  %s1134_s24 = scalar_lea.vmem %s7088_s4, %s5374_s23 }
 0x119   : >> { %v1170_v35 = vrot.slane %v1168_v23, 7  ;;  %v1177_v36 = vrot.slane %v1175_v25, 7  ;;  %v4753_v42 = vpack.c.bf16 %v5370_v9, %v5370_v9  ;;  %v5755_v44 = vsel %vm5745_vm14, %v7108_v61, 0  ;;  %v5221_v45 = vld [vmem:[%s5741_s27 + $0x38] sm:$0xff]   ;;  %4866 = vmatprep.subr.bf16.mxu0 %v5220_v38  ;;  %v5223_v60 = vld [vmem:[%s5741_s27 + $0x30] sm:$0xff]   ;;  %v5224_v14 = vld [vmem:[%s5741_s27 + $0x68] sm:$0xff]  }
 0x11a   : >> { %v1184_v40 = vrot.slane %v1182_v27, 7  ;;  %v1191_v41 = vrot.slane %v1189_v29, 7  ;;  %v5760_v51 = vcombine.low %v5755_v44, %v5755_v44  ;;  %v5764_v52 = vcombine.high %v5755_v44, %v5755_v44  ;;  %4867 = vmatpush3.bf16.msra.mxu0 %v5221_v45  ;;  %v5225_v22 = vld [vmem:[%s5741_s27 + $0x28] sm:$0xff]  }
 0x11b   : >> { %v1173_v47 = vor.u32 %v1171_v24, %v1170_v35  ;;  %v1180_v50 = vor.u32 %v1178_v26, %v1177_v36  ;;  %v1161_v56 = vshrl.u32 %v4753_v42, 16  ;;  %v1164_v57 = vshll.u32 %v4753_v42, 16  ;;  %4868 = vmatprep.subr.bf16.mxu0 %v5222_v58 }
 0x11c   : >> { %v1187_v54 = vor.u32 %v1185_v28, %v1184_v40  ;;  %v1194_v55 = vor.u32 %v1192_v30, %v1191_v41  ;;  %v4428_v0 = vrot.slane %v5760_v51, 9  ;;  %v1404_v1 = vrot.slane %v5764_v52, 5  ;;  %v5226_v30 = vld [vmem:[%s5741_s27 + $0x60] sm:$0xff]  }
 0x11d   : >> { %v1225_v62 = vsel %vm5615_vm2, 0, %v1173_v47  ;;  %v1226_v63 = vsel %vm5615_vm2, 0, %v1180_v50  ;;  %v1163_v19 = vrot.slane %v1161_v56, 7  ;;  %v5227_v41 = vld [vmem:[%s5741_s27 + $0x20] sm:$0xff]   ;;  %vm1284_vm1 = vsmask.f32 3328 }
 0x11e   : >> { %v1237_v2 = vsel %vm5745_vm14, %v1225_v62, 0  ;;  %v5778_v3 = vsel %vm5745_vm14, %v1226_v63, 0  ;;  %v1227_v4 = vsel %vm5615_vm2, 0, %v1187_v54  ;;  %v1228_v5 = vsel %vm5615_vm2, 0, %v1194_v55  ;;  %4869 = vmatpush3.bf16.msra.mxu0 %v5223_v60 }
 0x11f   : >> { %v5784_v7 = vcombine.low %v1237_v2, %v1237_v2  ;;  %v5786_v8 = vcombine.high %v1237_v2, %v1237_v2  ;;  %v5789_v12 = vcombine.low %v1237_v2, %v5778_v3  ;;  %v5793_v13 = vcombine.low %v5778_v3, %v5778_v3  ;;  %4870 = vmatprep.subr.bf16.mxu0 %v5224_v14  ;;  %v5229_v14 = vld [vmem:[%s5741_s27 + $0x18] sm:$0xff]  }
 0x120   : >> { %v5798_v16 = vcombine.high %v5778_v3, %v5778_v3  ;;  %v1239_v17 = vsel %vm5745_vm14, %v1227_v4, 0  ;;  %v5804_v53 = vsel %vm5745_vm14, %v1228_v5, 0  ;;  %v1166_v27 = vor.u32 %v1164_v57, %v1163_v19  ;;  %v5228_v57 = vld [vmem:[%s5741_s27 + $0x58] sm:$0xff]  }
 0x121   : >> { %1532 = vrot.lane.b32.xlu1 %v5789_v12, %s5377_s28  ;;  %v5815_v23 = vcombine.low %v1239_v17, %v1239_v17  ;;  %v5817_v24 = vcombine.high %v1239_v17, %v1239_v17  ;;  %v5820_v25 = vcombine.low %v1239_v17, %v5804_v53  ;;  %v5824_v26 = vcombine.low %v5804_v53, %v5804_v53 }
 0x122   : >> { %v4430_v28 = vrot.slane %v5784_v7, 9  ;;  %v1412_v29 = vrot.slane %v5786_v8, 5  ;;  %v5833_v35 = vcombine.high %v5804_v53, %v5804_v53  ;;  %v4431_v36 = vrot.slane %v5793_v13, 9  ;;  %4871 = vmatpush3.bf16.msra.mxu0 %v5225_v22 }
 0x123   : >> { %1534 = vrot.lane.b32.xlu0 %v5820_v25, %s5377_s28  ;;  %v1416_v38 = vrot.slane %v5798_v16, 5  ;;  %v4432_v40 = vrot.slane %v5815_v23, 9  ;;  %v1224_v42 = vsel %vm5615_vm2, 0, %v1166_v27  ;;  %v4452_v47 = vcombine.low %v5778_v3, %v1239_v17  ;;  %4872 = vmatprep.subr.bf16.mxu0 %v5226_v30  ;;  %v5230_v17 = vld [vmem:[%s5741_s27 + $0x50] sm:$0xff]  }
 0x124   : >> { %v1413_v45 = vsel %vm5808_vm0, %v4430_v28, %v1412_v29  ;;  %v1420_v50 = vrot.slane %v5817_v24, 5  ;;  %v5847_v54 = vsel %vm5745_vm14, %v1224_v42, 0  ;;  %v5855_v56 = vsel %vm5808_vm0, %v4428_v0, %v1404_v1 }
 0x125   : >> { %v5851_v55 = vsel %vm5808_vm0, %v4431_v36, %v1416_v38  ;;  %v4414_v58 = vcombine.low %v5847_v54, %v5847_v54  ;;  %v4451_v60 = vcombine.low %v5847_v54, %v1237_v2  ;;  %v4415_v62 = vcombine.high %v5847_v54, %v5847_v54 }
 0x126   : >> { %v5865_v63 = vsel %vm5808_vm0, %v4432_v40, %v1420_v50  ;;  %v4433_v1 = vrot.slane %v5824_v26, 9  ;;  %v1424_v3 = vrot.slane %v5833_v35, 5  ;;  %v4758_v2 = vpack.c.bf16 %v5350_v6, %v5350_v6  ;;  %4873 = vmatpush3.bf16.msra.mxu0 %v5227_v41 }
 0x127   : >> { %v4460_v0 = vcombine.low %v5851_v55, %v5865_v63  ;;  %1505 = vrot.lane.b32.xlu1 %v4451_v60, %s5378_s29  ;;  %v4429_v4 = vrot.slane %v4414_v58, 9  ;;  %v1408_v5 = vrot.slane %v4415_v62, 5  ;;  %v5877_v19 = vcombine.low %v1413_v45, %v5851_v55  ;;  %4874 = vmatprep.subr.bf16.mxu0 %v5228_v57  ;;  %v5231_v60 = vld [vmem:[%s5741_s27 + $0x10] sm:$0xff]  }
 0x128   : >> { %vm1285_vm3 = vsmask.f32 7440  ;;  %v1288_v22 = vshrl.u32 %v5760_v51, 16  ;;  %v1291_v27 = vshll.u32 %v5760_v51, 16  ;;  %v1196_v29 = vshrl.u32 %v4758_v2, 16 }
 0x129   : >> { %v1409_v28 = vsel %vm5808_vm0, %v4429_v4, %v1408_v5  ;;  %v1199_v30 = vshll.u32 %v4758_v2, 16  ;;  %v1297_v36 = vshll.u32 %v5764_v52, 16  ;;  %v1302_v55 = vshrl.u32 %v4414_v58, 16  ;;  %v5232_v4 = vld [vmem:[%s5741_s27 + $0x48] sm:$0xff]   ;;  %vm5908_vm4 = vmor %vm1284_vm1, %vm1285_vm3 }
 0x12a   : >> { %v4459_v38 = vcombine.low %v1409_v28, %v1413_v45  ;;  %v4447_v40 = vcombine.low %v5855_v56, %v1409_v28  ;;  %v1290_v41 = vrot.slane %v1288_v22, 4  ;;  %v1293_v42 = vrot.slane %v1291_v27, 5  ;;  %4875 = vmatpush3.bf16.msra.mxu0 %v5229_v14  ;;  %v5234_v22 = vld [vmem:[%s5741_s27 + $0x88] sm:$0xff]  }
 0x12b   : >> { %1507 = vrot.lane.b32.xlu1 %v4452_v47, %s5378_s29  ;;  %v1198_v50 = vrot.slane %v1196_v29, 7  ;;  %v1299_v51 = vrot.slane %v1297_v36, 5  ;;  %v1305_v57 = vshll.u32 %v4414_v58, 16  ;;  %v1311_v45 = vshll.u32 %v4415_v62, 16  ;;  %4876 = vmatprep.subr.bf16.mxu0 %v5230_v17  ;;  %v5233_v14 = vld [vmem:[%s5741_s27 + $0x8] sm:$0xff]  }
 0x12c   : >> { %1523 = vrot.lane.b32.xlu0 %v4459_v38, %s5379_s16  ;;  %v1294_v52 = vor.u32 %v1293_v42, %v1290_v41  ;;  %v1316_v5 = vshrl.u32 %v5784_v7, 16  ;;  %v1319_v2 = vshll.u32 %v5784_v7, 16  ;;  %v1304_v27 = vrot.slane %v1302_v55, 4  ;;  %5050 = vmatprep.subr.bf16.mxu1 %v5234_v22  ;;  %v5235_v38 = vld [vmem:[%s5741_s27 + $0x40] sm:$0xff]  }
 0x12d   : >> { %v1201_v47 = vor.u32 %v1199_v30, %v1198_v50  ;;  %v1307_v28 = vrot.slane %v1305_v57, 5  ;;  %v1325_v58 = vshll.u32 %v5786_v8, 16  ;;  %v1313_v36 = vrot.slane %v1311_v45, 5  ;;  %5051 = vmatpush3.bf16.msra.mxu1 %v5234_v22 }
 0x12e   : >> { %v1295_v29 = vrot.slane %v1294_v52, 4  ;;  %v1318_v61 = vrot.slane %v1316_v5, 4  ;;  %v1321_v11 = vrot.slane %v1319_v2, 5  ;;  %v1330_v30 = vshrl.u32 %v5793_v13, 16  ;;  %4877 = vmatpush3.bf16.msra.mxu0 %v5231_v60  ;;  %v5236_v2 = vld [vmem:[%s5741_s27] sm:$0xff]  }
 0x12f   : >> { %1493 = vrot.lane.b32.xlu1 %v4447_v40, %s5377_s28  ;;  %v1229_v62 = vsel %vm5615_vm2, 0, %v1201_v47  ;;  %v1308_v7 = vor.u32 %v1307_v28, %v1304_v27  ;;  %v1327_v17 = vrot.slane %v1325_v58, 5  ;;  %v1425_v41 = vsel %vm5808_vm0, %v4433_v1, %v1424_v3  ;;  %4878 = vmatprep.subr.bf16.mxu0 %v5232_v4  ;;  %v5237_v1 = vld [vmem:[%s5741_s27 + $0x80] sm:$0xff]   ;;  %s1919_s27 = scalar_lea.vmem %s7090_s6, %s5374_s23 }
 0x130   : >> { %1525 = vrot.lane.b32.xlu0 %v4460_v0, %s5379_s16  ;;  %v5902_v8 = vsel %vm5745_vm14, %v1229_v62, 0  ;;  %v1322_v42 = vor.u32 %v1321_v11, %v1318_v61  ;;  %v1333_v50 = vshll.u32 %v5793_v13, 16  ;;  %v1332_v60 = vrot.slane %v1330_v30, 4  ;;  %5052 = vmatprep.subr.bf16.mxu1 %v5237_v1 }
 0x131   : >> { %v4424_v0 = vcombine.low %v5902_v8, %v5902_v8  ;;  %v4425_v55 = vcombine.high %v5902_v8, %v5902_v8  ;;  %v1309_v57 = vrot.slane %v1308_v7, 4  ;;  %v1339_v45 = vshll.u32 %v5798_v16, 16  ;;  %5053 = vmatpush3.bf16.msra.mxu1 %v5237_v1 }
 0x132   : >> { %v1323_v3 = vrot.slane %v1322_v42, 4  ;;  %v1335_v52 = vrot.slane %v1333_v50, 5  ;;  %v1344_v61 = vshrl.u32 %v5815_v23, 16  ;;  %v5924_v4 = vsel %vm5908_vm4, %v1295_v29, %v1299_v51  ;;  %4879 = vmatpush3.bf16.msra.mxu0 %v5233_v14 }
 0x133   : >> { %v4434_v11 = vrot.slane %v4424_v0, 9  ;;  %v1428_v13 = vrot.slane %v4425_v55, 5  ;;  %1495 = vrot.lane.b32.xlu1 %v5877_v19, %s5377_s28  ;;  %v1347_v5 = vshll.u32 %v5815_v23, 16  ;;  %v5930_v22 = vsel %vm5908_vm4, %v1309_v57, %v1313_v36  ;;  %4880 = vmatprep.subr.bf16.mxu0 %v5235_v38 }
 0x134   : >> { %v5934_v16 = vsel %vm5908_vm4, %v1323_v3, %v1327_v17  ;;  %v1336_v47 = vor.u32 %v1335_v52, %v1332_v60  ;;  %v1341_v27 = vrot.slane %v1339_v45, 5  ;;  %v1346_v28 = vrot.slane %v1344_v61, 4 }
 0x135   : >> { %v5938_v51 = vsel %vm5808_vm0, %v4434_v11, %v1428_v13  ;;  %v4455_v23 = vcombine.low %v5930_v22, %v5934_v16  ;;  %v1349_v58 = vrot.slane %v1347_v5, 5  ;;  %v1353_v36 = vshll.u32 %v5817_v24, 16 }
 0x136   : >> { %v4461_v14 = vcombine.low %v1425_v41, %v5938_v51  ;;  %v1337_v29 = vrot.slane %v1336_v47, 4  ;;  %v1358_v62 = vshrl.u32 %v5824_v26, 16  ;;  %v4443_v7 = vcombine.low %v5924_v4, %v5930_v22  ;;  %4881 = vmatpush3.bf16.msra.mxu0 %v5236_v2 }
 0x137   : >> { %v1350_v17 = vor.u32 %v1349_v58, %v1346_v28  ;;  %v1361_v30 = vshll.u32 %v5824_v26, 16  ;;  %v1367_v38 = vshll.u32 %v5833_v35, 16  ;;  %v1355_v50 = vrot.slane %v1353_v36, 5 }
 0x138   : >> { %1527 = vrot.lane.b32.xlu0 %v4461_v14, %s5379_s16  ;;  %v5952_v42 = vsel %vm5908_vm4, %v1337_v29, %v1341_v27  ;;  %v1360_v57 = vrot.slane %v1358_v62, 4  ;;  %v1372_v52 = vshrl.u32 %v4424_v0, 16  ;;  %v1375_v45 = vshll.u32 %v4424_v0, 16 }
 0x139   : >> { %v4444_v24 = vcombine.low %v5934_v16, %v5952_v42  ;;  %v1351_v60 = vrot.slane %v1350_v17, 4  ;;  %v1363_v1 = vrot.slane %v1361_v30, 5  ;;  %v1369_v3 = vrot.slane %v1367_v38, 5 }
 0x13a   : >> { %v4759_v61 = vpack.c.bf16 %v5346_v15, %v5346_v15  ;;  %v1381_v11 = vshll.u32 %v4425_v55, 16  ;;  %v1374_v5 = vrot.slane %v1372_v52, 4  ;;  %v1377_v2 = vrot.slane %v1375_v45, 5 }
 0x13b   : >> { %1475 = vrot.lane.b32.xlu1 %v4444_v24, %s5379_s16  ;;  %v5959_v26 = vsel %vm5908_vm4, %v1351_v60, %v1355_v50  ;;  %v1364_v35 = vor.u32 %v1363_v1, %v1360_v57  ;;  %v4449_v0 = vcombine.low %v5865_v63, %v1425_v41  ;;  %vm1550_vm5 = vcmask 261120  }
 0x13c   : >> { %1473 = vrot.lane.b32.xlu0 %v4443_v7, %s5379_s16  ;;  %v4456_v13 = vcombine.low %v5952_v42, %v5959_v26  ;;  %v1203_v27 = vshrl.u32 %v4759_v61, 16  ;;  %v1206_v28 = vshll.u32 %v4759_v61, 16  ;;  %v1378_v58 = vor.u32 %v1377_v2, %v1374_v5  ;;  %5054 = vmatprep.mubr.msk.bf16.mxu1 %vm1550_vm5, %v5877_v19 }
 0x13d   : >> { %v1365_v47 = vrot.slane %v1364_v35, 4  ;;  %v1383_v14 = vrot.slane %v1381_v11, 5  ;;  %v4760_v36 = vpack.c.bf16 %v5342_v18, %v5342_v18  ;;  %5055 = vmatmul.mubr.msk.bf16.vlgmr.msra.gmra.mxu1 %vm1550_vm5, %v4449_v0  ;;  %v4453_v52 = vcombine.low %v5804_v53, %v5902_v8 }
 0x13e   : >> { %v1205_v55 = vrot.slane %v1203_v27, 7  ;;  %v1379_v41 = vrot.slane %v1378_v58, 4  ;;  %vm1563_vm6 = vcmask 523264   ;;  %vm1572_vm7 = vcmask 785408  }
 0x13f   : >> { %v5969_v29 = vsel %vm5908_vm4, %v1365_v47, %v1369_v3  ;;  %v1210_v7 = vshrl.u32 %v4760_v36, 16  ;;  %v1213_v17 = vshll.u32 %v4760_v36, 16 }
 0x140   : >> { %1541 = vrot.lane.b32.xlu0 %v4444_v24, %s5378_s29  ;;  %v4445_v63 = vcombine.low %v5959_v26, %v5969_v29  ;;  %v1208_v62 = vor.u32 %v1206_v28, %v1205_v55  ;;  %v5982_v30 = vsel %vm5908_vm4, %v1379_v41, %v1383_v14 }
 0x141   : >> { %v4457_v38 = vcombine.low %v5969_v29, %v5982_v30  ;;  %v1212_v50 = vrot.slane %v1210_v7, 7 }
 0x142   : >> { %1477 = vrot.lane.b32.xlu1 %v4445_v63, %s5379_s16  ;;  %v1230_v19 = vsel %vm5615_vm2, 0, %v1208_v62 }
 0x143   : >> { %v1242_v57 = vsel %vm5745_vm14, %v1230_v19, 0  ;;  %v1215_v3 = vor.u32 %v1213_v17, %v1212_v50 }
 0x144   : >> { %1543 = vrot.lane.b32.xlu0 %v4445_v63, %s5378_s29  ;;  %v5992_v24 = vcombine.low %v5902_v8, %v1242_v57  ;;  %v4426_v60 = vcombine.low %v1242_v57, %v1242_v57  ;;  %v4427_v1 = vcombine.high %v1242_v57, %v1242_v57 }
 0x145   : >> { %v1231_v11 = vsel %vm5615_vm2, 0, %v1215_v3 }
 0x146   : >> { %1497 = vrot.lane.b32.xlu1 %v4449_v0, %s5377_s28  ;;  %v1386_v45 = vshrl.u32 %v4426_v60, 16  ;;  %v1389_v35 = vshll.u32 %v4426_v60, 16  ;;  %v1395_v61 = vshll.u32 %v4427_v1, 16  ;;  %v1243_v5 = vsel %vm5745_vm14, %v1231_v11, 0 }
 0x147   : >> { %v4435_v2 = vrot.slane %v4426_v60, 9  ;;  %v1432_v47 = vrot.slane %v4427_v1, 5  ;;  %v4436_v0 = vcombine.low %v1243_v5, %v1243_v5  ;;  %v4437_v58 = vcombine.high %v1243_v5, %v1243_v5 }
 0x148   : >> { %1536 = vrot.lane.b32.xlu0 %v5992_v24, %s5377_s28  ;;  %v1388_v27 = vrot.slane %v1386_v45, 4  ;;  %v1391_v28 = vrot.slane %v1389_v35, 5  ;;  %v1397_v53 = vrot.slane %v1395_v61, 5 }
 0x149   : >> { %v1433_v8 = vsel %vm5808_vm0, %v4435_v2, %v1432_v47  ;;  %v4438_v55 = vrot.slane %v4436_v0, 9  ;;  %v1440_v63 = vshrl.u32 %v4436_v0, 16  ;;  %v1455_v41 = vrot.slane %v4437_v58, 5 }
 0x14a   : >> { %1509 = vrot.lane.b32.xlu1 %v4453_v52, %s5378_s29  ;;  %v1392_v14 = vor.u32 %v1391_v28, %v1388_v27  ;;  %v4450_v36 = vcombine.low %v5938_v51, %v1433_v8  ;;  %v1443_v62 = vshll.u32 %v4436_v0, 16  ;;  %v1449_v7 = vshll.u32 %v4437_v58, 16 }
 0x14b   : >> { %v1442_v19 = vrot.slane %v1440_v63, 4  ;;  %v1456_v50 = vsel %vm5808_vm0, %v4438_v55, %v1455_v41  ;;  %v4463_v47 = vcombine.low %v1243_v5, %v5755_v44  ;;  %v4454_v27 = vcombine.low %v1242_v57, %v1243_v5 }
 0x14c   : >> { %v1393_v17 = vrot.slane %v1392_v14, 4  ;;  %5058 = vmatprep.mubr.msk.bf16.mxu1 %vm1550_vm5, %v4450_v36  ;;  %v1445_v60 = vrot.slane %v1443_v62, 5  ;;  %v4465_v3 = vcombine.low %v1456_v50, %v5855_v56  ;;  %v1451_v45 = vrot.slane %v1449_v7, 5 }
 0x14d   : >> { %v4462_v35 = vcombine.low %v1433_v8, %v1456_v50  ;;  %v4439_v57 = vcombine.low %v5755_v44, %v5847_v54 }
 0x14e   : >> { %v6012_v1 = vsel %vm5908_vm4, %v1393_v17, %v1397_v53  ;;  %v1446_v52 = vor.u32 %v1445_v60, %v1442_v19  ;;  %5059 = vmatmul.mubr.msk.bf16.gmra.mxu1 %vm1550_vm5, %v4465_v3 }
 0x14f   : >> { %v4446_v51 = vcombine.low %v5982_v30, %v6012_v1 }
 0x150   : >> { %v1447_v61 = vrot.slane %v1446_v52, 4 }
 0x151   : >> { %1545 = vrot.lane.b32.xlu0 %v4446_v51, %s5378_s29  ;;  %1479 = vrot.lane.b32.xlu1 %v4446_v51, %s5379_s16 }
 0x152   : >> { %v1452_v11 = vsel %vm5908_vm4, %v1447_v61, %v1451_v45 }
 0x153   : >> { %v4458_v2 = vcombine.low %v6012_v1, %v1452_v11  ;;  %v4464_v28 = vcombine.low %v1452_v11, %v5924_v4 }
 0x155   : >> { %1529 = vrot.lane.b32.xlu0 %v4462_v35, %s5379_s16  ;;  %1499 = vrot.lane.b32.xlu1 %v4450_v36, %s5377_s28 }
 0x159   : >> { %1538 = vrot.lane.b32.xlu0 %v4463_v47, %s5377_s28  ;;  %1511 = vrot.lane.b32.xlu1 %v4454_v27, %s5378_s29 }
 0x15d   : >> { %1547 = vrot.lane.b32.xlu0 %v4464_v28, %s5378_s29 }
 0x193   : >> { %v1533_v0 = vpop.permute.xlu1 %1532 }
 0x195   : >> { %v1535_v53 = vpop.permute.xlu0 %1534 }
 0x199   : >> { %v1506_v8 = vpop.permute.xlu1 %1505 }
 0x19d   : >> { %v1508_v58 = vpop.permute.xlu1 %1507 }
 0x19e   : >> { %v1524_v14 = vpop.permute.xlu0 %1523 }
 0x19f   : >> { %v1587_v7 = vsel %vm1550_vm5, %v4455_v23, %v1524_v14 }
 0x1a0   : >> { %v1598_v60 = vsel %vm1563_vm6, %v1587_v7, %v1533_v0  ;;  %v5243_v7 = vld [vmem:[%s6073_s21 + $0x30] sm:$0xff]  }
 0x1a1   : >> { %v1494_v55 = vpop.permute.xlu1 %1493 }
 0x1a2   : >> { %v1526_v63 = vpop.permute.xlu0 %1525 }
 0x1a3   : >> { %v1590_v54 = vsel %vm1550_vm5, %v4456_v13, %v1526_v63 }
 0x1a4   : >> { %v1600_v51 = vsel %vm1563_vm6, %v1590_v54, %v1535_v53 }
 0x1a5   : >> { %v1496_v41 = vpop.permute.xlu1 %1495 }
 0x1aa   : >> { %v1528_v36 = vpop.permute.xlu0 %1527 }
 0x1ad   : >> { %v1476_v62 = vpop.permute.xlu1 %1475 }
 0x1ae   : >> { %v1474_v5 = vpop.permute.xlu0 %1473  ;;  %v1556_v23 = vsel %vm1550_vm5, %v5789_v12, %v1476_v62  ;;  %v1593_v12 = vsel %vm1550_vm5, %v4457_v38, %v1528_v36  ;;  %v5242_v62 = vld [vmem:[%s6073_s21 + $0x70] sm:$0xff]  }
 0x1af   : >> { %v1553_v17 = vsel %vm1550_vm5, %v4439_v57, %v1474_v5  ;;  %v1567_v42 = vsel %vm1563_vm6, %v1556_v23, %v1496_v41  ;;  %v5240_v57 = vld [vmem:[%s6073_s21 + $0x78] sm:$0xff]  }
 0x1b0   : >> { %v1565_v19 = vsel %vm1563_vm6, %v1553_v17, %v1494_v55  ;;  %v1577_v26 = vsel %vm1572_vm7, %v1567_v42, %v1508_v58  ;;  %v5241_v5 = vld [vmem:[%s6073_s21 + $0x38] sm:$0xff]   ;;  %4912 = vmatprep.subr.bf16.mxu1 %v5240_v57  ;;  %v5244_v17 = vld [vmem:[%s6073_s21 + $0x68] sm:$0xff]  }
 0x1b1   : >> { %v1574_v16 = vsel %vm1572_vm7, %v1565_v19, %v1506_v8  ;;  %4913 = vmatpush3.bf16.msra.mxu1 %v5241_v5  ;;  %v5245_v19 = vld [vmem:[%s6073_s21 + $0x28] sm:$0xff]  }
 0x1b2   : >> { %v1542_v50 = vpop.permute.xlu0 %1541  ;;  %4914 = vmatprep.subr.bf16.mxu1 %v5242_v62 }
 0x1b3   : >> { %v1606_v1 = vsel %vm1572_vm7, %v1598_v60, %v1542_v50 }
 0x1b4   : >> { %1775 = vmatprep.mubr.bf16.mxu0 %v1606_v1  ;;  %v1478_v22 = vpop.permute.xlu1 %1477  ;;  %v6087_v1 = vld [vmem:[%s1134_s24] ss:$0 sm:$0xff] }
 0x1b5   : >> { %1776 = vmatmul.mubr.bf16.vlgmr.msra.gmra.mxu0 %v1574_v16  ;;  %v1559_v61 = vsel %vm1550_vm5, %v5820_v25, %v1478_v22  ;;  %4915 = vmatpush3.bf16.msra.mxu1 %v5243_v7 }
 0x1b6   : >> { %v1544_v3 = vpop.permute.xlu0 %1543  ;;  %4916 = vmatprep.subr.bf16.mxu1 %v5244_v17 }
 0x1b7   : >> { %v1609_v52 = vsel %vm1572_vm7, %v1600_v51, %v1544_v3 }
 0x1b8   : >> { %1783 = vmatprep.mubr.bf16.mxu0 %v1609_v52  ;;  %v1498_v45 = vpop.permute.xlu1 %1497 }
 0x1b9   : >> { %v1569_v11 = vsel %vm1563_vm6, %v1559_v61, %v1498_v45  ;;  %4917 = vmatpush3.bf16.msra.mxu1 %v5245_v19 }
 0x1ba   : >> { %v1537_v13 = vpop.permute.xlu0 %1536 }
 0x1bb   : >> { %v1602_v47 = vsel %vm1563_vm6, %v1593_v12, %v1537_v13 }
 0x1bc   : >> { %v1510_v35 = vpop.permute.xlu1 %1509 }
 0x1bd   : >> { %1784 = vmatmul.mubr.bf16.gmra.mxu0 %v1577_v26  ;;  %v1580_v53 = vsel %vm1572_vm7, %v1569_v11, %v1510_v35 }
 0x1c3   : >> { %v1546_v27 = vpop.permute.xlu0 %1545  ;;  %v1480_v28 = vpop.permute.xlu1 %1479 }
 0x1c4   : >> { %v1612_v0 = vsel %vm1572_vm7, %v1602_v47, %v1546_v27  ;;  %v1562_v29 = vsel %vm1550_vm5, %v5992_v24, %v1480_v28  ;;  %v5238_v24 = vld [vmem:[%s6073_s21 + $0x88] sm:$0xff]  }
 0x1c5   : >> { %1791 = vmatprep.mubr.bf16.mxu0 %v1612_v0  ;;  %5062 = vmatprep.subr.bf16.mxu0 %v5238_v24 }
 0x1c6   : >> { %1792 = vmatmul.mubr.bf16.gmra.mxu0 %v1580_v53 }
 0x1c7   : >> { %v1530_v8 = vpop.permute.xlu0 %1529  ;;  %v1500_v25 = vpop.permute.xlu1 %1499  ;;  %5063 = vmatpush3.bf16.msra.mxu0 %v5238_v24 }
 0x1c8   : >> { %v1596_v38 = vsel %vm1550_vm5, %v4458_v2, %v1530_v8  ;;  %v1571_v58 = vsel %vm1563_vm6, %v1562_v29, %v1500_v25  ;;  %v5239_v2 = vld [vmem:[%s6073_s21 + $0x80] sm:$0xff]  }
 0x1c9   : >> { %5064 = vmatprep.subr.bf16.mxu0 %v5239_v2  ;;  %v5246_v25 = vld [vmem:[%s6073_s21 + $0x60] sm:$0xff]  }
 0x1ca   : >> { %v5247_v29 = vld [vmem:[%s6073_s21 + $0x20] sm:$0xff]   ;;  %4918 = vmatprep.subr.bf16.mxu1 %v5246_v25 }
 0x1cb   : >> { %v1539_v30 = vpop.permute.xlu0 %1538  ;;  %v1512_v14 = vpop.permute.xlu1 %1511  ;;  %5065 = vmatpush3.bf16.msra.mxu0 %v5239_v2  ;;  %4919 = vmatpush3.bf16.msra.mxu1 %v5247_v29 }
 0x1cc   : >> { %v1604_v55 = vsel %vm1563_vm6, %v1596_v38, %v1539_v30  ;;  %v1583_v36 = vsel %vm1572_vm7, %v1571_v58, %v1512_v14 }
 0x1cf   : >> { %v1548_v63 = vpop.permute.xlu0 %1547 }
 0x1d0   : >> { %v1615_v41 = vsel %vm1572_vm7, %v1604_v55, %v1548_v63 }
 0x1d1   : >> { %1799 = vmatprep.mubr.bf16.mxu0 %v1615_v41 }
 0x1d2   : >> { %1800 = vmatmul.mubr.bf16.gmra.mxu0 %v1583_v36 }
 0x1fd   : >> { %v5056_v50 = vpop.f32.mrf.mxu1 }
 0x1ff   : >> { %v1842_v22 = vpop.f32.mrf.mxu1 }
 0x201   : >> { %v5057_v51 = vpop.f32.mrf.mxu1 }
 0x203   : >> { %v1845_v61 = vpop.f32.mrf.mxu1 }
 0x20e   : >> { %v6094_v41 = vpop.f32.mrf.mxu1 }
 0x275   : >> { %v4882_v60 = vpop.f32.mrf.mxu0 }
 0x277   : >> { %v4883_v54 = vpop.f32.mrf.mxu0 }
 0x278   : >> { %v4884_v16 = vadd.f32 %v4883_v54, %v4882_v60  ;;  %v5248_v60 = vld [vmem:[%s6073_s21 + $0x58] sm:$0xff]  }
 0x279   : >> { %v4885_v23 = vpop.f32.mrf.mxu0  ;;  %v5249_v54 = vld [vmem:[%s6073_s21 + $0x18] sm:$0xff]   ;;  %4920 = vmatprep.subr.bf16.mxu1 %v5248_v60 }
 0x27a   : >> { %v1778_v3 = vadd.f32 %v4884_v16, %v6087_v1  ;;  %v1858_v16 = vpop.f32.mrf.mxu1  ;;  %4921 = vmatpush3.bf16.msra.mxu1 %v5249_v54 }
 0x27b   : >> { %v4886_v52 = vpop.f32.mrf.mxu0 }
 0x27c   : >> { %v1843_v45 = vadd.f32 %v1842_v22, %v1778_v3  ;;  %v4887_v42 = vadd.f32 %v4886_v52, %v4885_v23 }
 0x27d   : >> { %v4888_v26 = vpop.f32.mrf.mxu0 }
 0x27e   : >> { %v1873_v13 = vmax.f32 %v1843_v45, 0.0  ;;  %v1781_v35 = vadd.f32 %v4887_v42, %v6087_v1 }
 0x27f   : >> { %v4889_v12 = vpop.f32.mrf.mxu0 }
 0x280   : >> { %v4762_v11 = vpack.c.bf16 %v1873_v13, %v1873_v13  ;;  %v1846_v47 = vadd.f32 %v1845_v61, %v1781_v35  ;;  %v4890_v27 = vadd.f32 %v4889_v12, %v4888_v26 }
 0x281   : >> { %v4891_v28 = vpop.f32.mrf.mxu0 }
 0x282   : >> { %v1946_v0 = vshrl.u32 %v4762_v11, 16  ;;  %v1874_v53 = vmax.f32 %v1846_v47, 0.0  ;;  %v1786_v8 = vadd.f32 %v4890_v27, %v6087_v1  ;;  %v1949_v30 = vshll.u32 %v4762_v11, 16 }
 0x283   : >> { %v4892_v38 = vpop.f32.mrf.mxu0 }
 0x284   : >> { %v1948_v58 = vrot.slane %v1946_v0, 7  ;;  %v4763_v14 = vpack.c.bf16 %v1874_v53, %v1874_v53  ;;  %v1851_v55 = vadd.f32 %v5056_v50, %v1786_v8  ;;  %v4893_v63 = vadd.f32 %v4892_v38, %v4891_v28  ;;  %v6114_v53 = vpop.f32.mrf.mxu1 }
 0x286   : >> { %v1951_v36 = vor.u32 %v1949_v30, %v1948_v58  ;;  %v1953_v24 = vshrl.u32 %v4763_v14, 16  ;;  %v1875_v2 = vmax.f32 %v1851_v55, 0.0  ;;  %v1789_v57 = vadd.f32 %v4893_v63, %v6087_v1  ;;  %v4894_v5 = vpop.f32.mrf.mxu0 }
 0x287   : >> { %v1956_v17 = vshll.u32 %v4763_v14, 16 }
 0x288   : >> { %v2009_v62 = vsel %vm5615_vm2, 0, %v1951_v36  ;;  %v1955_v7 = vrot.slane %v1953_v24, 7  ;;  %v4764_v19 = vpack.c.bf16 %v1875_v2, %v1875_v2  ;;  %v1854_v22 = vadd.f32 %v5057_v51, %v1789_v57  ;;  %v4895_v23 = vpop.f32.mrf.mxu0 }
 0x289   : >> { %v6103_v50 = vsel %vm5745_vm14, %v2009_v62, 0  ;;  %v4896_v35 = vadd.f32 %v4895_v23, %v4894_v5  ;;  %v5250_v5 = vld [vmem:[%s6073_s21 + $0x50] sm:$0xff]  }
 0x28a   : >> { %v4498_v3 = vcombine.low %v6103_v50, %v6103_v50  ;;  %v4499_v52 = vcombine.high %v6103_v50, %v6103_v50  ;;  %v1958_v45 = vor.u32 %v1956_v17, %v1955_v7  ;;  %v1960_v42 = vshrl.u32 %v4764_v19, 16  ;;  %v4897_v61 = vpop.f32.mrf.mxu0  ;;  %v5251_v62 = vld [vmem:[%s6073_s21 + $0x10] sm:$0xff]   ;;  %v1861_v17 = vpop.f32.mrf.mxu1  ;;  %4922 = vmatprep.subr.bf16.mxu1 %v5250_v5 }
 0x28b   : >> { %v1963_v26 = vshll.u32 %v4764_v19, 16  ;;  %v1876_v13 = vmax.f32 %v1854_v22, 0.0  ;;  %v1794_v0 = vadd.f32 %v4896_v35, %v6087_v1  ;;  %4923 = vmatpush3.bf16.msra.mxu1 %v5251_v62 }
 0x28c   : >> { %v2010_v12 = vsel %vm5615_vm2, 0, %v1958_v45  ;;  %v1962_v51 = vrot.slane %v1960_v42, 7  ;;  %v4512_v11 = vrot.slane %v4498_v3, 9  ;;  %v2160_v47 = vrot.slane %v4499_v52, 5  ;;  %v4898_v8 = vpop.f32.mrf.mxu0 }
 0x28d   : >> { %v2018_v27 = vsel %vm5745_vm14, %v2010_v12, 0  ;;  %v4765_v28 = vpack.c.bf16 %v1876_v13, %v1876_v13  ;;  %v2061_v25 = vshrl.u32 %v4498_v3, 16  ;;  %v4899_v38 = vadd.f32 %v4898_v8, %v4897_v61 }
 0x28e   : >> { %v6116_v29 = vcombine.low %v2018_v27, %v2018_v27  ;;  %v6118_v30 = vcombine.high %v2018_v27, %v2018_v27  ;;  %v4534_v58 = vcombine.low %v6103_v50, %v2018_v27  ;;  %v1859_v55 = vadd.f32 %v1858_v16, %v1794_v0 }
 0x28f   : >> { %v1967_v14 = vshrl.u32 %v4765_v28, 16  ;;  %v6123_v63 = vsel %vm5808_vm0, %v4512_v11, %v2160_v47  ;;  %v1970_v36 = vshll.u32 %v4765_v28, 16  ;;  %v1797_v24 = vadd.f32 %v4899_v38, %v6087_v1 }
 0x290   : >> { %2255 = vrot.lane.b32.xlu1 %v4534_v58, %s5378_s29  ;;  %v4530_v2 = vcombine.low %v5855_v56, %v6123_v63  ;;  %v1965_v57 = vor.u32 %v1963_v26, %v1962_v51  ;;  %v1877_v7 = vmax.f32 %v1859_v55, 0.0  ;;  %v2063_v19 = vrot.slane %v2061_v25, 4 }
 0x291   : >> { %v2064_v60 = vshll.u32 %v4498_v3, 16  ;;  %v2070_v54 = vshll.u32 %v4499_v52, 16  ;;  %v1862_v22 = vadd.f32 %v1861_v17, %v1797_v24  ;;  %v4513_v23 = vrot.slane %v6116_v29, 9  ;;  %v5252_v3 = vld [vmem:[%s6073_s21 + $0x48] sm:$0xff]  }
 0x292   : >> { %v2011_v16 = vsel %vm5615_vm2, 0, %v1965_v57  ;;  %v2164_v45 = vrot.slane %v6118_v30, 5  ;;  %v1969_v42 = vrot.slane %v1967_v14, 7  ;;  %v4766_v26 = vpack.c.bf16 %v1877_v7, %v1877_v7  ;;  %v4900_v13 = vpop.f32.mrf.mxu0  ;;  %v5253_v52 = vld [vmem:[%s6073_s21 + $0x8] sm:$0xff]   ;;  %4924 = vmatprep.subr.bf16.mxu1 %v5252_v3 }
 0x293   : >> { %v6137_v35 = vsel %vm5745_vm14, %v2011_v16, 0  ;;  %v2066_v61 = vrot.slane %v2064_v60, 5  ;;  %v1878_v12 = vmax.f32 %v1862_v22, 0.0  ;;  %v2072_v25 = vrot.slane %v2070_v54, 5  ;;  %4925 = vmatpush3.bf16.msra.mxu1 %v5253_v52  ;;  %v5254_v54 = vld [vmem:[%s6073_s21 + $0x40] sm:$0xff]  }
 0x294   : >> { %2243 = vrot.lane.b32.xlu1 %v4530_v2, %s5377_s28  ;;  %v6144_v51 = vcombine.low %v6137_v35, %v6137_v35  ;;  %v6148_v11 = vcombine.high %v6137_v35, %v6137_v35  ;;  %v6151_v47 = vcombine.low %v2018_v27, %v6137_v35  ;;  %v1974_v28 = vshrl.u32 %v4766_v26, 16  ;;  %v4901_v0 = vpop.f32.mrf.mxu0  ;;  %v5255_v22 = vld [vmem:[%s6073_s21] sm:$0xff]   ;;  %4926 = vmatprep.subr.bf16.mxu1 %v5254_v54 }
 0x295   : >> { %v2067_v8 = vor.u32 %v2066_v61, %v2063_v19  ;;  %v2165_v38 = vsel %vm5808_vm0, %v4513_v23, %v2164_v45  ;;  %v6155_v58 = vpack.c.bf16 %v1878_v12, %v1878_v12  ;;  %v4902_v14 = vadd.f32 %v4901_v0, %v4900_v13 }
 0x296   : >> { %2282 = vrot.lane.b32.xlu0 %v6151_v47, %s5377_s28  ;;  %v4514_v55 = vrot.slane %v6144_v51, 9  ;;  %v2168_v27 = vrot.slane %v6148_v11, 5  ;;  %v1976_v24 = vrot.slane %v1974_v28, 7  ;;  %v1977_v2 = vshll.u32 %v4766_v26, 16  ;;  %v4903_v57 = vpop.f32.mrf.mxu0 }
 0x297   : >> { %v2068_v5 = vrot.slane %v2067_v8, 4  ;;  %v1972_v62 = vor.u32 %v1970_v36, %v1969_v42  ;;  %v1981_v7 = vshrl.u32 %v6155_v58, 16  ;;  %v1802_v17 = vadd.f32 %v4902_v14, %v6087_v1  ;;  %4927 = vmatpush3.bf16.msra.mxu1 %v5255_v22 }
 0x298   : >> { %v2169_v19 = vsel %vm5808_vm0, %v4514_v55, %v2168_v27  ;;  %v4542_v60 = vcombine.low %v6123_v63, %v2165_v38  ;;  %v4904_v16 = vpop.f32.mrf.mxu0  ;;  %v1979_v42 = vor.u32 %v1977_v2, %v1976_v24  ;;  %v1984_v26 = vshll.u32 %v6155_v58, 16 }
 0x299   : >> { %v6170_v23 = vsel %vm5908_vm4, %v2068_v5, %v2072_v25  ;;  %v4531_v45 = vcombine.low %v2165_v38, %v2169_v19  ;;  %v2012_v36 = vsel %vm5615_vm2, 0, %v1972_v62  ;;  %v1867_v13 = vadd.f32 %v6094_v41, %v1802_v17 }
 0x29a   : >> { %v4905_v61 = vadd.f32 %v4904_v16, %v4903_v57  ;;  %v4526_v63 = vcombine.low %v5924_v4, %v6170_v23  ;;  %2273 = vrot.lane.b32.xlu0 %v4542_v60, %s5379_s16  ;;  %v2020_v3 = vsel %vm5745_vm14, %v2012_v36, 0  ;;  %v2013_v52 = vsel %vm5615_vm2, 0, %v1979_v42 }
 0x29b   : >> { %5066 = vmatprep.mubr.msk.bf16.mxu0 %vm1550_vm5, %v4531_v45  ;;  %v2075_v12 = vshrl.u32 %v6116_v29, 16  ;;  %v2078_v28 = vshll.u32 %v6116_v29, 16  ;;  %v1879_v41 = vmax.f32 %v1867_v13, 0.0  ;;  %v4504_v8 = vcombine.low %v2020_v3, %v2020_v3 }
 0x29c   : >> { %v1805_v0 = vadd.f32 %v4905_v61, %v6087_v1  ;;  %2224 = vrot.lane.b32.xlu1 %v4526_v63, %s5379_s16  ;;  %v4535_v25 = vcombine.low %v6137_v35, %v2020_v3  ;;  %v6191_v38 = vsel %vm5745_vm14, %v2013_v52, 0  ;;  %v6193_v58 = vcombine.high %v2020_v3, %v2020_v3 }
 0x29d   : >> { %v2077_v14 = vrot.slane %v2075_v12, 4  ;;  %v2080_v55 = vrot.slane %v2078_v28, 5  ;;  %v4768_v27 = vpack.c.bf16 %v1879_v41, %v1879_v41  ;;  %v6198_v24 = vcombine.low %v6191_v38, %v6191_v38 }
 0x29e   : >> { %v1870_v29 = vadd.f32 %v6114_v53, %v1805_v0  ;;  %v6202_v1 = vcombine.high %v6191_v38, %v6191_v38  ;;  %v6205_v35 = vcombine.low %v2020_v3, %v6191_v38  ;;  %v4515_v2 = vrot.slane %v4504_v8, 9 }
 0x29f   : >> { %v2172_v57 = vrot.slane %v6193_v58, 5  ;;  %v2081_v5 = vor.u32 %v2080_v55, %v2077_v14  ;;  %v1983_v62 = vrot.slane %v1981_v7, 7  ;;  %v1988_v17 = vshrl.u32 %v4768_v27, 16 }
 0x2a0   : >> { %v1880_v60 = vmax.f32 %v1870_v29, 0.0  ;;  %2257 = vrot.lane.b32.xlu1 %v4535_v25, %s5378_s29  ;;  %v4516_v53 = vrot.slane %v6198_v24, 9  ;;  %2284 = vrot.lane.b32.xlu0 %v6205_v35, %s5377_s28  ;;  %v2176_v22 = vrot.slane %v6202_v1, 5  ;;  %v2084_v36 = vshll.u32 %v6118_v30, 16 }
 0x2a1   : >> { %v2173_v54 = vsel %vm5808_vm0, %v4515_v2, %v2172_v57  ;;  %v2082_v16 = vrot.slane %v2081_v5, 4  ;;  %v1990_v42 = vrot.slane %v1988_v17, 7  ;;  %v1991_v13 = vshll.u32 %v4768_v27, 16 }
 0x2a2   : >> { %v4769_v7 = vpack.c.bf16 %v1880_v60, %v1880_v60  ;;  %v2089_v61 = vshrl.u32 %v6144_v51, 16  ;;  %v6219_v63 = vsel %vm5808_vm0, %v4516_v53, %v2176_v22  ;;  %v4543_v3 = vcombine.low %v2169_v19, %v2173_v54 }
 0x2a3   : >> { %v2086_v52 = vrot.slane %v2084_v36, 5  ;;  %v2092_v12 = vshll.u32 %v6144_v51, 16  ;;  %v6224_v41 = vcombine.low %v2173_v54, %v6219_v63  ;;  %v2098_v0 = vshll.u32 %v6148_v11, 16 }
 0x2a4   : >> { %v1995_v28 = vshrl.u32 %v4769_v7, 16  ;;  %2245 = vrot.lane.b32.xlu1 %v4531_v45, %s5377_s28  ;;  %v2091_v30 = vrot.slane %v2089_v61, 4  ;;  %v1998_v25 = vshll.u32 %v4769_v7, 16  ;;  %2275 = vrot.lane.b32.xlu0 %v4543_v3, %s5379_s16  ;;  %v1986_v55 = vor.u32 %v1984_v26, %v1983_v62 }
 0x2a5   : >> { %v6230_v14 = vsel %vm5908_vm4, %v2082_v16, %v2086_v52  ;;  %v2094_v19 = vrot.slane %v2092_v12, 5  ;;  %5067 = vmatmul.mubr.msk.bf16.vlgmr.msra.gmra.mxu0 %vm1550_vm5, %v6224_v41  ;;  %v1993_v45 = vor.u32 %v1991_v13, %v1990_v42  ;;  %v2103_v29 = vshrl.u32 %v4504_v8, 16 }
 0x2a6   : >> { %v1997_v27 = vrot.slane %v1995_v28, 7  ;;  %v4538_v51 = vcombine.low %v6170_v23, %v6230_v14  ;;  %v2014_v11 = vsel %vm5615_vm2, 0, %v1986_v55  ;;  %v2106_v57 = vshll.u32 %v4504_v8, 16 }
 0x2a7   : >> { %v2095_v2 = vor.u32 %v2094_v19, %v2091_v30  ;;  %v2112_v5 = vshll.u32 %v6193_v58, 16  ;;  %v2100_v60 = vrot.slane %v2098_v0, 5  ;;  %v2022_v26 = vsel %vm5745_vm14, %v2014_v11, 0 }
 0x2a8   : >> { %v2000_v17 = vor.u32 %v1998_v25, %v1997_v27  ;;  %v2015_v62 = vsel %vm5615_vm2, 0, %v1993_v45  ;;  %v4508_v54 = vcombine.low %v2022_v26, %v2022_v26  ;;  %v4509_v22 = vcombine.high %v2022_v26, %v2022_v26 }
 0x2a9   : >> { %v2096_v53 = vrot.slane %v2095_v2, 4  ;;  %v2105_v16 = vrot.slane %v2103_v29, 4  ;;  %v4536_v42 = vcombine.low %v6191_v38, %v2022_v26  ;;  %v6248_v8 = vsel %vm5745_vm14, %v2015_v62, 0 }
 0x2aa   : >> { %v2016_v36 = vsel %vm5615_vm2, 0, %v2000_v17  ;;  %v2108_v58 = vrot.slane %v2106_v57, 5  ;;  %v4510_v61 = vcombine.low %v6248_v8, %v6248_v8  ;;  %v2114_v3 = vrot.slane %v2112_v5, 5 }
 0x2ab   : >> { %v6252_v13 = vsel %vm5745_vm14, %v2016_v36, 0  ;;  %v6256_v7 = vsel %vm5908_vm4, %v2096_v53, %v2100_v60  ;;  %v4511_v12 = vcombine.high %v6248_v8, %v6248_v8  ;;  %v4517_v28 = vrot.slane %v4508_v54, 9 }
 0x2ac   : >> { %v4519_v38 = vcombine.low %v6252_v13, %v6252_v13  ;;  %v4527_v52 = vcombine.low %v6230_v14, %v6256_v7  ;;  %v2180_v30 = vrot.slane %v4509_v22, 5  ;;  %v4518_v0 = vrot.slane %v4510_v61, 9 }
 0x2ad   : >> { %v4520_v25 = vcombine.high %v6252_v13, %v6252_v13  ;;  %v2109_v19 = vor.u32 %v2108_v58, %v2105_v16  ;;  %v2184_v55 = vrot.slane %v4511_v12, 5  ;;  %v2117_v45 = vshrl.u32 %v6198_v24, 16 }
 0x2ae   : >> { %2226 = vrot.lane.b32.xlu1 %v4527_v52, %s5379_s16  ;;  %2291 = vrot.lane.b32.xlu0 %v4527_v52, %s5378_s29  ;;  %v4521_v27 = vrot.slane %v4519_v38, 9  ;;  %v2120_v29 = vshll.u32 %v6198_v24, 16  ;;  %v6273_v2 = vcombine.low %v2022_v26, %v6248_v8  ;;  %v2126_v5 = vshll.u32 %v6202_v1, 16 }
 0x2af   : >> { %v2207_v11 = vrot.slane %v4520_v25, 5  ;;  %v2110_v57 = vrot.slane %v2109_v19, 4  ;;  %v2181_v17 = vsel %vm5808_vm0, %v4517_v28, %v2180_v30  ;;  %v2185_v60 = vsel %vm5808_vm0, %v4518_v0, %v2184_v55 }
 0x2b0   : >> { %v2119_v62 = vrot.slane %v2117_v45, 4  ;;  %v2122_v53 = vrot.slane %v2120_v29, 5  ;;  %v4533_v16 = vcombine.low %v2181_v17, %v2185_v60  ;;  %v2131_v52 = vshrl.u32 %v4508_v54, 16 }
 0x2b1   : >> { %v2208_v36 = vsel %vm5808_vm0, %v4521_v27, %v2207_v11  ;;  %v6284_v24 = vsel %vm5908_vm4, %v2110_v57, %v2114_v3  ;;  %v4544_v28 = vcombine.low %v6219_v63, %v2181_v17  ;;  %v2128_v30 = vrot.slane %v2126_v5, 5 }
 0x2b2   : >> { %2259 = vrot.lane.b32.xlu1 %v4536_v42, %s5378_s29  ;;  %2286 = vrot.lane.b32.xlu0 %v6273_v2, %s5377_s28  ;;  %v4548_v1 = vcombine.low %v2208_v36, %v5855_v56  ;;  %v2123_v26 = vor.u32 %v2122_v53, %v2119_v62  ;;  %v4539_v58 = vcombine.low %v6256_v7, %v6284_v24  ;;  %v2134_v0 = vshll.u32 %v4508_v54, 16 }
 0x2b3   : >> { %5070 = vmatprep.mubr.msk.bf16.mxu0 %vm1550_vm5, %v4533_v16  ;;  %v2145_v3 = vshrl.u32 %v4510_v61, 16  ;;  %v2133_v19 = vrot.slane %v2131_v52, 4  ;;  %v2140_v55 = vshll.u32 %v4509_v22, 16  ;;  %v2148_v27 = vshll.u32 %v4510_v61, 16 }
 0x2b4   : >> { %5071 = vmatmul.mubr.msk.bf16.gmra.mxu0 %vm1550_vm5, %v4548_v1  ;;  %v2124_v42 = vrot.slane %v2123_v26, 4  ;;  %v2136_v45 = vrot.slane %v2134_v0, 5  ;;  %v2154_v57 = vshll.u32 %v4511_v12, 16  ;;  %v2192_v5 = vshrl.u32 %v4519_v38, 16 }
 0x2b5   : >> { %v2147_v29 = vrot.slane %v2145_v3, 4  ;;  %v2150_v63 = vrot.slane %v2148_v27, 5  ;;  %v2195_v17 = vshll.u32 %v4519_v38, 16  ;;  %v2142_v61 = vrot.slane %v2140_v55, 5 }
 0x2b6   : >> { %2247 = vrot.lane.b32.xlu1 %v6224_v41, %s5377_s28  ;;  %2277 = vrot.lane.b32.xlu0 %v4544_v28, %s5379_s16  ;;  %v6300_v11 = vsel %vm5908_vm4, %v2124_v42, %v2128_v30  ;;  %v2137_v54 = vor.u32 %v2136_v45, %v2133_v19  ;;  %v2194_v1 = vrot.slane %v2192_v5, 4  ;;  %v2201_v41 = vshll.u32 %v4520_v25, 16 }
 0x2b7   : >> { %v4528_v22 = vcombine.low %v6284_v24, %v6300_v11  ;;  %v2151_v62 = vor.u32 %v2150_v63, %v2147_v29  ;;  %v2197_v26 = vrot.slane %v2195_v17, 5  ;;  %v2156_v12 = vrot.slane %v2154_v57, 5 }
 0x2b8   : >> { %v2138_v53 = vrot.slane %v2137_v54, 4  ;;  %v4545_v38 = vcombine.low %v2185_v60, %v2208_v36  ;;  %v2203_v19 = vrot.slane %v2201_v41, 5  ;;  %v4537_v60 = vcombine.low %v6248_v8, %v6252_v13 }
 0x2b9   : >> { %v2152_v52 = vrot.slane %v2151_v62, 4  ;;  %v2198_v30 = vor.u32 %v2197_v26, %v2194_v1  ;;  %v4546_v36 = vcombine.low %v6252_v13, %v5755_v44  ;;  %v4522_v8 = vcombine.low %v5755_v44, %v6103_v50 }
 0x2ba   : >> { %2228 = vrot.lane.b32.xlu1 %v4528_v22, %s5379_s16  ;;  %2293 = vrot.lane.b32.xlu0 %v4528_v22, %s5378_s29  ;;  %v2143_v28 = vsel %vm5908_vm4, %v2138_v53, %v2142_v61 }
 0x2bb   : >> { %v4540_v0 = vcombine.low %v6300_v11, %v2143_v28  ;;  %v6311_v3 = vsel %vm5908_vm4, %v2152_v52, %v2156_v12  ;;  %v2199_v42 = vrot.slane %v2198_v30, 4 }
 0x2bc   : >> { %v4529_v55 = vcombine.low %v2143_v28, %v6311_v3 }
 0x2bd   : >> { %v2204_v25 = vsel %vm5908_vm4, %v2199_v42, %v2203_v19 }
 0x2be   : >> { %2279 = vrot.lane.b32.xlu0 %v4545_v38, %s5379_s16  ;;  %2249 = vrot.lane.b32.xlu1 %v4533_v16, %s5377_s28  ;;  %v4541_v27 = vcombine.low %v6311_v3, %v2204_v25  ;;  %v4547_v16 = vcombine.low %v2204_v25, %v5924_v4 }
 0x2c2   : >> { %2230 = vrot.lane.b32.xlu1 %v4529_v55, %s5379_s16  ;;  %2295 = vrot.lane.b32.xlu0 %v4529_v55, %s5378_s29 }
 0x2c6   : >> { %2261 = vrot.lane.b32.xlu1 %v4537_v60, %s5378_s29  ;;  %2288 = vrot.lane.b32.xlu0 %v4546_v36, %s5377_s28  ;;  %s4572_s28 = sshll.u32 %s5374_s23, 3 }
 0x2c7   : >> { %s2644_s17 = scalar_lea.vmem %s7091_s7, %s4572_s28  ;;  %s2650_s19 = scalar_lea.vmem %s7092_s8, %s4572_s28 }
 0x2c8   : >> { %s2654_s25 = scalar_lea.vmem %s7093_s9, %s4572_s28 }
 0x2ca   : >> { %2297 = vrot.lane.b32.xlu0 %v4547_v16, %s5378_s29  ;;  %s2669_s29 = scalar_lea.vmem %s7094_s10, %s5374_s23  ;;  %s1086_s23 = sadd.s32 1, %s5374_s23  }
 0x2cb   : >> { %p1083_p4 = scmp.ge.s32.totalorder %s1086_s23, 2  }
 0x2cc   : > { %s5381_s16 = smov (%p1083_p4), 64   ;;  %s5382_s24 = smov (%p1083_p4), 96  }
 0x2cd   : > { %s5383_s28 = smov (%p1083_p4), 32  }
 0x302   : >> { %v2256_v45 = vpop.permute.xlu1 %2255 }
 0x306   : >> { %v2244_v29 = vpop.permute.xlu1 %2243 }
 0x308   : >> { %v2283_v11 = vpop.permute.xlu0 %2282 }
 0x30c   : >> { %v2274_v54 = vpop.permute.xlu0 %2273 }
 0x30d   : >> { %v2334_v61 = vsel %vm1550_vm5, %v4538_v51, %v2274_v54 }
 0x30e   : >> { %v2225_v63 = vpop.permute.xlu1 %2224  ;;  %v2345_v26 = vsel %vm1563_vm6, %v2334_v61, %v2283_v11 }
 0x30f   : >> { %v2302_v22 = vsel %vm1550_vm5, %v4522_v8, %v2225_v63 }
 0x310   : >> { %v2313_v62 = vsel %vm1563_vm6, %v2302_v22, %v2244_v29 }
 0x311   : >> { %v2321_v50 = vsel %vm1572_vm7, %v2313_v62, %v2256_v45 }
 0x312   : >> { %v2258_v57 = vpop.permute.xlu1 %2257  ;;  %v2285_v5 = vpop.permute.xlu0 %2284 }
 0x316   : >> { %v2246_v17 = vpop.permute.xlu1 %2245  ;;  %v2276_v13 = vpop.permute.xlu0 %2275 }
 0x317   : >> { %v2337_v51 = vsel %vm1550_vm5, %v4539_v58, %v2276_v13 }
 0x318   : >> { %v2347_v42 = vsel %vm1563_vm6, %v2337_v51, %v2285_v5 }
 0x320   : >> { %v2227_v53 = vpop.permute.xlu1 %2226  ;;  %v2292_v1 = vpop.permute.xlu0 %2291 }
 0x321   : >> { %v2353_v41 = vsel %vm1572_vm7, %v2345_v26, %v2292_v1  ;;  %v2305_v12 = vsel %vm1550_vm5, %v6151_v47, %v2227_v53 }
 0x322   : >> { %2522 = vmatprep.mubr.bf16.mxu1 %v2353_v41  ;;  %v2315_v30 = vsel %vm1563_vm6, %v2305_v12, %v2246_v17 }
 0x323   : >> { %2523 = vmatmul.mubr.bf16.vlgmr.msra.gmra.mxu1 %v2321_v50  ;;  %v2324_v25 = vsel %vm1572_vm7, %v2315_v30, %v2258_v57 }
 0x324   : >> { %v2260_v52 = vpop.permute.xlu1 %2259  ;;  %v2287_v28 = vpop.permute.xlu0 %2286 }
 0x328   : >> { %v2248_v23 = vpop.permute.xlu1 %2247  ;;  %v2278_v14 = vpop.permute.xlu0 %2277 }
 0x329   : >> { %v2340_v7 = vsel %vm1550_vm5, %v4540_v0, %v2278_v14  ;;  %v4549_v14 = vld [vmem:[%s1919_s27] ss:$0 sm:$0xff] }
 0x32a   : >> { %v2349_v36 = vsel %vm1563_vm6, %v2340_v7, %v2287_v28 }
 0x32c   : >> { %v2229_v38 = vpop.permute.xlu1 %2228  ;;  %v2294_v3 = vpop.permute.xlu0 %2293 }
 0x32d   : >> { %v2356_v19 = vsel %vm1572_vm7, %v2347_v42, %v2294_v3  ;;  %v2308_v47 = vsel %vm1550_vm5, %v6205_v35, %v2229_v38 }
 0x32e   : >> { %2530 = vmatprep.mubr.bf16.mxu1 %v2356_v19  ;;  %v2317_v24 = vsel %vm1563_vm6, %v2308_v47, %v2248_v23 }
 0x32f   : >> { %2531 = vmatmul.mubr.bf16.gmra.mxu1 %v2324_v25  ;;  %v2327_v29 = vsel %vm1572_vm7, %v2317_v24, %v2260_v52 }
 0x330   : >> { %v2280_v55 = vpop.permute.xlu0 %2279  ;;  %v2250_v60 = vpop.permute.xlu1 %2249 }
 0x331   : >> { %v2343_v63 = vsel %vm1550_vm5, %v4541_v27, %v2280_v55 }
 0x334   : >> { %v2296_v58 = vpop.permute.xlu0 %2295  ;;  %v2231_v16 = vpop.permute.xlu1 %2230 }
 0x335   : >> { %v2359_v45 = vsel %vm1572_vm7, %v2349_v36, %v2296_v58  ;;  %v2311_v35 = vsel %vm1550_vm5, %v6273_v2, %v2231_v16 }
 0x336   : >> { %2538 = vmatprep.mubr.bf16.mxu1 %v2359_v45  ;;  %v2319_v8 = vsel %vm1563_vm6, %v2311_v35, %v2250_v60 }
 0x337   : >> { %2539 = vmatmul.mubr.bf16.gmra.mxu1 %v2327_v29 }
 0x338   : >> { %v2289_v11 = vpop.permute.xlu0 %2288  ;;  %v2262_v54 = vpop.permute.xlu1 %2261 }
 0x339   : >> { %v2351_v0 = vsel %vm1563_vm6, %v2343_v63, %v2289_v11  ;;  %v2330_v17 = vsel %vm1572_vm7, %v2319_v8, %v2262_v54 }
 0x33c   : >> { %v2298_v57 = vpop.permute.xlu0 %2297 }
 0x33d   : >> { %v2362_v5 = vsel %vm1572_vm7, %v2351_v0, %v2298_v57 }
 0x33e   : >> { %2546 = vmatprep.mubr.bf16.mxu1 %v2362_v5 }
 0x33f   : >> { %2547 = vmatmul.mubr.bf16.gmra.mxu1 %v2330_v17 }
 0x365   : >> { %v5068_v61 = vpop.f32.mrf.mxu0 }
 0x367   : >> { %v2589_v2 = vpop.f32.mrf.mxu0 }
 0x369   : >> { %v5069_v27 = vpop.f32.mrf.mxu0 }
 0x36b   : >> { %v2592_v50 = vpop.f32.mrf.mxu0 }
 0x374   : >> { %v5072_v23 = vpop.f32.mrf.mxu0 }
 0x376   : >> { %v2605_v25 = vpop.f32.mrf.mxu0 }
 0x378   : >> { %v5073_v45 = vpop.f32.mrf.mxu0 }
 0x37a   : >> { %v2608_v17 = vpop.f32.mrf.mxu0 }
 0x3e3   : >> { %v4928_v13 = vpop.f32.mrf.mxu1 }
 0x3e5   : >> { %v4929_v22 = vpop.f32.mrf.mxu1 }
 0x3e6   : >> { %v4930_v28 = vadd.f32 %v4929_v22, %v4928_v13 }
 0x3e7   : >> { %v4931_v62 = vpop.f32.mrf.mxu1 }
 0x3e8   : >> { %v2525_v42 = vadd.f32 %v4930_v28, %v4549_v14 }
 0x3e9   : >> { %v4932_v53 = vpop.f32.mrf.mxu1 }
 0x3ea   : >> { %v4933_v41 = vadd.f32 %v4932_v53, %v4931_v62  ;;  %v6370_v58 = vadd.f32 %v2589_v2, %v2525_v42 }
 0x3ec   : >> { %v2528_v30 = vadd.f32 %v4933_v41, %v4549_v14  ;;  %v2620_v0 = vsel %vm1550_vm5, %v6370_v58, 0.0 }
 0x3ee   : >> { %v6368_v55 = vadd.f32 %v2592_v50, %v2528_v30 }
 0x3ef   : >> { %v4934_v1 = vpop.f32.mrf.mxu1 }
 0x3f0   : >> { %v2621_v11 = vsel %vm1550_vm5, %v6368_v55, 0.0 }
 0x3f1   : >> { %v4935_v26 = vpop.f32.mrf.mxu1  ;;  %v2622_v13 = vadd.f32 %v2621_v11, %v2620_v0  ;;  %v2645_v11 = vld [vmem:[%s2644_s17] sm:$0xff] }
 0x3f2   : >> { %v4936_v12 = vadd.f32 %v4935_v26, %v4934_v1  ;;  %v2651_v0 = vld [vmem:[%s2650_s19] sm:$0xff] }
 0x3f3   : >> { %v4937_v52 = vpop.f32.mrf.mxu1 }
 0x3f4   : >> { %v2533_v19 = vadd.f32 %v4936_v12, %v4549_v14 }
 0x3f5   : >> { %v4938_v51 = vpop.f32.mrf.mxu1 }
 0x3f6   : >> { %v4939_v38 = vadd.f32 %v4938_v51, %v4937_v52  ;;  %v6372_v36 = vadd.f32 %v5068_v61, %v2533_v19 }
 0x3f7   : >> { %v4940_v3 = vpop.f32.mrf.mxu1 }
 0x3f8   : >> { %v2536_v60 = vadd.f32 %v4939_v38, %v4549_v14  ;;  %v2623_v57 = vsel %vm1550_vm5, %v6372_v36, 0.0 }
 0x3f9   : >> { %v4941_v47 = vpop.f32.mrf.mxu1  ;;  %v2624_v53 = vadd.f32 %v2623_v57, %v2622_v13  ;;  %v2655_v13 = vld [vmem:[%s2654_s25] sm:$0xff] }
 0x3fa   : >> { %v4942_v7 = vadd.f32 %v4941_v47, %v4940_v3  ;;  %v6376_v35 = vadd.f32 %v5069_v27, %v2536_v60 }
 0x3fb   : >> { %v4943_v24 = vpop.f32.mrf.mxu1 }
 0x3fc   : >> { %v2541_v16 = vadd.f32 %v4942_v7, %v4549_v14  ;;  %v2625_v61 = vsel %vm1550_vm5, %v6376_v35, 0.0 }
 0x3fd   : >> { %v4944_v29 = vpop.f32.mrf.mxu1  ;;  %v2626_v41 = vadd.f32 %v2625_v61, %v2624_v53 }
 0x3fe   : >> { %v4945_v63 = vadd.f32 %v4944_v29, %v4943_v24  ;;  %v6382_v5 = vadd.f32 %v2605_v25, %v2541_v16 }
 0x3ff   : >> { %v4946_v54 = vpop.f32.mrf.mxu1 }
 0x400   : >> { %v2544_v8 = vadd.f32 %v4945_v63, %v4549_v14  ;;  %v2627_v1 = vsel %vm1550_vm5, %v6382_v5, 0.0 }
 0x401   : >> { %v4947_v22 = vpop.f32.mrf.mxu1  ;;  %v2628_v51 = vadd.f32 %v2627_v1, %v2626_v41 }
 0x402   : >> { %v6386_v62 = vadd.f32 %v2608_v17, %v2544_v8  ;;  %v4948_v2 = vadd.f32 %v4947_v22, %v4946_v54  ;;  %v5380_v54 = vmov 0  }
 0x403   : >> { %v4949_v27 = vpop.f32.mrf.mxu1  ;;  %5218 = vset.pattern.permute.xlu1 %v5380_v54  ;;  %5219 = vset.pattern.permute.xlu0 %v5380_v54 }
 0x404   : >> { %v2549_v26 = vadd.f32 %v4948_v2, %v4549_v14  ;;  %v2629_v52 = vsel %vm1550_vm5, %v6386_v62, 0.0 }
 0x405   : >> { %v4950_v50 = vpop.f32.mrf.mxu1  ;;  %v2630_v3 = vadd.f32 %v2629_v52, %v2628_v51 }
 0x406   : >> { %v2614_v28 = vadd.f32 %v5072_v23, %v2549_v26  ;;  %v4951_v12 = vadd.f32 %v4950_v50, %v4949_v27  ;;  %v2670_v50 = vld [vmem:[%s2669_s29] sm:$0x1] }
 0x408   : >> { %v2631_v30 = vsel %vm1550_vm5, %v2614_v28, 0.0  ;;  %v2552_v38 = vadd.f32 %v4951_v12, %v4549_v14 }
 0x409   : >> { %v2632_v19 = vadd.f32 %v2631_v30, %v2630_v3  ;;  %v2678_v3 = vlaneseq }
 0x40a   : >> { %v2617_v42 = vadd.f32 %v5073_v45, %v2552_v38 }
 0x40c   : >> { %v2633_v25 = vsel %vm1550_vm5, %v2617_v42, 0.0 }
 0x40d   : >> { %v2634_v47 = vadd.f32 %v2633_v25, %v2632_v19  ;;  %v2679_v19 = vshrl.u32 %v2678_v3, 7 }
 0x40f   : >> { %v2635_v60 = vrot.slane %v2634_v47, 4  ;;  %v2680_v25 = vsub.s32 0, %v2679_v19 }
 0x411   : >> { %v2636_v7 = vadd.f32 %v2635_v60, %v2634_v47 }
 0x413   : >> { %v2637_v24 = vrot.slane %v2636_v7, 2 }
 0x415   : >> { %v2638_v16 = vadd.f32 %v2637_v24, %v2636_v7 }
 0x417   : >> { %v2639_v29 = vrot.slane %v2638_v16, 1 }
 0x419   : >> { %v2640_v23 = vadd.f32 %v2639_v29, %v2638_v16 }
 0x41b   : >> { %v2642_v63 = vmul.f32 0.015625, %v2640_v23 }
 0x41d   : >> { %v2646_v14 = vmul.f32 %v2645_v11, %v2642_v63 }
 0x41f   : >> { %v2647_v45 = vsel %vm1550_vm5, %v2646_v14, 0.0 }
 0x420   : >> { %2648 = vadd.xlane.f32.xlu0 %v2647_v45 }
 0x4a9   : >> { %v2649_v57 = vpop.xlane.xlu0 %2648 }
 0x4aa   : >> { %v2652_v8 = vadd.f32 %v2651_v0, %v2649_v57 }
 0x4ac   : >> { %v2653_v17 = vmax.f32 %v2652_v8, 0.0 }
 0x4ae   : >> { %2658 = vperm.xlu1 %5218, %v2653_v17  }
 0x529   : >> { %v2659_v22 = vpop.permute.xlu1 %2658 }
 0x52a   : >> { %v2661_v61 = vmul.f32 %v2659_v22, %v2655_v13  ;;  %v5260_v22 = vld [vmem:[%s7095_s11 + $0x78] sm:$0xff] (%p1083_p4)  }
 0x52b   : > { %4958 = vmatprep.subr.bf16.mxu0 (%p1083_p4), %v5260_v22 }
 0x52c   : >> { %v2662_v2 = vsel %vm1550_vm5, %v2661_v61, 0.0 }
 0x52d   : >> { %v2663_v53 = vrot.slane %v2662_v2, 4 }
 0x52f   : >> { %v2664_v27 = vadd.f32 %v2663_v53, %v2662_v2 }
 0x531   : >> { %v2665_v1 = vrot.slane %v2664_v27, 2 }
 0x533   : >> { %v2666_v26 = vadd.f32 %v2665_v1, %v2664_v27 }
 0x535   : >> { %v2667_v41 = vrot.slane %v2666_v26, 1 }
 0x537   : >> { %v2668_v52 = vadd.f32 %v2667_v41, %v2666_v26 }
 0x539   : >> { %v2671_v12 = vadd.f32 %v2670_v50, %v2668_v52 }
 0x53b   : >> { %v4573_v51 = vmul.f32 -1.442695, %v2671_v12 }
 0x53d   : >> { %5256 = vpow2.f32 %v4573_v51 }
 0x54a   : >> { %v5257_v30 = vpop.eup %5256 }
 0x54b   : >> { %v2675_v38 = vadd.f32 1.0, %v5257_v30 }
 0x54d   : >> { %5258 = vrcp.f32 %v2675_v38 }
 0x55a   : >> { %v5259_v47 = vpop.eup %5258 }
 0x55b   : >> { %v2681_v60 = vrot.slane %v5259_v47, %v2680_v25  ;;  %v5263_v25 = vld [vmem:[%s7095_s11 + $0x30] sm:$0xff] (%p1083_p4)   ;;  %v5264_v47 = vld [vmem:[%s7095_s11 + $0x68] sm:$0xff] (%p1083_p4)  }
 0x55d   : >> { %v2682_v7 = vmul.f32 %v2681_v60, %v6370_v58  ;;  %v2683_v24 = vmul.f32 %v2681_v60, %v6368_v55  ;;  %v2684_v16 = vmul.f32 %v2681_v60, %v6372_v36  ;;  %v2685_v29 = vmul.f32 %v2681_v60, %v6376_v35 }
 0x55e   : >> { %v2686_v23 = vmul.f32 %v2681_v60, %v6382_v5  ;;  %v2687_v11 = vmul.f32 %v2681_v60, %v6386_v62  ;;  %v2688_v63 = vmul.f32 %v2681_v60, %v2614_v28  ;;  %v2689_v14 = vmul.f32 %v2681_v60, %v2617_v42  ;;  %1085 = sbr.rel (!%p1083_p4) target bundleno = 277 (0x115), region = 125 }
 0x55f   : >> { %v2690_v45 = vadd.f32 %v5370_v9, %v2682_v7   ;;  %v2691_v54 = vadd.f32 %v5366_v21, %v2683_v24   ;;  %v2692_v0 = vadd.f32 %v5362_v31, %v2684_v16   ;;  %v2693_v58 = vadd.f32 %v5358_v46, %v2685_v29  }
 0x560   : >> { %v2694_v55 = vadd.f32 %v5354_v59, %v2686_v23   ;;  %v2695_v36 = vadd.f32 %v5350_v6, %v2687_v11   ;;  %v2696_v35 = vadd.f32 %v5346_v15, %v2688_v63   ;;  %v2697_v5 = vadd.f32 %v5342_v18, %v2689_v14   ;;  %v5265_v14 = vld [vmem:[%s7095_s11 + $0x28] sm:$0xff] (%p1083_p4)  }
 0x561   : >> { %v7117_v46 = vmov %v2693_v58  ;;  %v7118_v31 = vmov %v2692_v0  ;;  %v7119_v21 = vmov %v2691_v54  ;;  %v7120_v9 = vmov %v2690_v45 }
 0x562   : >> { %v7113_v18 = vmov %v2697_v5  ;;  %v7114_v15 = vmov %v2696_v35  ;;  %v7115_v6 = vmov %v2695_v36  ;;  %v7116_v59 = vmov %v2694_v55  ;;  %v5261_v21 = vld [vmem:[%s7095_s11 + $0x38] sm:$0xff] (%p1083_p4)   ;;  %v5262_v31 = vld [vmem:[%s7095_s11 + $0x70] sm:$0xff] (%p1083_p4)  }
 0x563   : > { %v4771_v9 = vpack.c.bf16 %v2691_v54, %v2691_v54  ;;  %v4772_v62 = vpack.c.bf16 %v2692_v0, %v2692_v0  ;;  %v4773_v28 = vpack.c.bf16 %v2693_v58, %v2693_v58  ;;  %v4774_v42 = vpack.c.bf16 %v2694_v55, %v2694_v55  ;;  %4959 = vmatpush3.bf16.msra.mxu0 %v5261_v21 }
 0x564   : > { %v4770_v57 = vpack.c.bf16 %v2690_v45, %v2690_v45  ;;  %v6443_v8 = vpack.c.bf16 %v2695_v36, %v2695_v36  ;;  %v6445_v17 = vpack.c.bf16 %v2696_v35, %v2696_v35  ;;  %v6447_v13 = vpack.c.bf16 %v2697_v5, %v2697_v5  ;;  %4960 = vmatprep.subr.bf16.mxu0 %v5262_v31 }
 0x565   : > { %v2767_v61 = vshrl.u32 %v4771_v9, 16  ;;  %v2770_v2 = vshll.u32 %v4771_v9, 16  ;;  %v2774_v53 = vshrl.u32 %v4772_v62, 16  ;;  %v2777_v27 = vshll.u32 %v4772_v62, 16  ;;  %v5266_v9 = vld [vmem:[%s7095_s11 + $0x60] sm:$0xff]  }
 0x566   : > { %v2781_v46 = vshrl.u32 %v4773_v28, 16  ;;  %v2784_v59 = vshll.u32 %v4773_v28, 16  ;;  %v2788_v6 = vshrl.u32 %v4774_v42, 16  ;;  %v2791_v15 = vshll.u32 %v4774_v42, 16 }
 0x567   : > { %v2769_v18 = vrot.slane %v2767_v61, 7  ;;  %v2776_v1 = vrot.slane %v2774_v53, 7  ;;  %v2760_v26 = vshrl.u32 %v4770_v57, 16  ;;  %v2763_v41 = vshll.u32 %v4770_v57, 16  ;;  %4961 = vmatpush3.bf16.msra.mxu0 %v5263_v25 }
 0x568   : > { %v2783_v50 = vrot.slane %v2781_v46, 7  ;;  %v2790_v52 = vrot.slane %v2788_v6, 7  ;;  %v2795_v12 = vshrl.u32 %v6443_v8, 16  ;;  %v2798_v51 = vshll.u32 %v6443_v8, 16  ;;  %4962 = vmatprep.subr.bf16.mxu0 %v5264_v47  ;;  %v5268_v6 = vld [vmem:[%s7095_s11 + $0x58] sm:$0xff]  }
 0x569   : > { %v2772_v30 = vor.u32 %v2770_v2, %v2769_v18  ;;  %v2779_v38 = vor.u32 %v2777_v27, %v2776_v1  ;;  %v2762_v3 = vrot.slane %v2760_v26, 7  ;;  %v2802_v19 = vshrl.u32 %v6445_v17, 16  ;;  %v5267_v27 = vld [vmem:[%s7095_s11 + $0x20] sm:$0xff]  }
 0x56a   : > { %v2786_v60 = vor.u32 %v2784_v59, %v2783_v50  ;;  %v2793_v7 = vor.u32 %v2791_v15, %v2790_v52  ;;  %v6467_v24 = vrot.slane %v2795_v12, 7  ;;  %v2805_v16 = vshll.u32 %v6445_v17, 16 }
 0x56b   : > { %v2824_v29 = vsel %vm5615_vm2, 0, %v2772_v30  ;;  %v2825_v23 = vsel %vm5615_vm2, 0, %v2779_v38  ;;  %v2765_v11 = vor.u32 %v2763_v41, %v2762_v3  ;;  %v6474_v63 = vrot.slane %v2802_v19, 7  ;;  %4963 = vmatpush3.bf16.msra.mxu0 %v5265_v14  ;;  %v5269_v30 = vld [vmem:[%s7095_s11 + $0x18] sm:$0xff]  }
 0x56c   : > { %v2836_v45 = vsel %vm5745_vm14, %v2824_v29, 0  ;;  %v2837_v54 = vsel %vm5745_vm14, %v2825_v23, 0  ;;  %v2826_v0 = vsel %vm5615_vm2, 0, %v2786_v60  ;;  %v2827_v58 = vsel %vm5615_vm2, 0, %v2793_v7  ;;  %4964 = vmatprep.subr.bf16.mxu0 %v5266_v9  ;;  %v5270_v23 = vld [vmem:[%s7095_s11 + $0x50] sm:$0xff]  }
 0x56d   : > { %v6487_v55 = vcombine.low %v2837_v54, %v2837_v54  ;;  %v6489_v36 = vcombine.low %v2836_v45, %v2837_v54  ;;  %v4586_v35 = vcombine.low %v2836_v45, %v2836_v45  ;;  %v2838_v5 = vsel %vm5745_vm14, %v2826_v0, 0  ;;  %v5271_v9 = vld [vmem:[%s7095_s11 + $0x10] sm:$0xff]  }
 0x56e   : > { %v6498_v62 = vsel %vm5745_vm14, %v2827_v58, 0  ;;  %v6500_v28 = vcombine.low %v2838_v5, %v2838_v5  ;;  %v2823_v42 = vsel %vm5615_vm2, 0, %v2765_v11  ;;  %v4587_v57 = vcombine.high %v2836_v45, %v2836_v45 }
 0x56f   : > { %3131 = vrot.lane.b32.xlu1 %v6489_v36, %s5381_s16  ;;  %v6508_v22 = vcombine.low %v6498_v62, %v6498_v62  ;;  %v6511_v61 = vcombine.low %v2838_v5, %v6498_v62  ;;  %v6515_v2 = vsel %vm5745_vm14, %v2823_v42, 0  ;;  %v4600_v53 = vrot.slane %v4586_v35, 9  ;;  %4965 = vmatpush3.bf16.msra.mxu0 %v5267_v27 }
 0x570   : > { %v4621_v21 = vcombine.low %v6515_v2, %v2836_v45  ;;  %v4584_v31 = vcombine.low %v6515_v2, %v6515_v2  ;;  %v4585_v46 = vcombine.high %v6515_v2, %v6515_v2  ;;  %v3011_v59 = vrot.slane %v4587_v57, 5  ;;  %4966 = vmatprep.subr.bf16.mxu0 %v5268_v6 }
 0x571   : > { %3133 = vrot.lane.b32.xlu0 %v6511_v61, %s5381_s16  ;;  %v4622_v15 = vcombine.low %v2837_v54, %v2838_v5  ;;  %v4589_v18 = vcombine.high %v2837_v54, %v2837_v54  ;;  %v6530_v1 = vcombine.high %v2838_v5, %v2838_v5  ;;  %v4601_v26 = vrot.slane %v6487_v55, 9 }
 0x572   : > { %v4599_v41 = vrot.slane %v4584_v31, 9  ;;  %v3007_v50 = vrot.slane %v4585_v46, 5  ;;  %v3012_v52 = vsel %vm5808_vm0, %v4600_v53, %v3011_v59  ;;  %v4602_v12 = vrot.slane %v6500_v28, 9 }
 0x573   : > { %3104 = vrot.lane.b32.xlu1 %v4621_v21, %s5382_s24  ;;  %v3015_v38 = vrot.slane %v4589_v18, 5  ;;  %v3019_v3 = vrot.slane %v6530_v1, 5  ;;  %v2901_v19 = vshrl.u32 %v4584_v31, 16  ;;  %v2904_v25 = vshll.u32 %v4584_v31, 16  ;;  %v5274_v31 = vld [vmem:[%s7095_s11 + $0x88] sm:$0xff]   ;;  %4967 = vmatpush3.bf16.msra.mxu0 %v5269_v30 }
 0x574   : > { %v3008_v47 = vsel %vm5808_vm0, %v4599_v41, %v3007_v50  ;;  %v2910_v60 = vshll.u32 %v4585_v46, 16  ;;  %v2915_v7 = vshrl.u32 %v4586_v35, 16  ;;  %v2918_v29 = vshll.u32 %v4586_v35, 16  ;;  %v5272_v41 = vld [vmem:[%s7095_s11 + $0x48] sm:$0xff]   ;;  %4968 = vmatprep.subr.bf16.mxu0 %v5270_v23  ;;  %5074 = vmatprep.subr.bf16.mxu1 %v5274_v31 }
 0x575   : > { %v4629_v11 = vcombine.low %v3008_v47, %v3012_v52  ;;  %v3016_v14 = vsel %vm5808_vm0, %v4601_v26, %v3015_v38  ;;  %v6550_v45 = vsel %vm5808_vm0, %v4602_v12, %v3019_v3  ;;  %v4617_v54 = vcombine.low %v5855_v56, %v3008_v47  ;;  %5075 = vmatpush3.bf16.msra.mxu1 %v5274_v31 }
 0x576   : > { %v4630_v0 = vcombine.low %v3016_v14, %v6550_v45  ;;  %v2903_v58 = vrot.slane %v2901_v19, 4  ;;  %v2906_v5 = vrot.slane %v2904_v25, 5  ;;  %v2912_v35 = vrot.slane %v2910_v60, 5 }
 0x577   : > { %3122 = vrot.lane.b32.xlu0 %v4629_v11, %s5383_s28  ;;  %3106 = vrot.lane.b32.xlu1 %v4622_v15, %s5382_s24  ;;  %v4618_v42 = vcombine.low %v3012_v52, %v3016_v14  ;;  %v2917_v53 = vrot.slane %v2915_v7, 4  ;;  %v2920_v27 = vrot.slane %v2918_v29, 5  ;;  %v2924_v21 = vshll.u32 %v4587_v57, 16  ;;  %v5275_v11 = vld [vmem:[%s7095_s11 + $0x40] sm:$0xff]  }
 0x578   : > { %v2907_v46 = vor.u32 %v2906_v5, %v2903_v58  ;;  %v2929_v59 = vshrl.u32 %v6487_v55, 16  ;;  %v2932_v6 = vshll.u32 %v6487_v55, 16  ;;  %v2938_v26 = vshll.u32 %v4589_v18, 16  ;;  %v5273_v55 = vld [vmem:[%s7095_s11 + $0x8] sm:$0xff]   ;;  %4969 = vmatpush3.bf16.msra.mxu0 %v5271_v9 }
 0x579   : > { %v2921_v15 = vor.u32 %v2920_v27, %v2917_v53  ;;  %v2926_v50 = vrot.slane %v2924_v21, 5  ;;  %v4593_v57 = vcombine.high %v6498_v62, %v6498_v62  ;;  %v2943_v52 = vshrl.u32 %v6500_v28, 16  ;;  %5078 = vmatprep.mubr.msk.bf16.mxu1 %vm1550_vm5, %v4618_v42  ;;  %4970 = vmatprep.subr.bf16.mxu0 %v5272_v41 }
 0x57a   : > { %v2908_v12 = vrot.slane %v2907_v46, 4  ;;  %v2931_v38 = vrot.slane %v2929_v59, 4  ;;  %v2934_v3 = vrot.slane %v2932_v6, 5  ;;  %v2940_v19 = vrot.slane %v2938_v26, 5 }
 0x57b   : > { %3124 = vrot.lane.b32.xlu0 %v4630_v0, %s5383_s28  ;;  %3092 = vrot.lane.b32.xlu1 %v4617_v54, %s5381_s16  ;;  %v2922_v18 = vrot.slane %v2921_v15, 4  ;;  %v2945_v30 = vrot.slane %v2943_v52, 4  ;;  %v2946_v25 = vshll.u32 %v6500_v28, 16  ;;  %v2952_v47 = vshll.u32 %v6530_v1, 16  ;;  %v5277_v28 = vld [vmem:[%s7095_s11 + $0x80] sm:$0xff]  }
 0x57c   : > { %v6580_v60 = vsel %vm5908_vm4, %v2908_v12, %v2912_v35  ;;  %v2935_v7 = vor.u32 %v2934_v3, %v2931_v38  ;;  %v2957_v29 = vshrl.u32 %v6508_v22, 16  ;;  %v2960_v23 = vshll.u32 %v6508_v22, 16  ;;  %5076 = vmatprep.subr.bf16.mxu1 %v5277_v28  ;;  %4971 = vmatpush3.bf16.msra.mxu0 %v5273_v55 }
 0x57d   : > { %v4613_v1 = vcombine.low %v5924_v4, %v6580_v60  ;;  %v6594_v14 = vsel %vm5908_vm4, %v2922_v18, %v2926_v50  ;;  %v2948_v54 = vrot.slane %v2946_v25, 5  ;;  %v2954_v0 = vrot.slane %v2952_v47, 5  ;;  %5077 = vmatpush3.bf16.msra.mxu1 %v5277_v28  ;;  %4972 = vmatprep.subr.bf16.mxu0 %v5275_v11 }
 0x57e   : > { %v2936_v58 = vrot.slane %v2935_v7, 4  ;;  %v2959_v5 = vrot.slane %v2957_v29, 4  ;;  %v2962_v35 = vrot.slane %v2960_v23, 5  ;;  %v2966_v9 = vshll.u32 %v4593_v57, 16 }
 0x57f   : > { %3072 = vrot.lane.b32.xlu0 %v4613_v1, %s5383_s28  ;;  %3094 = vrot.lane.b32.xlu1 %v4618_v42, %s5381_s16  ;;  %v2949_v53 = vor.u32 %v2948_v54, %v2945_v30  ;;  %v2800_v27 = vor.u32 %v2798_v51, %v6467_v24  ;;  %v4603_v21 = vrot.slane %v6508_v22, 9  ;;  %v3023_v31 = vrot.slane %v4593_v57, 5  ;;  %v5276_v42 = vld [vmem:[%s7095_s11] sm:$0xff]  }
 0x580   : > { %v6604_v46 = vsel %vm5908_vm4, %v2936_v58, %v2940_v19  ;;  %v2963_v59 = vor.u32 %v2962_v35, %v2959_v5  ;;  %v2968_v6 = vrot.slane %v2966_v9, 5  ;;  %v2807_v26 = vor.u32 %v2805_v16, %v6474_v63  ;;  %4973 = vmatpush3.bf16.msra.mxu0 %v5276_v42 }
 0x581   : > { %v4614_v8 = vcombine.low %v6594_v14, %v6604_v46  ;;  %v2950_v51 = vrot.slane %v2949_v53, 4  ;;  %v2828_v24 = vsel %vm5615_vm2, 0, %v2800_v27  ;;  %v3024_v22 = vsel %vm5808_vm0, %v4603_v21, %v3023_v31 }
 0x582   : > { %v2964_v41 = vrot.slane %v2963_v59, 4  ;;  %v2840_v17 = vsel %vm5745_vm14, %v2828_v24, 0  ;;  %v4619_v16 = vcombine.low %v6550_v45, %v3024_v22  ;;  %v2829_v63 = vsel %vm5615_vm2, 0, %v2807_v26 }
 0x583   : > { %3140 = vrot.lane.b32.xlu0 %v4614_v8, %s5382_s24  ;;  %3074 = vrot.lane.b32.xlu1 %v4614_v8, %s5383_s28  ;;  %v6627_v15 = vsel %vm5908_vm4, %v2950_v51, %v2954_v0  ;;  %v4594_v50 = vcombine.low %v2840_v17, %v2840_v17  ;;  %v4595_v57 = vcombine.high %v2840_v17, %v2840_v17  ;;  %v6631_v52 = vsel %vm5745_vm14, %v2829_v63, 0 }
 0x584   : > { %v6635_v45 = vsel %vm5908_vm4, %v2964_v41, %v2968_v6  ;;  %v4596_v12 = vcombine.low %v6631_v52, %v6631_v52  ;;  %v6640_v38 = vcombine.low %v2840_v17, %v6631_v52  ;;  %v4597_v18 = vcombine.high %v6631_v52, %v6631_v52  ;;  %5079 = vmatmul.mubr.msk.bf16.vlgmr.msra.gmra.mxu1 %vm1550_vm5, %v4619_v16 }
 0x585   : > { %v4615_v3 = vcombine.low %v6627_v15, %v6635_v45  ;;  %v4604_v19 = vrot.slane %v4594_v50, 9  ;;  %v3027_v55 = vrot.slane %v4595_v57, 5  ;;  %v2971_v30 = vshrl.u32 %v4594_v50, 16 }
 0x586   : > { %v2974_v25 = vshll.u32 %v4594_v50, 16  ;;  %v2980_v47 = vshll.u32 %v4595_v57, 16  ;;  %v2985_v7 = vshrl.u32 %v4596_v12, 16  ;;  %v2988_v23 = vshll.u32 %v4596_v12, 16 }
 0x587   : > { %3142 = vrot.lane.b32.xlu0 %v4615_v3, %s5382_s24  ;;  %3076 = vrot.lane.b32.xlu1 %v4615_v3, %s5383_s28  ;;  %v3028_v29 = vsel %vm5808_vm0, %v4604_v19, %v3027_v55  ;;  %v2994_v11 = vshll.u32 %v4597_v18, 16  ;;  %v2809_v28 = vshrl.u32 %v6447_v13, 16  ;;  %v4623_v54 = vcombine.low %v6498_v62, %v2840_v17 }
 0x588   : > { %v4631_v1 = vcombine.low %v3024_v22, %v3028_v29  ;;  %v2973_v0 = vrot.slane %v2971_v30, 4  ;;  %v2976_v58 = vrot.slane %v2974_v25, 5  ;;  %v2982_v5 = vrot.slane %v2980_v47, 5 }
 0x589   : > { %v2987_v35 = vrot.slane %v2985_v7, 4  ;;  %v2990_v9 = vrot.slane %v2988_v23, 5  ;;  %v2811_v53 = vrot.slane %v2809_v28, 7  ;;  %v2812_v21 = vshll.u32 %v6447_v13, 16 }
 0x58a   : > { %v2977_v27 = vor.u32 %v2976_v58, %v2973_v0  ;;  %v4605_v31 = vrot.slane %v4596_v12, 9  ;;  %v3031_v59 = vrot.slane %v4597_v18, 5  ;;  %v2996_v26 = vrot.slane %v2994_v11, 5 }
 0x58b   : > { %3126 = vrot.lane.b32.xlu0 %v4631_v1, %s5383_s28  ;;  %3096 = vrot.lane.b32.xlu1 %v4619_v16, %s5381_s16  ;;  %v2991_v6 = vor.u32 %v2990_v9, %v2987_v35  ;;  %v4625_v62 = vcombine.low %v6580_v60, %v6594_v14  ;;  %v4626_v42 = vcombine.low %v6604_v46, %v6627_v15 }
 0x58c   : > { %v2978_v8 = vrot.slane %v2977_v27, 4  ;;  %v2814_v51 = vor.u32 %v2812_v21, %v2811_v53  ;;  %v3032_v13 = vsel %vm5808_vm0, %v4605_v31, %v3031_v59  ;;  %v4609_v21 = vcombine.low %v5755_v44, %v6515_v2 }
 0x58d   : > { %v2992_v24 = vrot.slane %v2991_v6, 4  ;;  %v4620_v17 = vcombine.low %v3028_v29, %v3032_v13 }
 0x58e   : > { %v6664_v22 = vsel %vm5908_vm4, %v2978_v8, %v2982_v5  ;;  %v2830_v41 = vsel %vm5615_vm2, 0, %v2814_v51 }
 0x58f   : > { %3135 = vrot.lane.b32.xlu0 %v6640_v38, %s5381_s16  ;;  %3108 = vrot.lane.b32.xlu1 %v4623_v54, %s5382_s24  ;;  %v6673_v60 = vsel %vm5908_vm4, %v2992_v24, %v2996_v26  ;;  %v2842_v14 = vsel %vm5745_vm14, %v2830_v41, 0  ;;  %v4627_v46 = vcombine.low %v6635_v45, %v6664_v22 }
 0x590   : > { %v4616_v16 = vcombine.low %v6664_v22, %v6673_v60  ;;  %v4606_v63 = vcombine.low %v2842_v14, %v2842_v14  ;;  %v4607_v15 = vcombine.high %v2842_v14, %v2842_v14  ;;  %5082 = vmatprep.mubr.msk.bf16.mxu1 %vm1550_vm5, %v4620_v17  ;;  %v4633_v23 = vcombine.low %v2842_v14, %v5755_v44 }
 0x591   : > { %v4624_v11 = vcombine.low %v6631_v52, %v2842_v14 }
 0x592   : > { %v4608_v50 = vrot.slane %v4606_v63, 9  ;;  %v3054_v57 = vrot.slane %v4607_v15, 5  ;;  %v3039_v12 = vshrl.u32 %v4606_v63, 16  ;;  %v3042_v3 = vshll.u32 %v4606_v63, 16 }
 0x593   : > { %3144 = vrot.lane.b32.xlu0 %v4616_v16, %s5382_s24  ;;  %3078 = vrot.lane.b32.xlu1 %v4616_v16, %s5383_s28  ;;  %v3048_v19 = vshll.u32 %v4607_v15, 16 }
 0x594   : > { %v3055_v55 = vsel %vm5808_vm0, %v4608_v50, %v3054_v57  ;;  %v3041_v18 = vrot.slane %v3039_v12, 4  ;;  %v3044_v30 = vrot.slane %v3042_v3, 5 }
 0x595   : > { %v4632_v25 = vcombine.low %v3032_v13, %v3055_v55  ;;  %v4635_v47 = vcombine.low %v3055_v55, %v5855_v56  ;;  %v3050_v29 = vrot.slane %v3048_v19, 5 }
 0x596   : > { %v3045_v7 = vor.u32 %v3044_v30, %v3041_v18 }
 0x597   : > { %3128 = vrot.lane.b32.xlu0 %v4632_v25, %s5383_s28  ;;  %3098 = vrot.lane.b32.xlu1 %v4620_v17, %s5381_s16 }
 0x598   : > { %v3046_v28 = vrot.slane %v3045_v7, 4  ;;  %5083 = vmatmul.mubr.msk.bf16.gmra.mxu1 %vm1550_vm5, %v4635_v47 }
 0x59a   : > { %v3051_v1 = vsel %vm5908_vm4, %v3046_v28, %v3050_v29 }
 0x59b   : > { %3137 = vrot.lane.b32.xlu0 %v4633_v23, %s5381_s16  ;;  %3110 = vrot.lane.b32.xlu1 %v4624_v11, %s5382_s24  ;;  %v4634_v54 = vcombine.low %v3051_v1, %v5924_v4  ;;  %v4628_v0 = vcombine.low %v6673_v60, %v3051_v1 }
 0x59f   : > { %3146 = vrot.lane.b32.xlu0 %v4634_v54, %s5382_s24 }
 0x5e1   : > { %v3132_v58 = vpop.permute.xlu1 %3131 }
 0x5e3   : > { %v3134_v5 = vpop.permute.xlu0 %3133 }
 0x5e5   : > { %v3105_v35 = vpop.permute.xlu1 %3104 }
 0x5e9   : > { %v3123_v52 = vpop.permute.xlu0 %3122  ;;  %v3107_v9 = vpop.permute.xlu1 %3106 }
 0x5ea   : > { %v3186_v6 = vsel %vm1550_vm5, %v4625_v62, %v3123_v52  ;;  %v5282_v52 = vld [vmem:[%s7097_s13 + $0x70] sm:$0xff]  }
 0x5eb   : > { %v3197_v24 = vsel %vm1563_vm6, %v3186_v6, %v3132_v58  ;;  %v6758_v6 = vld [vmem:[%s7096_s12] ss:$0 sm:$0xff] }
 0x5ed   : > { %v3125_v53 = vpop.permute.xlu0 %3124  ;;  %v3093_v27 = vpop.permute.xlu1 %3092 }
 0x5ee   : > { %v3189_v41 = vsel %vm1550_vm5, %v4626_v42, %v3125_v53  ;;  %v5284_v53 = vld [vmem:[%s7097_s13 + $0x68] sm:$0xff]  }
 0x5ef   : > { %v3199_v62 = vsel %vm1563_vm6, %v3189_v41, %v3134_v5  ;;  %v5278_v5 = vld [vmem:[%s7097_s13 + $0x88] sm:$0xff]  }
 0x5f0   : > { %5086 = vmatprep.subr.bf16.mxu0 %v5278_v5 }
 0x5f1   : > { %v3073_v31 = vpop.permute.xlu0 %3072  ;;  %v3095_v59 = vpop.permute.xlu1 %3094 }
 0x5f2   : > { %v3152_v26 = vsel %vm1550_vm5, %v4609_v21, %v3073_v31 }
 0x5f3   : > { %v3164_v8 = vsel %vm1563_vm6, %v3152_v26, %v3093_v27  ;;  %v5285_v27 = vld [vmem:[%s7097_s13 + $0x28] sm:$0xff]  }
 0x5f4   : > { %v3173_v60 = vsel %vm1572_vm7, %v3164_v8, %v3105_v35  ;;  %v5281_v35 = vld [vmem:[%s7097_s13 + $0x38] sm:$0xff]  }
 0x5f5   : > { %v3141_v51 = vpop.permute.xlu0 %3140  ;;  %v3075_v13 = vpop.permute.xlu1 %3074 }
 0x5f6   : > { %v3205_v17 = vsel %vm1572_vm7, %v3197_v24, %v3141_v51  ;;  %v3155_v2 = vsel %vm1550_vm5, %v6489_v36, %v3075_v13 }
 0x5f7   : > { %3374 = vmatprep.mubr.bf16.mxu0 %v3205_v17  ;;  %v3166_v15 = vsel %vm1563_vm6, %v3155_v2, %v3095_v59 }
 0x5f8   : > { %3375 = vmatmul.mubr.bf16.vlgmr.msra.gmra.mxu0 %v3173_v60  ;;  %v3176_v57 = vsel %vm1572_vm7, %v3166_v15, %v3107_v9  ;;  %v5283_v9 = vld [vmem:[%s7097_s13 + $0x30] sm:$0xff]  }
 0x5f9   : > { %v3143_v14 = vpop.permute.xlu0 %3142  ;;  %v3077_v16 = vpop.permute.xlu1 %3076  ;;  %5087 = vmatpush3.bf16.msra.mxu0 %v5278_v5 }
 0x5fa   : > { %v3208_v63 = vsel %vm1572_vm7, %v3199_v62, %v3143_v14  ;;  %v3158_v19 = vsel %vm1550_vm5, %v6511_v61, %v3077_v16 }
 0x5fb   : > { %3382 = vmatprep.mubr.bf16.mxu0 %v3208_v63 }
 0x5fd   : > { %v3127_v50 = vpop.permute.xlu0 %3126  ;;  %v3097_v42 = vpop.permute.xlu1 %3096 }
 0x5fe   : > { %v3192_v36 = vsel %vm1550_vm5, %v4627_v46, %v3127_v50  ;;  %v3168_v25 = vsel %vm1563_vm6, %v3158_v19, %v3097_v42 }
 0x600   : > { %3383 = vmatmul.mubr.bf16.gmra.mxu0 %v3176_v57  ;;  %v5286_v57 = vld [vmem:[%s7097_s13 + $0x60] sm:$0xff]  }
 0x601   : > { %v3136_v12 = vpop.permute.xlu0 %3135  ;;  %v3109_v3 = vpop.permute.xlu1 %3108 }
 0x602   : > { %v3201_v55 = vsel %vm1563_vm6, %v3192_v36, %v3136_v12  ;;  %v3179_v7 = vsel %vm1572_vm7, %v3168_v25, %v3109_v3  ;;  %v5287_v12 = vld [vmem:[%s7097_s13 + $0x20] sm:$0xff]  }
 0x605   : > { %v3145_v18 = vpop.permute.xlu0 %3144  ;;  %v3079_v30 = vpop.permute.xlu1 %3078 }
 0x606   : > { %v3211_v47 = vsel %vm1572_vm7, %v3201_v55, %v3145_v18  ;;  %v3161_v45 = vsel %vm1550_vm5, %v6640_v38, %v3079_v30  ;;  %v5279_v38 = vld [vmem:[%s7097_s13 + $0x80] sm:$0xff]  }
 0x607   : > { %3390 = vmatprep.mubr.bf16.mxu0 %v3211_v47  ;;  %5088 = vmatprep.subr.bf16.mxu0 %v5279_v38 }
 0x608   : > { %3391 = vmatmul.mubr.bf16.gmra.mxu0 %v3179_v7 }
 0x609   : > { %v3129_v29 = vpop.permute.xlu0 %3128  ;;  %v3099_v23 = vpop.permute.xlu1 %3098  ;;  %5089 = vmatpush3.bf16.msra.mxu0 %v5279_v38 }
 0x60a   : > { %v3195_v22 = vsel %vm1550_vm5, %v4628_v0, %v3129_v29  ;;  %v3170_v1 = vsel %vm1563_vm6, %v3161_v45, %v3099_v23  ;;  %v5280_v0 = vld [vmem:[%s7097_s13 + $0x78] sm:$0xff]  }
 0x60b   : > { %5004 = vmatprep.subr.bf16.mxu1 %v5280_v0  ;;  %v5288_v23 = vld [vmem:[%s7097_s13 + $0x58] sm:$0xff]  }
 0x60c   : > { %5005 = vmatpush3.bf16.msra.mxu1 %v5281_v35 }
 0x60d   : > { %v3138_v61 = vpop.permute.xlu0 %3137  ;;  %v3111_v46 = vpop.permute.xlu1 %3110  ;;  %5006 = vmatprep.subr.bf16.mxu1 %v5282_v52 }
 0x60e   : > { %v3203_v11 = vsel %vm1563_vm6, %v3195_v22, %v3138_v61  ;;  %v3182_v58 = vsel %vm1572_vm7, %v3170_v1, %v3111_v46  ;;  %v5289_v61 = vld [vmem:[%s7097_s13 + $0x18] sm:$0xff]  }
 0x610   : > { %5007 = vmatpush3.bf16.msra.mxu1 %v5283_v9 }
 0x611   : > { %v3147_v28 = vpop.permute.xlu0 %3146  ;;  %5008 = vmatprep.subr.bf16.mxu1 %v5284_v53 }
 0x612   : > { %v3214_v54 = vsel %vm1572_vm7, %v3203_v11, %v3147_v28 }
 0x613   : > { %3398 = vmatprep.mubr.bf16.mxu0 %v3214_v54 }
 0x614   : > { %3399 = vmatmul.mubr.bf16.gmra.mxu0 %v3182_v58  ;;  %5009 = vmatpush3.bf16.msra.mxu1 %v5285_v27 }
 0x615   : > { %5010 = vmatprep.subr.bf16.mxu1 %v5286_v57 }
 0x618   : > { %5011 = vmatpush3.bf16.msra.mxu1 %v5287_v12 }
 0x619   : > { %5012 = vmatprep.subr.bf16.mxu1 %v5288_v23 }
 0x61c   : > { %5013 = vmatpush3.bf16.msra.mxu1 %v5289_v61 }
 0x644   : > { %v5080_v21 = vpop.f32.mrf.mxu1 }
 0x646   : > { %v3441_v26 = vpop.f32.mrf.mxu1 }
 0x648   : > { %v5081_v13 = vpop.f32.mrf.mxu1 }
 0x64a   : > { %v3444_v16 = vpop.f32.mrf.mxu1 }
 0x658   : > { %v6769_v25 = vpop.f32.mrf.mxu1 }
 0x65a   : > { %v3457_v5 = vpop.f32.mrf.mxu1 }
 0x6b8   : > { %v4974_v31 = vpop.f32.mrf.mxu0 }
 0x6ba   : > { %v4975_v59 = vpop.f32.mrf.mxu0 }
 0x6bb   : > { %v4976_v8 = vadd.f32 %v4975_v59, %v4974_v31 }
 0x6bc   : > { %v4977_v51 = vpop.f32.mrf.mxu0 }
 0x6bd   : > { %v3377_v24 = vadd.f32 %v4976_v8, %v6758_v6 }
 0x6be   : > { %v4978_v41 = vpop.f32.mrf.mxu0 }
 0x6bf   : > { %v3442_v17 = vadd.f32 %v3441_v26, %v3377_v24  ;;  %v4979_v60 = vadd.f32 %v4978_v41, %v4977_v51 }
 0x6c0   : > { %v4980_v2 = vpop.f32.mrf.mxu0 }
 0x6c1   : > { %v4778_v62 = vpack.c.bf16 %v3442_v17, %v3442_v17  ;;  %v3380_v14 = vadd.f32 %v4979_v60, %v6758_v6  ;;  %v6793_v17 = vpop.f32.mrf.mxu1 }
 0x6c2   : > { %v4981_v63 = vpop.f32.mrf.mxu0 }
 0x6c3   : > { %v3497_v15 = vshrl.u32 %v4778_v62, 16  ;;  %v3445_v50 = vadd.f32 %v3444_v16, %v3380_v14  ;;  %v4982_v42 = vadd.f32 %v4981_v63, %v4980_v2  ;;  %v3500_v36 = vshll.u32 %v4778_v62, 16 }
 0x6c4   : > { %v4983_v3 = vpop.f32.mrf.mxu0 }
 0x6c5   : > { %v3499_v19 = vrot.slane %v3497_v15, 7  ;;  %v4779_v55 = vpack.c.bf16 %v3445_v50, %v3445_v50  ;;  %v3385_v18 = vadd.f32 %v4982_v42, %v6758_v6 }
 0x6c6   : > { %v4984_v30 = vpop.f32.mrf.mxu0 }
 0x6c7   : > { %v3502_v47 = vor.u32 %v3500_v36, %v3499_v19  ;;  %v3504_v7 = vshrl.u32 %v4779_v55, 16  ;;  %v3450_v29 = vadd.f32 %v5080_v21, %v3385_v18  ;;  %v4985_v45 = vadd.f32 %v4984_v30, %v4983_v3 }
 0x6c8   : > { %v4986_v22 = vpop.f32.mrf.mxu0  ;;  %v3507_v28 = vshll.u32 %v4779_v55, 16  ;;  %v3460_v55 = vpop.f32.mrf.mxu1 }
 0x6c9   : > { %v3560_v46 = vsel %vm5615_vm2, 0, %v3502_v47  ;;  %v3506_v11 = vrot.slane %v3504_v7, 7  ;;  %v4780_v1 = vpack.c.bf16 %v3450_v29, %v3450_v29  ;;  %v3388_v58 = vadd.f32 %v4985_v45, %v6758_v6 }
 0x6ca   : > { %v6781_v54 = vsel %vm5745_vm14, %v3560_v46, 0  ;;  %v4987_v38 = vpop.f32.mrf.mxu0 }
 0x6cb   : > { %v4667_v0 = vcombine.low %v6781_v54, %v6781_v54  ;;  %v3509_v35 = vor.u32 %v3507_v28, %v3506_v11  ;;  %v3511_v52 = vshrl.u32 %v4780_v1, 16  ;;  %v3453_v9 = vadd.f32 %v5081_v13, %v3388_v58  ;;  %v5291_v58 = vld [vmem:[%s7097_s13 + $0x10] sm:$0xff]  }
 0x6cc   : > { %v4988_v53 = vadd.f32 %v4987_v38, %v4986_v22  ;;  %v4989_v27 = vpop.f32.mrf.mxu0  ;;  %v4668_v21 = vcombine.high %v6781_v54, %v6781_v54  ;;  %v3514_v26 = vshll.u32 %v4780_v1, 16  ;;  %v5290_v1 = vld [vmem:[%s7097_s13 + $0x50] sm:$0xff]  }
 0x6cd   : > { %v3561_v31 = vsel %vm5615_vm2, 0, %v3509_v35  ;;  %v3513_v59 = vrot.slane %v3511_v52, 7  ;;  %v4681_v8 = vrot.slane %v4667_v0, 9  ;;  %v4781_v24 = vpack.c.bf16 %v3453_v9, %v3453_v9  ;;  %v5292_v52 = vld [vmem:[%s7097_s13 + $0x48] sm:$0xff]   ;;  %5014 = vmatprep.subr.bf16.mxu1 %v5290_v1 }
 0x6ce   : > { %v3569_v51 = vsel %vm5745_vm14, %v3561_v31, 0  ;;  %v3393_v41 = vadd.f32 %v4988_v53, %v6758_v6  ;;  %v4990_v13 = vpop.f32.mrf.mxu0  ;;  %v3711_v60 = vrot.slane %v4668_v21, 5  ;;  %v3612_v42 = vshrl.u32 %v4667_v0, 16  ;;  %5015 = vmatpush3.bf16.msra.mxu1 %v5291_v58 }
 0x6cf   : > { %v6795_v2 = vcombine.low %v3569_v51, %v3569_v51  ;;  %v4991_v62 = vadd.f32 %v4990_v13, %v4989_v27  ;;  %v4703_v14 = vcombine.low %v6781_v54, %v3569_v51  ;;  %v3516_v16 = vor.u32 %v3514_v26, %v3513_v59  ;;  %5016 = vmatprep.subr.bf16.mxu1 %v5292_v52 }
 0x6d0   : > { %v3518_v63 = vshrl.u32 %v4781_v24, 16  ;;  %v3458_v15 = vadd.f32 %v3457_v5, %v3393_v41  ;;  %v3712_v50 = vsel %vm5808_vm0, %v4681_v8, %v3711_v60  ;;  %v3521_v57 = vshll.u32 %v4781_v24, 16  ;;  %v5293_v24 = vld [vmem:[%s7097_s13 + $0x8] sm:$0xff]  }
 0x6d1   : > { %v3396_v12 = vadd.f32 %v4991_v62, %v6758_v6  ;;  %3806 = vrot.lane.b32.xlu1 %v4703_v14, %s5382_s24  ;;  %v3562_v3 = vsel %vm5615_vm2, 0, %v3516_v16  ;;  %v6804_v19 = vcombine.high %v3569_v51, %v3569_v51  ;;  %v4699_v30 = vcombine.low %v5855_v56, %v3712_v50 }
 0x6d2   : > { %v4782_v36 = vpack.c.bf16 %v3458_v15, %v3458_v15  ;;  %v6808_v18 = vsel %vm5745_vm14, %v3562_v3, 0  ;;  %v4682_v47 = vrot.slane %v6795_v2, 9  ;;  %v3520_v7 = vrot.slane %v3518_v63, 7  ;;  %5017 = vmatpush3.bf16.msra.mxu1 %v5293_v24 }
 0x6d3   : > { %v3461_v29 = vadd.f32 %v3460_v55, %v3396_v12  ;;  %v6813_v23 = vcombine.low %v3569_v51, %v6808_v18  ;;  %v3715_v61 = vrot.slane %v6804_v19, 5  ;;  %v3614_v46 = vrot.slane %v3612_v42, 4  ;;  %v5294_v42 = vld [vmem:[%s7097_s13 + $0x40] sm:$0xff]  }
 0x6d4   : > { %v3525_v45 = vshrl.u32 %v4782_v36, 16  ;;  %v4992_v22 = vpop.f32.mrf.mxu0  ;;  %v3615_v11 = vshll.u32 %v4667_v0, 16  ;;  %v3621_v28 = vshll.u32 %v4668_v21, 16  ;;  %v3528_v5 = vshll.u32 %v4782_v36, 16  ;;  %5018 = vmatprep.subr.bf16.mxu1 %v5294_v42 }
 0x6d5   : > { %v6822_v38 = vpack.c.bf16 %v3461_v29, %v3461_v29  ;;  %3833 = vrot.lane.b32.xlu0 %v6813_v23, %s5381_s16  ;;  %3794 = vrot.lane.b32.xlu1 %v4699_v30, %s5381_s16  ;;  %v3716_v0 = vsel %vm5808_vm0, %v4682_v47, %v3715_v61  ;;  %v6831_v35 = vcombine.low %v6808_v18, %v6808_v18  ;;  %v3626_v31 = vshrl.u32 %v6795_v2, 16  ;;  %v5295_v61 = vld [vmem:[%s7097_s13] sm:$0xff]  }
 0x6d6   : > { %v3527_v9 = vrot.slane %v3525_v45, 7  ;;  %v4993_v53 = vpop.f32.mrf.mxu0  ;;  %v4711_v27 = vcombine.low %v3712_v50, %v3716_v0  ;;  %v3617_v21 = vrot.slane %v3615_v11, 5  ;;  %v3623_v8 = vrot.slane %v3621_v28, 5  ;;  %5019 = vmatpush3.bf16.msra.mxu1 %v5295_v61 }
 0x6d7   : > { %v3532_v59 = vshrl.u32 %v6822_v38, 16  ;;  %v4994_v26 = vadd.f32 %v4993_v53, %v4992_v22  ;;  %v6840_v51 = vcombine.high %v6808_v18, %v6808_v18  ;;  %v4683_v60 = vrot.slane %v6831_v35, 9 }
 0x6d8   : > { %v4995_v41 = vpop.f32.mrf.mxu0  ;;  %v3618_v13 = vor.u32 %v3617_v21, %v3614_v46  ;;  %v3523_v62 = vor.u32 %v3521_v57, %v3520_v7  ;;  %v3530_v14 = vor.u32 %v3528_v5, %v3527_v9  ;;  %v3535_v63 = vshll.u32 %v6822_v38, 16 }
 0x6d9   : > { %v6846_v16 = vrot.slane %v3532_v59, 7  ;;  %v3401_v15 = vadd.f32 %v4994_v26, %v6758_v6  ;;  %3824 = vrot.lane.b32.xlu0 %v4711_v27, %s5383_s28  ;;  %v3719_v50 = vrot.slane %v6840_v51, 5  ;;  %v3628_v55 = vrot.slane %v3626_v31, 4 }
 0x6da   : > { %v3619_v12 = vrot.slane %v3618_v13, 4  ;;  %v4996_v3 = vpop.f32.mrf.mxu0  ;;  %v3563_v57 = vsel %vm5615_vm2, 0, %v3523_v62  ;;  %v3564_v36 = vsel %vm5615_vm2, 0, %v3530_v14  ;;  %v3629_v46 = vshll.u32 %v6795_v2, 16 }
 0x6db   : > { %v3466_v30 = vadd.f32 %v6769_v25, %v3401_v15  ;;  %v4997_v47 = vadd.f32 %v4996_v3, %v4995_v41  ;;  %v3720_v7 = vsel %vm5808_vm0, %v4683_v60, %v3719_v50  ;;  %v3571_v29 = vsel %vm5745_vm14, %v3563_v57, 0 }
 0x6dc   : > { %v6869_v45 = vsel %vm5908_vm4, %v3619_v12, %v3623_v8  ;;  %v4700_v22 = vcombine.low %v3716_v0, %v3720_v7  ;;  %v6873_v25 = vsel %vm5745_vm14, %v3564_v36, 0  ;;  %v4673_v38 = vcombine.low %v3571_v29, %v3571_v29 }
 0x6dd   : > { %v4784_v11 = vpack.c.bf16 %v3466_v30, %v3466_v30  ;;  %v4695_v28 = vcombine.low %v5924_v4, %v6869_v45  ;;  %v3404_v1 = vadd.f32 %v4997_v47, %v6758_v6  ;;  %v6881_v58 = vcombine.low %v6873_v25, %v6873_v25 }
 0x6de   : > { %5090 = vmatprep.mubr.msk.bf16.mxu0 %vm1550_vm5, %v4700_v22  ;;  %v6885_v5 = vcombine.low %v3571_v29, %v6873_v25  ;;  %v6887_v0 = vcombine.high %v3571_v29, %v3571_v29  ;;  %v6891_v2 = vcombine.high %v6873_v25, %v6873_v25  ;;  %v4704_v9 = vcombine.low %v6808_v18, %v3571_v29 }
 0x6df   : > { %v3539_v52 = vshrl.u32 %v4784_v11, 16  ;;  %3775 = vrot.lane.b32.xlu1 %v4695_v28, %s5383_s28  ;;  %v3469_v6 = vadd.f32 %v6793_v17, %v3404_v1  ;;  %v4685_v53 = vrot.slane %v6881_v58, 9  ;;  %v4684_v27 = vrot.slane %v4673_v38, 9 }
 0x6e0   : > { %3835 = vrot.lane.b32.xlu0 %v6885_v5, %s5381_s16  ;;  %v3723_v21 = vrot.slane %v6887_v0, 5  ;;  %v3727_v31 = vrot.slane %v6891_v2, 5  ;;  %v3631_v59 = vrot.slane %v3629_v46, 5  ;;  %v3635_v24 = vshll.u32 %v6804_v19, 16 }
 0x6e1   : > { %v3541_v26 = vrot.slane %v3539_v52, 7  ;;  %v4785_v8 = vpack.c.bf16 %v3469_v6, %v3469_v6  ;;  %v3640_v17 = vshrl.u32 %v6831_v35, 16  ;;  %v3643_v60 = vshll.u32 %v6831_v35, 16 }
 0x6e2   : > { %v3724_v18 = vsel %vm5808_vm0, %v4684_v27, %v3723_v21  ;;  %v6907_v41 = vsel %vm5808_vm0, %v4685_v53, %v3727_v31  ;;  %v3632_v13 = vor.u32 %v3631_v59, %v3628_v55  ;;  %v3542_v62 = vshll.u32 %v4784_v11, 16 }
 0x6e3   : > { %v3546_v14 = vshrl.u32 %v4785_v8, 16  ;;  %3808 = vrot.lane.b32.xlu1 %v4704_v9, %s5382_s24  ;;  %v6912_v15 = vcombine.low %v3724_v18, %v6907_v41  ;;  %v4712_v19 = vcombine.low %v3720_v7, %v3724_v18  ;;  %v3549_v50 = vshll.u32 %v4785_v8, 16 }
 0x6e4   : > { %v3633_v42 = vrot.slane %v3632_v13, 4  ;;  %v3642_v12 = vrot.slane %v3640_v17, 4  ;;  %v3645_v3 = vrot.slane %v3643_v60, 5  ;;  %v3649_v35 = vshll.u32 %v6840_v51, 16 }
 0x6e5   : > { %v3548_v57 = vrot.slane %v3546_v14, 7  ;;  %3826 = vrot.lane.b32.xlu0 %v4712_v19, %s5383_s28  ;;  %5091 = vmatmul.mubr.msk.bf16.vlgmr.msra.gmra.mxu0 %vm1550_vm5, %v6912_v15  ;;  %v3537_v36 = vor.u32 %v3535_v63, %v6846_v16  ;;  %v3544_v55 = vor.u32 %v3542_v62, %v3541_v26  ;;  %v3637_v30 = vrot.slane %v3635_v24, 5 }
 0x6e6   : > { %v3646_v47 = vor.u32 %v3645_v3, %v3642_v12  ;;  %v3654_v29 = vshrl.u32 %v4673_v38, 16  ;;  %v3657_v11 = vshll.u32 %v4673_v38, 16  ;;  %v3651_v1 = vrot.slane %v3649_v35, 5 }
 0x6e7   : > { %v3551_v61 = vor.u32 %v3549_v50, %v3548_v57  ;;  %3796 = vrot.lane.b32.xlu1 %v4700_v22, %s5381_s16  ;;  %v3565_v7 = vsel %vm5615_vm2, 0, %v3537_v36  ;;  %v3566_v46 = vsel %vm5615_vm2, 0, %v3544_v55  ;;  %v6934_v22 = vsel %vm5908_vm4, %v3633_v42, %v3637_v30 }
 0x6e8   : > { %v3647_v28 = vrot.slane %v3646_v47, 4  ;;  %v3573_v51 = vsel %vm5745_vm14, %v3565_v7, 0  ;;  %v6928_v16 = vsel %vm5745_vm14, %v3566_v46, 0  ;;  %v3656_v6 = vrot.slane %v3654_v29, 4 }
 0x6e9   : > { %v3567_v63 = vsel %vm5615_vm2, 0, %v3551_v61  ;;  %v4677_v52 = vcombine.low %v3573_v51, %v3573_v51  ;;  %v4678_v53 = vcombine.high %v3573_v51, %v3573_v51  ;;  %v4679_v27 = vcombine.low %v6928_v16, %v6928_v16 }
 0x6ea   : > { %v6938_v38 = vsel %vm5745_vm14, %v3567_v63, 0  ;;  %v6942_v9 = vsel %vm5908_vm4, %v3647_v28, %v3651_v1  ;;  %v6950_v31 = vcombine.high %v6928_v16, %v6928_v16  ;;  %v3659_v59 = vrot.slane %v3657_v11, 5 }
 0x6eb   : > { %v4696_v49 = vcombine.low %v6934_v22, %v6942_v9  ;;  %v4686_v21 = vrot.slane %v4677_v52, 9  ;;  %v3731_v37 = vrot.slane %v4678_v53, 5  ;;  %v4687_v26 = vrot.slane %v4679_v27, 9 }
 0x6ec   : > { %v3663_v8 = vshll.u32 %v6887_v0, 16  ;;  %v3668_v24 = vshrl.u32 %v6881_v58, 16  ;;  %v6957_v17 = vcombine.low %v3573_v51, %v6928_v16  ;;  %v3735_v18 = vrot.slane %v6950_v31, 5 }
 0x6ed   : > { %3842 = vrot.lane.b32.xlu0 %v4696_v49, %s5382_s24  ;;  %3777 = vrot.lane.b32.xlu1 %v4696_v49, %s5383_s28  ;;  %v3660_v13 = vor.u32 %v3659_v59, %v3656_v6  ;;  %v3671_v60 = vshll.u32 %v6881_v58, 16  ;;  %v3732_v62 = vsel %vm5808_vm0, %v4686_v21, %v3731_v37  ;;  %v3677_v0 = vshll.u32 %v6891_v2, 16 }
 0x6ee   : > { %v3670_v14 = vrot.slane %v3668_v24, 4  ;;  %v4688_v19 = vcombine.low %v6938_v38, %v6938_v38  ;;  %v4705_v50 = vcombine.low %v6873_v25, %v3573_v51  ;;  %v3736_v42 = vsel %vm5808_vm0, %v4687_v26, %v3735_v18 }
 0x6ef   : > { %v3665_v12 = vrot.slane %v3663_v8, 5  ;;  %v3673_v3 = vrot.slane %v3671_v60, 5  ;;  %v4713_v57 = vcombine.low %v6907_v41, %v3732_v62  ;;  %v4702_v35 = vcombine.low %v3732_v62, %v3736_v42 }
 0x6f0   : > { %v4689_v58 = vcombine.high %v6938_v38, %v6938_v38  ;;  %v4690_v36 = vrot.slane %v4688_v19, 9  ;;  %v3661_v2 = vrot.slane %v3660_v13, 4  ;;  %v3682_v25 = vshrl.u32 %v4677_v52, 16 }
 0x6f1   : > { %3837 = vrot.lane.b32.xlu0 %v6957_v17, %s5381_s16  ;;  %3810 = vrot.lane.b32.xlu1 %v4705_v50, %s5382_s24  ;;  %v3674_v55 = vor.u32 %v3673_v3, %v3670_v14  ;;  %v3685_v30 = vshll.u32 %v4677_v52, 16  ;;  %v3679_v47 = vrot.slane %v3677_v0, 5  ;;  %v3696_v61 = vshrl.u32 %v4679_v27, 16 }
 0x6f2   : > { %5094 = vmatprep.mubr.msk.bf16.mxu0 %vm1550_vm5, %v4702_v35  ;;  %v3758_v29 = vrot.slane %v4689_v58, 5  ;;  %v3699_v41 = vshll.u32 %v4679_v27, 16  ;;  %v3684_v46 = vrot.slane %v3682_v25, 4  ;;  %v3691_v28 = vshll.u32 %v4678_v53, 16 }
 0x6f3   : > { %v3675_v7 = vrot.slane %v3674_v55, 4  ;;  %v3687_v11 = vrot.slane %v3685_v30, 5  ;;  %v3698_v51 = vrot.slane %v3696_v61, 4  ;;  %v6983_v52 = vsel %vm5908_vm4, %v3661_v2, %v3665_v12 }
 0x6f4   : > { %v3759_v1 = vsel %vm5808_vm0, %v4690_v36, %v3758_v29  ;;  %v3701_v63 = vrot.slane %v3699_v41, 5  ;;  %v3705_v49 = vshll.u32 %v6950_v31, 16  ;;  %v3743_v59 = vshrl.u32 %v4688_v19, 16 }
 0x6f5   : > { %3828 = vrot.lane.b32.xlu0 %v4713_v57, %s5383_s28  ;;  %3798 = vrot.lane.b32.xlu1 %v6912_v15, %s5381_s16  ;;  %v6987_v6 = vsel %vm5908_vm4, %v3675_v7, %v3679_v47  ;;  %v4717_v53 = vcombine.low %v3759_v1, %v5855_v56  ;;  %v3688_v27 = vor.u32 %v3687_v11, %v3684_v46  ;;  %v3693_v15 = vrot.slane %v3691_v28, 5 }
 0x6f6   : > { %v3702_v20 = vor.u32 %v3701_v63, %v3698_v51  ;;  %v4697_v21 = vcombine.low %v6983_v52, %v6987_v6  ;;  %v3746_v37 = vshll.u32 %v4688_v19, 16  ;;  %v4707_v24 = vcombine.low %v6869_v45, %v6934_v22 }
 0x6f7   : > { %5095 = vmatmul.mubr.msk.bf16.gmra.mxu0 %vm1550_vm5, %v4717_v53  ;;  %v3689_v26 = vrot.slane %v3688_v27, 4  ;;  %v4708_v56 = vcombine.low %v6942_v9, %v6983_v52  ;;  %v3745_v31 = vrot.slane %v3743_v59, 4  ;;  %v3752_v13 = vshll.u32 %v4689_v58, 16 }
 0x6f8   : > { %v3703_v8 = vrot.slane %v3702_v20, 4  ;;  %v3748_v18 = vrot.slane %v3746_v37, 5  ;;  %v3707_v62 = vrot.slane %v3705_v49, 5  ;;  %v4714_v14 = vcombine.low %v3736_v42, %v3759_v1 }
 0x6f9   : > { %3844 = vrot.lane.b32.xlu0 %v4697_v21, %s5382_s24  ;;  %3779 = vrot.lane.b32.xlu1 %v4697_v21, %s5383_s28  ;;  %v3694_v60 = vsel %vm5908_vm4, %v3689_v26, %v3693_v15  ;;  %v3754_v9 = vrot.slane %v3752_v13, 5  ;;  %v4715_v3 = vcombine.low %v6938_v38, %v5755_v44  ;;  %v4706_v57 = vcombine.low %v6928_v16, %v6938_v38 }
 0x6fa   : > { %v3749_v0 = vor.u32 %v3748_v18, %v3745_v31  ;;  %v4709_v19 = vcombine.low %v6987_v6, %v3694_v60  ;;  %v7005_v45 = vsel %vm5908_vm4, %v3703_v8, %v3707_v62  ;;  %v4691_v47 = vcombine.low %v5755_v44, %v6781_v54 }
 0x6fb   : > { %v4698_v50 = vcombine.low %v3694_v60, %v7005_v45 }
 0x6fc   : > { %v3750_v22 = vrot.slane %v3749_v0, 4 }
 0x6fd   : > { %3830 = vrot.lane.b32.xlu0 %v4714_v14, %s5383_s28  ;;  %3800 = vrot.lane.b32.xlu1 %v4702_v35, %s5381_s16 }
 0x6fe   : > { %v3755_v12 = vsel %vm5908_vm4, %v3750_v22, %v3754_v9 }
 0x6ff   : > { %v4710_v42 = vcombine.low %v7005_v45, %v3755_v12  ;;  %v4716_v35 = vcombine.low %v3755_v12, %v5924_v4 }
 0x701   : > { %3846 = vrot.lane.b32.xlu0 %v4698_v50, %s5382_s24  ;;  %3781 = vrot.lane.b32.xlu1 %v4698_v50, %s5383_s28 }
 0x705   : > { %3839 = vrot.lane.b32.xlu0 %v4715_v3, %s5381_s16  ;;  %3812 = vrot.lane.b32.xlu1 %v4706_v57, %s5382_s24 }
 0x709   : > { %3848 = vrot.lane.b32.xlu0 %v4716_v35, %s5382_s24 }
 0x743   : > { %v3807_v40 = vpop.permute.xlu1 %3806 }
 0x747   : > { %v3834_v58 = vpop.permute.xlu0 %3833  ;;  %v3795_v36 = vpop.permute.xlu1 %3794 }
 0x74b   : > { %v3825_v2 = vpop.permute.xlu0 %3824 }
 0x74c   : > { %v3885_v61 = vsel %vm1550_vm5, %v4707_v24, %v3825_v2 }
 0x74d   : > { %v3896_v7 = vsel %vm1563_vm6, %v3885_v61, %v3834_v58 }
 0x751   : > { %v3776_v55 = vpop.permute.xlu1 %3775 }
 0x752   : > { %v3836_v25 = vpop.permute.xlu0 %3835  ;;  %v3853_v38 = vsel %vm1550_vm5, %v4691_v47, %v3776_v55 }
 0x753   : > { %v3864_v4 = vsel %vm1563_vm6, %v3853_v38, %v3795_v36 }
 0x754   : > { %v3872_v28 = vsel %vm1572_vm7, %v3864_v4, %v3807_v40 }
 0x755   : > { %v3809_v30 = vpop.permute.xlu1 %3808 }
 0x757   : > { %v3827_v29 = vpop.permute.xlu0 %3826 }
 0x758   : > { %v3888_v52 = vsel %vm1550_vm5, %v4708_v56, %v3827_v29 }
 0x759   : > { %v3797_v16 = vpop.permute.xlu1 %3796  ;;  %v3898_v53 = vsel %vm1563_vm6, %v3888_v52, %v3836_v25 }
 0x75f   : > { %v3843_v41 = vpop.permute.xlu0 %3842  ;;  %v3778_v46 = vpop.permute.xlu1 %3777 }
 0x760   : > { %v3904_v11 = vsel %vm1572_vm7, %v3896_v7, %v3843_v41  ;;  %v3856_v54 = vsel %vm1550_vm5, %v6813_v23, %v3778_v46 }
 0x761   : > { %4110 = vmatprep.mubr.bf16.mxu1 %v3904_v11  ;;  %v3866_v6 = vsel %vm1563_vm6, %v3856_v54, %v3797_v16 }
 0x762   : > { %4111 = vmatmul.mubr.bf16.vlgmr.msra.gmra.mxu1 %v3872_v28  ;;  %v3875_v21 = vsel %vm1572_vm7, %v3866_v6, %v3809_v30 }
 0x763   : > { %v3838_v1 = vpop.permute.xlu0 %3837  ;;  %v3811_v44 = vpop.permute.xlu1 %3810 }
 0x767   : > { %v3829_v51 = vpop.permute.xlu0 %3828  ;;  %v3799_v63 = vpop.permute.xlu1 %3798 }
 0x768   : > { %v3891_v37 = vsel %vm1550_vm5, %v4709_v19, %v3829_v51 }
 0x769   : > { %v3900_v8 = vsel %vm1563_vm6, %v3891_v37, %v3838_v1 }
 0x76b   : > { %v3845_v27 = vpop.permute.xlu0 %3844  ;;  %v3780_v20 = vpop.permute.xlu1 %3779 }
 0x76c   : > { %v3907_v49 = vsel %vm1572_vm7, %v3898_v53, %v3845_v27  ;;  %v3859_v15 = vsel %vm1550_vm5, %v6885_v5, %v3780_v20 }
 0x76d   : > { %4118 = vmatprep.mubr.bf16.mxu1 %v3907_v49  ;;  %v3868_v26 = vsel %vm1563_vm6, %v3859_v15, %v3799_v63 }
 0x76e   : > { %4119 = vmatmul.mubr.bf16.gmra.mxu1 %v3875_v21  ;;  %v3878_v18 = vsel %vm1572_vm7, %v3868_v26, %v3811_v44 }
 0x76f   : > { %v3831_v23 = vpop.permute.xlu0 %3830  ;;  %v3801_v59 = vpop.permute.xlu1 %3800 }
 0x770   : > { %v3894_v60 = vsel %vm1550_vm5, %v4710_v42, %v3831_v23 }
 0x773   : > { %v3847_v24 = vpop.permute.xlu0 %3846  ;;  %v3782_v31 = vpop.permute.xlu1 %3781 }
 0x774   : > { %v3910_v56 = vsel %vm1572_vm7, %v3900_v8, %v3847_v24  ;;  %v3862_v5 = vsel %vm1550_vm5, %v6957_v17, %v3782_v31  ;;  %v7055_v17 = vld [vmem:[%s7098_s14] ss:$0 sm:$0xff] }
 0x775   : > { %4126 = vmatprep.mubr.bf16.mxu1 %v3910_v56  ;;  %v3870_v19 = vsel %vm1563_vm6, %v3862_v5, %v3801_v59 }
 0x776   : > { %4127 = vmatmul.mubr.bf16.gmra.mxu1 %v3878_v18 }
 0x777   : > { %v3840_v13 = vpop.permute.xlu0 %3839  ;;  %v3813_v62 = vpop.permute.xlu1 %3812 }
 0x778   : > { %v3902_v14 = vsel %vm1563_vm6, %v3894_v60, %v3840_v13  ;;  %v3881_v22 = vsel %vm1572_vm7, %v3870_v19, %v3813_v62 }
 0x77b   : > { %v3849_v0 = vpop.permute.xlu0 %3848 }
 0x77c   : > { %v3913_v45 = vsel %vm1572_vm7, %v3902_v14, %v3849_v0 }
 0x77d   : > { %4134 = vmatprep.mubr.bf16.mxu1 %v3913_v45 }
 0x77e   : > { %4135 = vmatmul.mubr.bf16.gmra.mxu1 %v3881_v22 }
 0x7a5   : > { %v5092_v9 = vpop.f32.mrf.mxu0 }
 0x7a7   : > { %v4177_v12 = vpop.f32.mrf.mxu0 }
 0x7a9   : > { %v5093_v40 = vpop.f32.mrf.mxu0 }
 0x7ab   : > { %v4180_v30 = vpop.f32.mrf.mxu0 }
 0x7b7   : > { %v5096_v1 = vpop.f32.mrf.mxu0 }
 0x7b9   : > { %v4193_v6 = vpop.f32.mrf.mxu0 }
 0x7bb   : > { %v5097_v59 = vpop.f32.mrf.mxu0 }
 0x7bd   : > { %v4196_v13 = vpop.f32.mrf.mxu0 }
 0x822   : > { %v5020_v50 = vpop.f32.mrf.mxu1 }
 0x824   : > { %v5021_v42 = vpop.f32.mrf.mxu1 }
 0x825   : > { %v5022_v3 = vadd.f32 %v5021_v42, %v5020_v50 }
 0x826   : > { %v5023_v57 = vpop.f32.mrf.mxu1 }
 0x827   : > { %v4113_v35 = vadd.f32 %v5022_v3, %v7055_v17 }
 0x828   : > { %v5024_v58 = vpop.f32.mrf.mxu1 }
 0x829   : > { %v4178_v36 = vadd.f32 %v4177_v12, %v4113_v35  ;;  %v5025_v2 = vadd.f32 %v5024_v58, %v5023_v57 }
 0x82b   : > { %vm4208_vm2 = vcmp.gt.f32.partialorder %v4178_v36, 0.0  ;;  %v4216_v55 = vmul.f32 0.1, %v4178_v36  ;;  %v4116_v25 = vadd.f32 %v5025_v2, %v7055_v17  ;;  %v7121_v2 = vld [vmem:[#allocation3_spill] sm:$0xff] }
 0x82d   : > { %v4224_v47 = vsel %vm4208_vm2, %v4178_v36, %v4216_v55  ;;  %v4181_v29 = vadd.f32 %v4180_v30, %v4116_v25 }
 0x82e   : > { %v4232_v16 = vadd.f32 %v4224_v47, %v5586_v32  ;;  %v5026_v38 = vpop.f32.mrf.mxu1 }
 0x82f   : > { %vm4209_vm8 = vcmp.gt.f32.partialorder %v4181_v29, 0.0  ;;  %v4217_v61 = vmul.f32 0.1, %v4181_v29 }
 0x830   : > { %4240 = vst [vmem:[%s5498_s22] sm:$0xff] %v4232_v16  ;;  %v5027_v4 = vpop.f32.mrf.mxu1 }
 0x831   : > { %v4225_v41 = vsel %vm4209_vm8, %v4181_v29, %v4217_v61  ;;  %v5028_v7 = vadd.f32 %v5027_v4, %v5026_v38 }
 0x832   : > { %v4233_v46 = vadd.f32 %v4225_v41, %v5589_v33  ;;  %v5029_v11 = vpop.f32.mrf.mxu1 }
 0x833   : > { %v4121_v28 = vadd.f32 %v5028_v7, %v7055_v17 }
 0x834   : > { %4241 = vst [vmem:[%s5498_s22 + $0x8] sm:$0xff] %v4233_v46  ;;  %v5030_v44 = vpop.f32.mrf.mxu1 }
 0x835   : > { %v4186_v54 = vadd.f32 %v5092_v9, %v4121_v28  ;;  %v5031_v51 = vadd.f32 %v5030_v44, %v5029_v11 }
 0x836   : > { %v5032_v63 = vpop.f32.mrf.mxu1 }
 0x837   : > { %vm4210_vm9 = vcmp.gt.f32.partialorder %v4186_v54, 0.0  ;;  %v4218_v32 = vmul.f32 0.1, %v4186_v54  ;;  %v4124_v52 = vadd.f32 %v5031_v51, %v7055_v17 }
 0x838   : > { %v5033_v53 = vpop.f32.mrf.mxu1 }
 0x839   : > { %v4226_v27 = vsel %vm4210_vm9, %v4186_v54, %v4218_v32  ;;  %v4189_v20 = vadd.f32 %v5093_v40, %v4124_v52  ;;  %v5034_v49 = vadd.f32 %v5033_v53, %v5032_v63 }
 0x83a   : > { %v4234_v33 = vadd.f32 %v4226_v27, %v5592_v34  ;;  %v5035_v21 = vpop.f32.mrf.mxu1 }
 0x83b   : > { %vm4211_vm10 = vcmp.gt.f32.partialorder %v4189_v20, 0.0  ;;  %v4219_v15 = vmul.f32 0.1, %v4189_v20  ;;  %v4129_v23 = vadd.f32 %v5034_v49, %v7055_v17 }
 0x83c   : > { %4242 = vst [vmem:[%s5498_s22 + $0x10] sm:$0xff] %v4234_v33  ;;  %v5036_v37 = vpop.f32.mrf.mxu1 }
 0x83d   : > { %v4227_v26 = vsel %vm4211_vm10, %v4189_v20, %v4219_v15  ;;  %v4194_v8 = vadd.f32 %v4193_v6, %v4129_v23  ;;  %v5037_v24 = vadd.f32 %v5036_v37, %v5035_v21 }
 0x83e   : > { %v4235_v56 = vadd.f32 %v4227_v26, %v5603_v39  ;;  %v5038_v31 = vpop.f32.mrf.mxu1 }
 0x83f   : > { %vm4212_vm11 = vcmp.gt.f32.partialorder %v4194_v8, 0.0  ;;  %v4220_v18 = vmul.f32 0.1, %v4194_v8  ;;  %v4132_v34 = vadd.f32 %v5037_v24, %v7055_v17 }
 0x840   : > { %4243 = vst [vmem:[%s5498_s22 + $0x18] sm:$0xff] %v4235_v56  ;;  %v5039_v5 = vpop.f32.mrf.mxu1 }
 0x841   : > { %v4228_v60 = vsel %vm4212_vm11, %v4194_v8, %v4220_v18  ;;  %v4197_v62 = vadd.f32 %v4196_v13, %v4132_v34  ;;  %v5040_v14 = vadd.f32 %v5039_v5, %v5038_v31 }
 0x842   : > { %v4236_v0 = vadd.f32 %v4228_v60, %v5608_v43  ;;  %v5041_v19 = vpop.f32.mrf.mxu1 }
 0x843   : > { %vm4213_vm12 = vcmp.gt.f32.partialorder %v4197_v62, 0.0  ;;  %v4221_v45 = vmul.f32 0.1, %v4197_v62  ;;  %v4137_v39 = vadd.f32 %v5040_v14, %v7055_v17 }
 0x844   : > { %4244 = vst [vmem:[%s5498_s22 + $0x20] sm:$0xff] %v4236_v0  ;;  %v5042_v22 = vpop.f32.mrf.mxu1 }
 0x845   : > { %v4229_v9 = vsel %vm4213_vm12, %v4197_v62, %v4221_v45  ;;  %v4202_v50 = vadd.f32 %v5096_v1, %v4137_v39  ;;  %v5043_v12 = vadd.f32 %v5042_v22, %v5041_v19 }
 0x846   : > { %v4237_v42 = vadd.f32 %v4229_v9, %v5611_v48 }
 0x847   : > { %vm4214_vm13 = vcmp.gt.f32.partialorder %v4202_v50, 0.0  ;;  %v4222_v3 = vmul.f32 0.1, %v4202_v50  ;;  %v4140_v57 = vadd.f32 %v5043_v12, %v7055_v17 }
 0x848   : > { %4245 = vst [vmem:[%s5498_s22 + $0x28] sm:$0xff] %v4237_v42 }
 0x849   : > { %v4230_v43 = vsel %vm4214_vm13, %v4202_v50, %v4222_v3  ;;  %v4205_v35 = vadd.f32 %v5097_v59, %v4140_v57 }
 0x84a   : > { %v4238_v40 = vadd.f32 %v4230_v43, %v5637_v10 }
 0x84b   : > { %vm4215_vm14 = vcmp.gt.f32.partialorder %v4205_v35, 0.0  ;;  %v4223_v58 = vmul.f32 0.1, %v4205_v35 }
 0x84c   : > { %4246 = vst [vmem:[%s5498_s22 + $0x30] sm:$0xff] %v4238_v40 }
 0x84d   : > { %v4231_v36 = vsel %vm4215_vm14, %v4205_v35, %v4223_v58 }
 0x84e   : > { %v4239_v55 = vadd.f32 %v4231_v36, %v7121_v2 }
 0x850   : > { %4247 = vst [vmem:[%s5498_s22 + $0x38] sm:$0xff] %v4239_v55 }
 0x851 PF: > { %s25_s18 = sadd.s32 1, %s5338_s18  }
 0x852   : > { %p22_p5 = scmp.ge.s32.totalorder %s25_s18, 4  }
 0x854   :  { %24 = sbr.rel (!%p22_p5) target bundleno = 1 (0x1), region = 136 }

</bundles_post_ra>
